<compile_context>
chip_gen: v6e
topology: v6e:2x2x1
jax: 0.10.0
libtpu: 0.0.40
codegen_flags: <defaults>
</compile_context>

<pallas_src>
import functools

import numpy as np

import jax
import jax.numpy as jnp
from jax import lax
from jax.experimental import pallas as pl
from jax.experimental.pallas import tpu as pltpu


# ----------------------------------------------------------------------------
# Small host-side constants (vectorized numpy, cached).
# ----------------------------------------------------------------------------
def _elu(v):
    # ELU(alpha=1): x if x > 0 else exp(x) - 1  (exp of min(x,0) avoids overflow)
    return jnp.where(v > 0.0, v, jnp.exp(jnp.minimum(v, 0.0)) - 1.0)


@functools.lru_cache(maxsize=None)
def _tap_masks_np(S, b_tile):
    """(9, b_tile*S*S) {0,1} masks: validity of tap t at each target position."""
    h = np.arange(S).reshape(S, 1)
    w = np.arange(S).reshape(1, S)
    masks = np.zeros((9, S, S), np.float32)
    for t in range(9):
        dy, dx = t // 3 - 1, t % 3 - 1
        masks[t] = ((h + dy >= 0) & (h + dy < S) &
                    (w + dx >= 0) & (w + dx < S)).astype(np.float32)
    masks = masks.reshape(9, S * S)
    return np.tile(masks, (1, b_tile))


@functools.lru_cache(maxsize=None)
def _pool_matrix_np(S):
    """(S*S, (S//2)**2) per-image operator: x_flat @ P == 2x2 avg pool."""
    So = S // 2
    P = np.zeros((S * S, So * So), np.float32)
    idx = np.arange(S * S)
    h, w = idx // S, idx % S
    P[idx, (h // 2) * So + (w // 2)] = 0.25
    return P


def _pick_b_tile(n):
    """Largest divisor of n that is <= 8 and keeps >= 2 grid steps (v7x: 2 TCs)."""
    best = None
    for bt in range(min(n, 8), 0, -1):
        if n % bt == 0:
            if n // bt >= 2:
                return bt
            if best is None:
                best = bt
    return best if best is not None else n


# ----------------------------------------------------------------------------
# Fused whole-network Pallas kernel.
# ----------------------------------------------------------------------------
def discriminator_pallas(x_nchw, params, conv_dim, image_size, z_dim,
                         compute_dtype=jnp.bfloat16, b_tile=None):
    N = x_nchw.shape[0]
    S0 = image_size
    assert S0 % 16 == 0, "image_size must be a multiple of 16"
    cd = conv_dim
    s_enc = S0 // 16
    ss = s_enc * s_enc

    if b_tile is None:
        b_tile = _pick_b_tile(N)
    assert N % b_tile == 0
    n_steps = N // b_tile

    # ---- glue: (N,3,S0,S0) -> (n_steps, 3, b_tile*S0*S0) channels-in-sublanes
    x_g = (x_nchw.reshape(n_steps, b_tile, 3, S0 * S0)
           .transpose(0, 2, 1, 3)
           .reshape(n_steps, 3, b_tile * S0 * S0)
           .astype(jnp.float32))

    # ---- assemble kernel operands -------------------------------------------
    inputs = [x_g]
    in_specs = [pl.BlockSpec((1, 3, b_tile * S0 * S0), lambda n: (n, 0, 0))]
    idx = {}

    def add_const(name, arr):
        idx[name] = len(inputs)
        inputs.append(arr)
        nd = arr.ndim
        in_specs.append(pl.BlockSpec(arr.shape, lambda n, _nd=nd: (0,) * _nd))

    stage_sizes = [S0, S0 // 2, S0 // 4, S0 // 8]
    for S in stage_sizes:
        add_const(f"mask{S}", jnp.asarray(_tap_masks_np(S, b_tile), jnp.float32))
        add_const(f"pool{S}", jnp.asarray(_pool_matrix_np(S), compute_dtype))

    def add_conv3(name):
        w, b = params[name + "_w"], params[name + "_b"]     # HWIO (3,3,Cin,Cout)
        _, _, cin, cout = w.shape
        wt = jnp.transpose(w.reshape(9, cin, cout), (2, 0, 1)).reshape(cout, 9 * cin)
        add_const(name + "_w", wt.astype(compute_dtype))
        add_const(name + "_b", b.reshape(cout, 1).astype(jnp.float32))

    def add_conv1(name):
        w, b = params[name + "_w"], params[name + "_b"]     # (1,1,Cin,Cout)
        cin, cout = w.shape[2], w.shape[3]
        add_const(name + "_w", jnp.transpose(w.reshape(cin, cout)).astype(compute_dtype))
        add_const(name + "_b", b.reshape(cout, 1).astype(jnp.float32))

    def add_encode():
        w, b = params["encode_w"], params["encode_b"]       # (s,s,4cd,z)
        kh, kw, cin, cout = w.shape
        wt = jnp.transpose(w.reshape(kh * kw, cin, cout),
                           (2, 0, 1)).reshape(cout, kh * kw * cin)
        add_const("encode_w", wt.astype(compute_dtype))
        add_const("encode_b", b.reshape(cout, 1).astype(jnp.float32))

    # ---- static layer plan (fully unrolled at trace time) --------------------
    add_conv3("conv1")
    plan = [("c3", "conv1", S0, 3, cd, True)]
    size, cin_cur = S0, cd
    for blk, cout_blk in (("conv2", cd), ("conv3", 2 * cd),
                          ("conv4", 3 * cd), ("conv5", 4 * cd)):
        add_conv3(blk + "_1")
        add_conv3(blk + "_2")
        add_conv1(blk + "_3")
        plan += [("c3", blk + "_1", size, cin_cur, cin_cur, True),
                 ("c3", blk + "_2", size, cin_cur, cin_cur, True),
                 ("c1", blk + "_3", size, cin_cur, cout_blk, False),
                 ("pool", None, size, cout_blk, cout_blk, False)]
        size //= 2
        cin_cur = cout_blk
    add_encode()
    plan.append(("enc", "encode", size, 4 * cd, z_dim, False))

    # ---- scratch sizing -------------------------------------------------------
    c_max = max(3, 4 * cd)                       # widest activation (channels)
    l_max = b_tile * S0 * S0                     # widest activation (lanes)
    r_max = max(27, 9 * 3 * cd, ss * 4 * cd)     # widest im2col (rows)
    n_in = len(inputs)

    def kernel(*refs):
        out_ref = refs[n_in]
        act_a = refs[n_in + 1]
        act_b = refs[n_in + 2]
        col = refs[n_in + 3]
        x_ref = refs[0]

        bufs = (act_a, act_b)
        cur = 0
        L0 = b_tile * S0 * S0
        act_a[0:3, 0:L0] = x_ref[0]                          # f32 activation

        for op, name, S, cin, cout, apply_elu in plan:
            L = b_tile * S * S
            src = bufs[cur]
            dst = bufs[1 - cur]
            if op == "c3":
                m_ref = refs[idx[f"mask{S}"]]
                w_ref = refs[idx[name + "_w"]]
                b_ref = refs[idx[name + "_b"]]
                rows = 9 * cin
                # zero staging region (border columns that are never written)
                col[0:rows, 0:L] = jnp.zeros((rows, L), jnp.float32)
                for t in range(9):
                    dy, dx = t // 3 - 1, t % 3 - 1
                    off = dy * S + dx
                    width = L - abs(off)
                    s0 = max(off, 0)        # source lane start
                    d0 = max(-off, 0)       # destination lane start
                    tap = (src[0:cin, s0:s0 + width]
                           * m_ref[t:t + 1, d0:d0 + width])
                    col[t * cin:t * cin + cin, d0:d0 + width] = tap
                acc = jnp.dot(w_ref[...],
                              col[0:rows, 0:L].astype(compute_dtype),
                              preferred_element_type=jnp.float32)
                acc = acc + b_ref[...]
                if apply_elu:
                    acc = _elu(acc)
                dst[0:cout, 0:L] = acc
                cur = 1 - cur
            elif op == "c1":
                w_ref = refs[idx[name + "_w"]]
                b_ref = refs[idx[name + "_b"]]
                acc = jnp.dot(w_ref[...],
                              src[0:cin, 0:L].astype(compute_dtype),
                              preferred_element_type=jnp.float32) + b_ref[...]
                dst[0:cout, 0:L] = acc
                cur = 1 - cur
            elif op == "pool":
                p_ref = refs[idx[f"pool{S}"]]
                hw = S * S
                hwo = (S // 2) * (S // 2)
                for b in range(b_tile):
                    part = jnp.dot(
                        src[0:cin, b * hw:(b + 1) * hw].astype(compute_dtype),
                        p_ref[...], preferred_element_type=jnp.float32)
                    dst[0:cin, b * hwo:(b + 1) * hwo] = part
                cur = 1 - cur
            else:  # "enc": (s x s) valid conv -> 1x1 output per image
                w_ref = refs[idx["encode_w"]]
                b_ref = refs[idx["encode_b"]]
                rows = S * S * cin
                col[0:rows, 0:L] = jnp.zeros((rows, L), jnp.float32)
                for p in range(S * S):
                    width = L - p
                    col[p * cin:p * cin + cin, 0:width] = src[0:cin, p:p + width]
                res = jnp.dot(w_ref[...],
                              col[0:rows, 0:L].astype(compute_dtype),
                              preferred_element_type=jnp.float32) + b_ref[...]
                out_ref[0] = res                 # (z_dim, b_tile*ss); col b*ss valid

    # ---- VMEM budget derived from operand sizes (not hard-coded) -------------
    def _nbytes(a):
        return int(np.prod(a.shape)) * jnp.dtype(a.dtype).itemsize
    operand_bytes = sum(_nbytes(a) for a in inputs)
    operand_bytes += n_steps and (z_dim * b_tile * ss * 4)
    scratch_bytes = (2 * c_max * l_max + r_max * l_max) * 4
    vmem_bytes = int(min(max(8 * 1024 * 1024,
                             3 * (operand_bytes + scratch_bytes)),
                         48 * 1024 * 1024))

    out3 = pl.pallas_call(
        kernel,
        out_shape=jax.ShapeDtypeStruct((n_steps, z_dim, b_tile * ss), jnp.float32),
        grid=(n_steps,),
        in_specs=in_specs,
        out_specs=pl.BlockSpec((1, z_dim, b_tile * ss), lambda n: (n, 0, 0)),
        scratch_shapes=[pltpu.VMEM((c_max, l_max), jnp.float32),
                        pltpu.VMEM((c_max, l_max), jnp.float32),
                        pltpu.VMEM((r_max, l_max), jnp.float32)],
        compiler_params=pltpu.CompilerParams(
            dimension_semantics=("parallel",),
            vmem_limit_bytes=vmem_bytes),
    )(*inputs)

    # keep only the valid encode column (p == 0) of each image, back to NCHW
    out = (out3.reshape(n_steps, z_dim, b_tile, ss)[:, :, :, 0]
           .transpose(0, 2, 1)
           .reshape(N, z_dim, 1, 1))
    return out


# ----------------------------------------------------------------------------
# Pure-JAX reference (lax.conv based) with the same bf16-operand / f32-accum
# rounding points as the kernel.
# ----------------------------------------------------------------------------
def discriminator_reference(x_nchw, params, conv_dim, image_size, z_dim,
                            compute_dtype=jnp.bfloat16):
    def conv(x, w, b, pad, act):
        y = lax.conv_general_dilated(
            x.astype(compute_dtype), w.astype(compute_dtype),
            window_strides=(1, 1),
            padding=[(pad, pad), (pad, pad)],
            dimension_numbers=("NHWC", "HWIO", "NHWC"),
            preferred_element_type=jnp.float32)
        y = y + b.astype(jnp.float32)
        return _elu(y) if act else y

    def pool(x):
        n, h, w, c = x.shape
        xb = x.astype(compute_dtype).astype(jnp.float32)   # mirror kernel rounding
        return xb.reshape(n, h // 2, 2, w // 2, 2, c).mean(axis=(2, 4))

    x = jnp.transpose(x_nchw, (0, 2, 3, 1)).astype(jnp.float32)
    x = conv(x, params["conv1_w"], params["conv1_b"], 1, True)
    for blk in ("conv2", "conv3", "conv4", "conv5"):
        x = conv(x, params[blk + "_1_w"], params[blk + "_1_b"], 1, True)
        x = conv(x, params[blk + "_2_w"], params[blk + "_2_b"], 1, True)
        x = conv(x, params[blk + "_3_w"], params[blk + "_3_b"], 0, False)
        x = pool(x)
    x = conv(x, params["encode_w"], params["encode_b"], 0, False)
    return jnp.transpose(x, (0, 3, 1, 2))                    # (N, z, 1, 1)


# ----------------------------------------------------------------------------
# Parameter init (HWIO layout, fan-in scaled so activations stay O(1))
# ----------------------------------------------------------------------------
def init_params(key, conv_dim, image_size, z_dim):
    cd = conv_dim
    s = image_size // 16
    shapes = {"conv1": (3, 3, 3, cd)}
    blocks = [("conv2", cd, cd), ("conv3", cd, 2 * cd),
              ("conv4", 2 * cd, 3 * cd), ("conv5", 3 * cd, 4 * cd)]
    for name, cin, cout in blocks:
        shapes[name + "_1"] = (3, 3, cin, cin)
        shapes[name + "_2"] = (3, 3, cin, cin)
        shapes[name + "_3"] = (1, 1, cin, cout)
    shapes["encode"] = (s, s, 4 * cd, z_dim)

    params = {}
    names = sorted(shapes)
    keys = jax.random.split(key, 2 * len(names))
    for i, name in enumerate(names):
        kh, kw, cin, cout = shapes[name]
        std = 1.0 / float(np.sqrt(kh * kw * cin))
        params[name + "_w"] = std * jax.random.normal(
            keys[2 * i], shapes[name], jnp.float32)
        params[name + "_b"] = 0.05 * jax.random.normal(
            keys[2 * i + 1], (cout,), jnp.float32)
    return params


if __name__ == "__main__":
    N, conv_dim, image_size, z_dim = 2, 8, 16, 16

    key = jax.random.PRNGKey(0)
    key_x, key_p = jax.random.split(key)
    x = jax.random.normal(key_x, (N, 3, image_size, image_size), jnp.float32)
    params = init_params(key_p, conv_dim, image_size, z_dim)

    @jax.jit
    def fwd(x_in, p):
        return discriminator_pallas(x_in, p, conv_dim, image_size, z_dim)

    out = jax.block_until_ready(fwd(x, params))
    assert out.shape == (N, z_dim, 1, 1), out.shape

    ref = jax.block_until_ready(
        discriminator_reference(x, params, conv_dim, image_size, z_dim))

    scale = max(float(jnp.max(jnp.abs(ref))), 1e-6)
    if not bool(jnp.allclose(out, ref, rtol=5e-3, atol=5e-3 * scale)):
        max_err = float(jnp.max(jnp.abs(out - ref)))
        raise SystemExit(f"Pallas output does not match reference (max err {max_err})")

    print("KERNEL_OK")
</pallas_src>

<mosaic_0001>
module attributes {stable_mosaic.version = 11 : i64} {
  func.func @kernel(%arg0: i32, %arg1: memref<1x3x256xf32, #tpu.memory_space<vmem>>, %arg2: memref<9x256xf32, #tpu.memory_space<vmem>>, %arg3: memref<256x64xbf16, #tpu.memory_space<vmem>>, %arg4: memref<9x64xf32, #tpu.memory_space<vmem>>, %arg5: memref<64x16xbf16, #tpu.memory_space<vmem>>, %arg6: memref<9x16xf32, #tpu.memory_space<vmem>>, %arg7: memref<16x4xbf16, #tpu.memory_space<vmem>>, %arg8: memref<9x4xf32, #tpu.memory_space<vmem>>, %arg9: memref<4x1xbf16, #tpu.memory_space<vmem>>, %arg10: memref<8x27xbf16, #tpu.memory_space<vmem>>, %arg11: memref<8x1xf32, #tpu.memory_space<vmem>>, %arg12: memref<8x72xbf16, #tpu.memory_space<vmem>>, %arg13: memref<8x1xf32, #tpu.memory_space<vmem>>, %arg14: memref<8x72xbf16, #tpu.memory_space<vmem>>, %arg15: memref<8x1xf32, #tpu.memory_space<vmem>>, %arg16: memref<8x8xbf16, #tpu.memory_space<vmem>>, %arg17: memref<8x1xf32, #tpu.memory_space<vmem>>, %arg18: memref<8x72xbf16, #tpu.memory_space<vmem>>, %arg19: memref<8x1xf32, #tpu.memory_space<vmem>>, %arg20: memref<8x72xbf16, #tpu.memory_space<vmem>>, %arg21: memref<8x1xf32, #tpu.memory_space<vmem>>, %arg22: memref<16x8xbf16, #tpu.memory_space<vmem>>, %arg23: memref<16x1xf32, #tpu.memory_space<vmem>>, %arg24: memref<16x144xbf16, #tpu.memory_space<vmem>>, %arg25: memref<16x1xf32, #tpu.memory_space<vmem>>, %arg26: memref<16x144xbf16, #tpu.memory_space<vmem>>, %arg27: memref<16x1xf32, #tpu.memory_space<vmem>>, %arg28: memref<24x16xbf16, #tpu.memory_space<vmem>>, %arg29: memref<24x1xf32, #tpu.memory_space<vmem>>, %arg30: memref<24x216xbf16, #tpu.memory_space<vmem>>, %arg31: memref<24x1xf32, #tpu.memory_space<vmem>>, %arg32: memref<24x216xbf16, #tpu.memory_space<vmem>>, %arg33: memref<24x1xf32, #tpu.memory_space<vmem>>, %arg34: memref<32x24xbf16, #tpu.memory_space<vmem>>, %arg35: memref<32x1xf32, #tpu.memory_space<vmem>>, %arg36: memref<16x32xbf16, #tpu.memory_space<vmem>>, %arg37: memref<16x1xf32, #tpu.memory_space<vmem>>, %arg38: memref<1x16x1xf32, #tpu.memory_space<vmem>>, %arg39: memref<32x256xf32, #tpu.memory_space<vmem>>, %arg40: memref<32x256xf32, #tpu.memory_space<vmem>>, %arg41: memref<216x256xf32, #tpu.memory_space<vmem>>) attributes {dimension_semantics = [#tpu.dimension_semantics<parallel>], iteration_bounds = array<i64: 2>, scalar_prefetch = 0 : i64, scratch_operands = 3 : i64, tpu.core_type = #tpu.core_type<tc>, window_params = [{transform_indices = @transform_0, window_bounds = array<i64: 1, 3, 256>}, {pipeline_mode = #tpu.pipeline_mode<synchronous>, transform_indices = @transform_1, window_bounds = array<i64: 9, 256>}, {pipeline_mode = #tpu.pipeline_mode<synchronous>, transform_indices = @transform_2, window_bounds = array<i64: 256, 64>}, {pipeline_mode = #tpu.pipeline_mode<synchronous>, transform_indices = @transform_3, window_bounds = array<i64: 9, 64>}, {pipeline_mode = #tpu.pipeline_mode<synchronous>, transform_indices = @transform_4, window_bounds = array<i64: 64, 16>}, {pipeline_mode = #tpu.pipeline_mode<synchronous>, transform_indices = @transform_5, window_bounds = array<i64: 9, 16>}, {pipeline_mode = #tpu.pipeline_mode<synchronous>, transform_indices = @transform_6, window_bounds = array<i64: 16, 4>}, {pipeline_mode = #tpu.pipeline_mode<synchronous>, transform_indices = @transform_7, window_bounds = array<i64: 9, 4>}, {pipeline_mode = #tpu.pipeline_mode<synchronous>, transform_indices = @transform_8, window_bounds = array<i64: 4, 1>}, {pipeline_mode = #tpu.pipeline_mode<synchronous>, transform_indices = @transform_9, window_bounds = array<i64: 8, 27>}, {pipeline_mode = #tpu.pipeline_mode<synchronous>, transform_indices = @transform_10, window_bounds = array<i64: 8, 1>}, {pipeline_mode = #tpu.pipeline_mode<synchronous>, transform_indices = @transform_11, window_bounds = array<i64: 8, 72>}, {pipeline_mode = #tpu.pipeline_mode<synchronous>, transform_indices = @transform_12, window_bounds = array<i64: 8, 1>}, {pipeline_mode = #tpu.pipeline_mode<synchronous>, transform_indices = @transform_13, window_bounds = array<i64: 8, 72>}, {pipeline_mode = #tpu.pipeline_mode<synchronous>, transform_indices = @transform_14, window_bounds = array<i64: 8, 1>}, {pipeline_mode = #tpu.pipeline_mode<synchronous>, transform_indices = @transform_15, window_bounds = array<i64: 8, 8>}, {pipeline_mode = #tpu.pipeline_mode<synchronous>, transform_indices = @transform_16, window_bounds = array<i64: 8, 1>}, {pipeline_mode = #tpu.pipeline_mode<synchronous>, transform_indices = @transform_17, window_bounds = array<i64: 8, 72>}, {pipeline_mode = #tpu.pipeline_mode<synchronous>, transform_indices = @transform_18, window_bounds = array<i64: 8, 1>}, {pipeline_mode = #tpu.pipeline_mode<synchronous>, transform_indices = @transform_19, window_bounds = array<i64: 8, 72>}, {pipeline_mode = #tpu.pipeline_mode<synchronous>, transform_indices = @transform_20, window_bounds = array<i64: 8, 1>}, {pipeline_mode = #tpu.pipeline_mode<synchronous>, transform_indices = @transform_21, window_bounds = array<i64: 16, 8>}, {pipeline_mode = #tpu.pipeline_mode<synchronous>, transform_indices = @transform_22, window_bounds = array<i64: 16, 1>}, {pipeline_mode = #tpu.pipeline_mode<synchronous>, transform_indices = @transform_23, window_bounds = array<i64: 16, 144>}, {pipeline_mode = #tpu.pipeline_mode<synchronous>, transform_indices = @transform_24, window_bounds = array<i64: 16, 1>}, {pipeline_mode = #tpu.pipeline_mode<synchronous>, transform_indices = @transform_25, window_bounds = array<i64: 16, 144>}, {pipeline_mode = #tpu.pipeline_mode<synchronous>, transform_indices = @transform_26, window_bounds = array<i64: 16, 1>}, {pipeline_mode = #tpu.pipeline_mode<synchronous>, transform_indices = @transform_27, window_bounds = array<i64: 24, 16>}, {pipeline_mode = #tpu.pipeline_mode<synchronous>, transform_indices = @transform_28, window_bounds = array<i64: 24, 1>}, {pipeline_mode = #tpu.pipeline_mode<synchronous>, transform_indices = @transform_29, window_bounds = array<i64: 24, 216>}, {pipeline_mode = #tpu.pipeline_mode<synchronous>, transform_indices = @transform_30, window_bounds = array<i64: 24, 1>}, {pipeline_mode = #tpu.pipeline_mode<synchronous>, transform_indices = @transform_31, window_bounds = array<i64: 24, 216>}, {pipeline_mode = #tpu.pipeline_mode<synchronous>, transform_indices = @transform_32, window_bounds = array<i64: 24, 1>}, {pipeline_mode = #tpu.pipeline_mode<synchronous>, transform_indices = @transform_33, window_bounds = array<i64: 32, 24>}, {pipeline_mode = #tpu.pipeline_mode<synchronous>, transform_indices = @transform_34, window_bounds = array<i64: 32, 1>}, {pipeline_mode = #tpu.pipeline_mode<synchronous>, transform_indices = @transform_35, window_bounds = array<i64: 16, 32>}, {pipeline_mode = #tpu.pipeline_mode<synchronous>, transform_indices = @transform_36, window_bounds = array<i64: 16, 1>}, {transform_indices = @transform_37, window_bounds = array<i64: 1, 16, 1>}]} {
    %c0 = arith.constant 0 : index
    %c0_0 = arith.constant 0 : index
    %c0_1 = arith.constant 0 : index
    %0 = vector.load %arg1[%c0, %c0_0, %c0_1] : memref<1x3x256xf32, #tpu.memory_space<vmem>>, vector<1x3x256xf32>
    %1 = vector.shape_cast %0 : vector<1x3x256xf32> to vector<3x256xf32>
    %c0_2 = arith.constant 0 : index
    %c0_3 = arith.constant 0 : index
    %2 = vector.load %arg39[%c0_2, %c0_3] : memref<32x256xf32, #tpu.memory_space<vmem>>, vector<3x256xf32>
    tpu.vector_store %arg39[%c0_2, %c0_3], %1 {strides = array<i32>} : memref<32x256xf32, #tpu.memory_space<vmem>>, vector<3x256xf32>,
    %cst = arith.constant 0.000000e+00 : f32
    %3 = vector.broadcast %cst : f32 to vector<27x256xf32>
    %c0_4 = arith.constant 0 : index
    %c0_5 = arith.constant 0 : index
    %4 = vector.load %arg41[%c0_4, %c0_5] : memref<216x256xf32, #tpu.memory_space<vmem>>, vector<27x256xf32>
    tpu.vector_store %arg41[%c0_4, %c0_5], %3 {strides = array<i32>} : memref<216x256xf32, #tpu.memory_space<vmem>>, vector<27x256xf32>,
    %c0_6 = arith.constant 0 : index
    %c0_7 = arith.constant 0 : index
    %5 = vector.load %arg39[%c0_6, %c0_7] : memref<32x256xf32, #tpu.memory_space<vmem>>, vector<3x239xf32>
    %c0_8 = arith.constant 0 : index
    %c17 = arith.constant 17 : index
    %6 = vector.load %arg2[%c0_8, %c17] : memref<9x256xf32, #tpu.memory_space<vmem>>, vector<1x239xf32>
    %7 = vector.broadcast %6 : vector<1x239xf32> to vector<3x239xf32>
    %8 = arith.mulf %5, %7 : vector<3x239xf32>
    %c0_9 = arith.constant 0 : index
    %c17_10 = arith.constant 17 : index
    %9 = vector.load %arg41[%c0_9, %c17_10] : memref<216x256xf32, #tpu.memory_space<vmem>>, vector<3x239xf32>
    tpu.vector_store %arg41[%c0_9, %c17_10], %8 {strides = array<i32>} : memref<216x256xf32, #tpu.memory_space<vmem>>, vector<3x239xf32>,
    %c0_11 = arith.constant 0 : index
    %c0_12 = arith.constant 0 : index
    %10 = vector.load %arg39[%c0_11, %c0_12] : memref<32x256xf32, #tpu.memory_space<vmem>>, vector<3x240xf32>
    %c1 = arith.constant 1 : index
    %c16 = arith.constant 16 : index
    %11 = vector.load %arg2[%c1, %c16] : memref<9x256xf32, #tpu.memory_space<vmem>>, vector<1x240xf32>
    %12 = vector.broadcast %11 : vector<1x240xf32> to vector<3x240xf32>
    %13 = arith.mulf %10, %12 : vector<3x240xf32>
    %c3 = arith.constant 3 : index
    %c16_13 = arith.constant 16 : index
    %14 = vector.load %arg41[%c3, %c16_13] : memref<216x256xf32, #tpu.memory_space<vmem>>, vector<3x240xf32>
    tpu.vector_store %arg41[%c3, %c16_13], %13 {strides = array<i32>} : memref<216x256xf32, #tpu.memory_space<vmem>>, vector<3x240xf32>,
    %c0_14 = arith.constant 0 : index
    %c0_15 = arith.constant 0 : index
    %15 = vector.load %arg39[%c0_14, %c0_15] : memref<32x256xf32, #tpu.memory_space<vmem>>, vector<3x241xf32>
    %c2 = arith.constant 2 : index
    %c15 = arith.constant 15 : index
    %16 = vector.load %arg2[%c2, %c15] : memref<9x256xf32, #tpu.memory_space<vmem>>, vector<1x241xf32>
    %17 = vector.broadcast %16 : vector<1x241xf32> to vector<3x241xf32>
    %18 = arith.mulf %15, %17 : vector<3x241xf32>
    %c6 = arith.constant 6 : index
    %c15_16 = arith.constant 15 : index
    %19 = vector.load %arg41[%c6, %c15_16] : memref<216x256xf32, #tpu.memory_space<vmem>>, vector<3x241xf32>
    tpu.vector_store %arg41[%c6, %c15_16], %18 {strides = array<i32>} : memref<216x256xf32, #tpu.memory_space<vmem>>, vector<3x241xf32>,
    %c0_17 = arith.constant 0 : index
    %c0_18 = arith.constant 0 : index
    %20 = vector.load %arg39[%c0_17, %c0_18] : memref<32x256xf32, #tpu.memory_space<vmem>>, vector<3x255xf32>
    %c3_19 = arith.constant 3 : index
    %c1_20 = arith.constant 1 : index
    %21 = vector.load %arg2[%c3_19, %c1_20] : memref<9x256xf32, #tpu.memory_space<vmem>>, vector<1x255xf32>
    %22 = vector.broadcast %21 : vector<1x255xf32> to vector<3x255xf32>
    %23 = arith.mulf %20, %22 : vector<3x255xf32>
    %c9 = arith.constant 9 : index
    %c1_21 = arith.constant 1 : index
    %24 = vector.load %arg41[%c9, %c1_21] : memref<216x256xf32, #tpu.memory_space<vmem>>, vector<3x255xf32>
    tpu.vector_store %arg41[%c9, %c1_21], %23 {strides = array<i32>} : memref<216x256xf32, #tpu.memory_space<vmem>>, vector<3x255xf32>,
    %c0_22 = arith.constant 0 : index
    %c0_23 = arith.constant 0 : index
    %25 = vector.load %arg39[%c0_22, %c0_23] : memref<32x256xf32, #tpu.memory_space<vmem>>, vector<3x256xf32>
    %c4 = arith.constant 4 : index
    %c0_24 = arith.constant 0 : index
    %26 = vector.load %arg2[%c4, %c0_24] : memref<9x256xf32, #tpu.memory_space<vmem>>, vector<1x256xf32>
    %27 = vector.broadcast %26 : vector<1x256xf32> to vector<3x256xf32>
    %28 = arith.mulf %25, %27 : vector<3x256xf32>
    %c12 = arith.constant 12 : index
    %c0_25 = arith.constant 0 : index
    %29 = vector.load %arg41[%c12, %c0_25] : memref<216x256xf32, #tpu.memory_space<vmem>>, vector<3x256xf32>
    tpu.vector_store %arg41[%c12, %c0_25], %28 {strides = array<i32>} : memref<216x256xf32, #tpu.memory_space<vmem>>, vector<3x256xf32>,
    %c0_26 = arith.constant 0 : index
    %c1_27 = arith.constant 1 : index
    %30 = vector.load %arg39[%c0_26, %c1_27] : memref<32x256xf32, #tpu.memory_space<vmem>>, vector<3x255xf32>
    %c5 = arith.constant 5 : index
    %c0_28 = arith.constant 0 : index
    %31 = vector.load %arg2[%c5, %c0_28] : memref<9x256xf32, #tpu.memory_space<vmem>>, vector<1x255xf32>
    %32 = vector.broadcast %31 : vector<1x255xf32> to vector<3x255xf32>
    %33 = arith.mulf %30, %32 : vector<3x255xf32>
    %c15_29 = arith.constant 15 : index
    %c0_30 = arith.constant 0 : index
    %34 = vector.load %arg41[%c15_29, %c0_30] : memref<216x256xf32, #tpu.memory_space<vmem>>, vector<3x255xf32>
    tpu.vector_store %arg41[%c15_29, %c0_30], %33 {strides = array<i32>} : memref<216x256xf32, #tpu.memory_space<vmem>>, vector<3x255xf32>,
    %c0_31 = arith.constant 0 : index
    %c15_32 = arith.constant 15 : index
    %35 = vector.load %arg39[%c0_31, %c15_32] : memref<32x256xf32, #tpu.memory_space<vmem>>, vector<3x241xf32>
    %c6_33 = arith.constant 6 : index
    %c0_34 = arith.constant 0 : index
    %36 = vector.load %arg2[%c6_33, %c0_34] : memref<9x256xf32, #tpu.memory_space<vmem>>, vector<1x241xf32>
    %37 = vector.broadcast %36 : vector<1x241xf32> to vector<3x241xf32>
    %38 = arith.mulf %35, %37 : vector<3x241xf32>
    %c18 = arith.constant 18 : index
    %c0_35 = arith.constant 0 : index
    %39 = vector.load %arg41[%c18, %c0_35] : memref<216x256xf32, #tpu.memory_space<vmem>>, vector<3x241xf32>
    tpu.vector_store %arg41[%c18, %c0_35], %38 {strides = array<i32>} : memref<216x256xf32, #tpu.memory_space<vmem>>, vector<3x241xf32>,
    %c0_36 = arith.constant 0 : index
    %c16_37 = arith.constant 16 : index
    %40 = vector.load %arg39[%c0_36, %c16_37] : memref<32x256xf32, #tpu.memory_space<vmem>>, vector<3x240xf32>
    %c7 = arith.constant 7 : index
    %c0_38 = arith.constant 0 : index
    %41 = vector.load %arg2[%c7, %c0_38] : memref<9x256xf32, #tpu.memory_space<vmem>>, vector<1x240xf32>
    %42 = vector.broadcast %41 : vector<1x240xf32> to vector<3x240xf32>
    %43 = arith.mulf %40, %42 : vector<3x240xf32>
    %c21 = arith.constant 21 : index
    %c0_39 = arith.constant 0 : index
    %44 = vector.load %arg41[%c21, %c0_39] : memref<216x256xf32, #tpu.memory_space<vmem>>, vector<3x240xf32>
    tpu.vector_store %arg41[%c21, %c0_39], %43 {strides = array<i32>} : memref<216x256xf32, #tpu.memory_space<vmem>>, vector<3x240xf32>,
    %c0_40 = arith.constant 0 : index
    %c17_41 = arith.constant 17 : index
    %45 = vector.load %arg39[%c0_40, %c17_41] : memref<32x256xf32, #tpu.memory_space<vmem>>, vector<3x239xf32>
    %c8 = arith.constant 8 : index
    %c0_42 = arith.constant 0 : index
    %46 = vector.load %arg2[%c8, %c0_42] : memref<9x256xf32, #tpu.memory_space<vmem>>, vector<1x239xf32>
    %47 = vector.broadcast %46 : vector<1x239xf32> to vector<3x239xf32>
    %48 = arith.mulf %45, %47 : vector<3x239xf32>
    %c24 = arith.constant 24 : index
    %c0_43 = arith.constant 0 : index
    %49 = vector.load %arg41[%c24, %c0_43] : memref<216x256xf32, #tpu.memory_space<vmem>>, vector<3x239xf32>
    tpu.vector_store %arg41[%c24, %c0_43], %48 {strides = array<i32>} : memref<216x256xf32, #tpu.memory_space<vmem>>, vector<3x239xf32>,
    %c0_44 = arith.constant 0 : index
    %c0_45 = arith.constant 0 : index
    %50 = vector.load %arg10[%c0_44, %c0_45] : memref<8x27xbf16, #tpu.memory_space<vmem>>, vector<8x27xbf16>
    %c0_46 = arith.constant 0 : index
    %c0_47 = arith.constant 0 : index
    %51 = vector.load %arg41[%c0_46, %c0_47] : memref<216x256xf32, #tpu.memory_space<vmem>>, vector<27x256xf32>
    %52 = arith.truncf %51 : vector<27x256xf32> to vector<27x256xbf16>
    %cst_48 = arith.constant dense<0.000000e+00> : vector<8x256xf32>
    %53 = tpu.matmul %50, %52, %cst_48 {dimension_numbers = #tpu.dot_dimension_numbers<[1], [0], [0], [1], [0, 0, 1, 1], [], []>} : vector<8x27xbf16>, vector<27x256xbf16>, vector<8x256xf32> -> vector<8x256xf32>
    %c0_49 = arith.constant 0 : index
    %c0_50 = arith.constant 0 : index
    %54 = vector.load %arg11[%c0_49, %c0_50] : memref<8x1xf32, #tpu.memory_space<vmem>>, vector<8x1xf32>
    %55 = vector.broadcast %54 : vector<8x1xf32> to vector<8x256xf32>
    %56 = arith.addf %53, %55 : vector<8x256xf32>
    %cst_51 = arith.constant 0.000000e+00 : f32
    %57 = vector.broadcast %cst_51 : f32 to vector<8x256xf32>
    %58 = arith.cmpf ogt, %56, %57 : vector<8x256xf32>
    %cst_52 = arith.constant 0.000000e+00 : f32
    %59 = vector.broadcast %cst_52 : f32 to vector<8x256xf32>
    %60 = arith.minimumf %56, %59 : vector<8x256xf32>
    %61 = math.exp %60 : vector<8x256xf32>
    %cst_53 = arith.constant 1.000000e+00 : f32
    %62 = vector.broadcast %cst_53 : f32 to vector<8x256xf32>
    %63 = arith.subf %61, %62 : vector<8x256xf32>
    %64 = arith.select %58, %56, %63 : vector<8x256xi1>, vector<8x256xf32>
    %c0_54 = arith.constant 0 : index
    %c0_55 = arith.constant 0 : index
    %65 = vector.load %arg40[%c0_54, %c0_55] : memref<32x256xf32, #tpu.memory_space<vmem>>, vector<8x256xf32>
    tpu.vector_store %arg40[%c0_54, %c0_55], %64 {strides = array<i32>} : memref<32x256xf32, #tpu.memory_space<vmem>>, vector<8x256xf32>,
    %cst_56 = arith.constant 0.000000e+00 : f32
    %66 = vector.broadcast %cst_56 : f32 to vector<72x256xf32>
    %c0_57 = arith.constant 0 : index
    %c0_58 = arith.constant 0 : index
    %67 = vector.load %arg41[%c0_57, %c0_58] : memref<216x256xf32, #tpu.memory_space<vmem>>, vector<72x256xf32>
    tpu.vector_store %arg41[%c0_57, %c0_58], %66 {strides = array<i32>} : memref<216x256xf32, #tpu.memory_space<vmem>>, vector<72x256xf32>,
    %c0_59 = arith.constant 0 : index
    %c0_60 = arith.constant 0 : index
    %68 = vector.load %arg40[%c0_59, %c0_60] : memref<32x256xf32, #tpu.memory_space<vmem>>, vector<8x239xf32>
    %c0_61 = arith.constant 0 : index
    %c17_62 = arith.constant 17 : index
    %69 = vector.load %arg2[%c0_61, %c17_62] : memref<9x256xf32, #tpu.memory_space<vmem>>, vector<1x239xf32>
    %70 = vector.broadcast %69 : vector<1x239xf32> to vector<8x239xf32>
    %71 = arith.mulf %68, %70 : vector<8x239xf32>
    %c0_63 = arith.constant 0 : index
    %c17_64 = arith.constant 17 : index
    %72 = vector.load %arg41[%c0_63, %c17_64] : memref<216x256xf32, #tpu.memory_space<vmem>>, vector<8x239xf32>
    tpu.vector_store %arg41[%c0_63, %c17_64], %71 {strides = array<i32>} : memref<216x256xf32, #tpu.memory_space<vmem>>, vector<8x239xf32>,
    %c0_65 = arith.constant 0 : index
    %c0_66 = arith.constant 0 : index
    %73 = vector.load %arg40[%c0_65, %c0_66] : memref<32x256xf32, #tpu.memory_space<vmem>>, vector<8x240xf32>
    %c1_67 = arith.constant 1 : index
    %c16_68 = arith.constant 16 : index
    %74 = vector.load %arg2[%c1_67, %c16_68] : memref<9x256xf32, #tpu.memory_space<vmem>>, vector<1x240xf32>
    %75 = vector.broadcast %74 : vector<1x240xf32> to vector<8x240xf32>
    %76 = arith.mulf %73, %75 : vector<8x240xf32>
    %c8_69 = arith.constant 8 : index
    %c16_70 = arith.constant 16 : index
    %77 = vector.load %arg41[%c8_69, %c16_70] : memref<216x256xf32, #tpu.memory_space<vmem>>, vector<8x240xf32>
    tpu.vector_store %arg41[%c8_69, %c16_70], %76 {strides = array<i32>} : memref<216x256xf32, #tpu.memory_space<vmem>>, vector<8x240xf32>,
    %c0_71 = arith.constant 0 : index
    %c0_72 = arith.constant 0 : index
    %78 = vector.load %arg40[%c0_71, %c0_72] : memref<32x256xf32, #tpu.memory_space<vmem>>, vector<8x241xf32>
    %c2_73 = arith.constant 2 : index
    %c15_74 = arith.constant 15 : index
    %79 = vector.load %arg2[%c2_73, %c15_74] : memref<9x256xf32, #tpu.memory_space<vmem>>, vector<1x241xf32>
    %80 = vector.broadcast %79 : vector<1x241xf32> to vector<8x241xf32>
    %81 = arith.mulf %78, %80 : vector<8x241xf32>
    %c16_75 = arith.constant 16 : index
    %c15_76 = arith.constant 15 : index
    %82 = vector.load %arg41[%c16_75, %c15_76] : memref<216x256xf32, #tpu.memory_space<vmem>>, vector<8x241xf32>
    tpu.vector_store %arg41[%c16_75, %c15_76], %81 {strides = array<i32>} : memref<216x256xf32, #tpu.memory_space<vmem>>, vector<8x241xf32>,
    %c0_77 = arith.constant 0 : index
    %c0_78 = arith.constant 0 : index
    %83 = vector.load %arg40[%c0_77, %c0_78] : memref<32x256xf32, #tpu.memory_space<vmem>>, vector<8x255xf32>
    %c3_79 = arith.constant 3 : index
    %c1_80 = arith.constant 1 : index
    %84 = vector.load %arg2[%c3_79, %c1_80] : memref<9x256xf32, #tpu.memory_space<vmem>>, vector<1x255xf32>
    %85 = vector.broadcast %84 : vector<1x255xf32> to vector<8x255xf32>
    %86 = arith.mulf %83, %85 : vector<8x255xf32>
    %c24_81 = arith.constant 24 : index
    %c1_82 = arith.constant 1 : index
    %87 = vector.load %arg41[%c24_81, %c1_82] : memref<216x256xf32, #tpu.memory_space<vmem>>, vector<8x255xf32>
    tpu.vector_store %arg41[%c24_81, %c1_82], %86 {strides = array<i32>} : memref<216x256xf32, #tpu.memory_space<vmem>>, vector<8x255xf32>,
    %c0_83 = arith.constant 0 : index
    %c0_84 = arith.constant 0 : index
    %88 = vector.load %arg40[%c0_83, %c0_84] : memref<32x256xf32, #tpu.memory_space<vmem>>, vector<8x256xf32>
    %c4_85 = arith.constant 4 : index
    %c0_86 = arith.constant 0 : index
    %89 = vector.load %arg2[%c4_85, %c0_86] : memref<9x256xf32, #tpu.memory_space<vmem>>, vector<1x256xf32>
    %90 = vector.broadcast %89 : vector<1x256xf32> to vector<8x256xf32>
    %91 = arith.mulf %88, %90 : vector<8x256xf32>
    %c32 = arith.constant 32 : index
    %c0_87 = arith.constant 0 : index
    %92 = vector.load %arg41[%c32, %c0_87] : memref<216x256xf32, #tpu.memory_space<vmem>>, vector<8x256xf32>
    tpu.vector_store %arg41[%c32, %c0_87], %91 {strides = array<i32>} : memref<216x256xf32, #tpu.memory_space<vmem>>, vector<8x256xf32>,
    %c0_88 = arith.constant 0 : index
    %c1_89 = arith.constant 1 : index
    %93 = vector.load %arg40[%c0_88, %c1_89] : memref<32x256xf32, #tpu.memory_space<vmem>>, vector<8x255xf32>
    %c5_90 = arith.constant 5 : index
    %c0_91 = arith.constant 0 : index
    %94 = vector.load %arg2[%c5_90, %c0_91] : memref<9x256xf32, #tpu.memory_space<vmem>>, vector<1x255xf32>
    %95 = vector.broadcast %94 : vector<1x255xf32> to vector<8x255xf32>
    %96 = arith.mulf %93, %95 : vector<8x255xf32>
    %c40 = arith.constant 40 : index
    %c0_92 = arith.constant 0 : index
    %97 = vector.load %arg41[%c40, %c0_92] : memref<216x256xf32, #tpu.memory_space<vmem>>, vector<8x255xf32>
    tpu.vector_store %arg41[%c40, %c0_92], %96 {strides = array<i32>} : memref<216x256xf32, #tpu.memory_space<vmem>>, vector<8x255xf32>,
    %c0_93 = arith.constant 0 : index
    %c15_94 = arith.constant 15 : index
    %98 = vector.load %arg40[%c0_93, %c15_94] : memref<32x256xf32, #tpu.memory_space<vmem>>, vector<8x241xf32>
    %c6_95 = arith.constant 6 : index
    %c0_96 = arith.constant 0 : index
    %99 = vector.load %arg2[%c6_95, %c0_96] : memref<9x256xf32, #tpu.memory_space<vmem>>, vector<1x241xf32>
    %100 = vector.broadcast %99 : vector<1x241xf32> to vector<8x241xf32>
    %101 = arith.mulf %98, %100 : vector<8x241xf32>
    %c48 = arith.constant 48 : index
    %c0_97 = arith.constant 0 : index
    %102 = vector.load %arg41[%c48, %c0_97] : memref<216x256xf32, #tpu.memory_space<vmem>>, vector<8x241xf32>
    tpu.vector_store %arg41[%c48, %c0_97], %101 {strides = array<i32>} : memref<216x256xf32, #tpu.memory_space<vmem>>, vector<8x241xf32>,
    %c0_98 = arith.constant 0 : index
    %c16_99 = arith.constant 16 : index
    %103 = vector.load %arg40[%c0_98, %c16_99] : memref<32x256xf32, #tpu.memory_space<vmem>>, vector<8x240xf32>
    %c7_100 = arith.constant 7 : index
    %c0_101 = arith.constant 0 : index
    %104 = vector.load %arg2[%c7_100, %c0_101] : memref<9x256xf32, #tpu.memory_space<vmem>>, vector<1x240xf32>
    %105 = vector.broadcast %104 : vector<1x240xf32> to vector<8x240xf32>
    %106 = arith.mulf %103, %105 : vector<8x240xf32>
    %c56 = arith.constant 56 : index
    %c0_102 = arith.constant 0 : index
    %107 = vector.load %arg41[%c56, %c0_102] : memref<216x256xf32, #tpu.memory_space<vmem>>, vector<8x240xf32>
    tpu.vector_store %arg41[%c56, %c0_102], %106 {strides = array<i32>} : memref<216x256xf32, #tpu.memory_space<vmem>>, vector<8x240xf32>,
    %c0_103 = arith.constant 0 : index
    %c17_104 = arith.constant 17 : index
    %108 = vector.load %arg40[%c0_103, %c17_104] : memref<32x256xf32, #tpu.memory_space<vmem>>, vector<8x239xf32>
    %c8_105 = arith.constant 8 : index
    %c0_106 = arith.constant 0 : index
    %109 = vector.load %arg2[%c8_105, %c0_106] : memref<9x256xf32, #tpu.memory_space<vmem>>, vector<1x239xf32>
    %110 = vector.broadcast %109 : vector<1x239xf32> to vector<8x239xf32>
    %111 = arith.mulf %108, %110 : vector<8x239xf32>
    %c64 = arith.constant 64 : index
    %c0_107 = arith.constant 0 : index
    %112 = vector.load %arg41[%c64, %c0_107] : memref<216x256xf32, #tpu.memory_space<vmem>>, vector<8x239xf32>
    tpu.vector_store %arg41[%c64, %c0_107], %111 {strides = array<i32>} : memref<216x256xf32, #tpu.memory_space<vmem>>, vector<8x239xf32>,
    %c0_108 = arith.constant 0 : index
    %c0_109 = arith.constant 0 : index
    %113 = vector.load %arg12[%c0_108, %c0_109] : memref<8x72xbf16, #tpu.memory_space<vmem>>, vector<8x72xbf16>
    %c0_110 = arith.constant 0 : index
    %c0_111 = arith.constant 0 : index
    %114 = vector.load %arg41[%c0_110, %c0_111] : memref<216x256xf32, #tpu.memory_space<vmem>>, vector<72x256xf32>
    %115 = arith.truncf %114 : vector<72x256xf32> to vector<72x256xbf16>
    %cst_112 = arith.constant dense<0.000000e+00> : vector<8x256xf32>
    %116 = tpu.matmul %113, %115, %cst_112 {dimension_numbers = #tpu.dot_dimension_numbers<[1], [0], [0], [1], [0, 0, 1, 1], [], []>} : vector<8x72xbf16>, vector<72x256xbf16>, vector<8x256xf32> -> vector<8x256xf32>
    %c0_113 = arith.constant 0 : index
    %c0_114 = arith.constant 0 : index
    %117 = vector.load %arg13[%c0_113, %c0_114] : memref<8x1xf32, #tpu.memory_space<vmem>>, vector<8x1xf32>
    %118 = vector.broadcast %117 : vector<8x1xf32> to vector<8x256xf32>
    %119 = arith.addf %116, %118 : vector<8x256xf32>
    %cst_115 = arith.constant 0.000000e+00 : f32
    %120 = vector.broadcast %cst_115 : f32 to vector<8x256xf32>
    %121 = arith.cmpf ogt, %119, %120 : vector<8x256xf32>
    %cst_116 = arith.constant 0.000000e+00 : f32
    %122 = vector.broadcast %cst_116 : f32 to vector<8x256xf32>
    %123 = arith.minimumf %119, %122 : vector<8x256xf32>
    %124 = math.exp %123 : vector<8x256xf32>
    %cst_117 = arith.constant 1.000000e+00 : f32
    %125 = vector.broadcast %cst_117 : f32 to vector<8x256xf32>
    %126 = arith.subf %124, %125 : vector<8x256xf32>
    %127 = arith.select %121, %119, %126 : vector<8x256xi1>, vector<8x256xf32>
    %c0_118 = arith.constant 0 : index
    %c0_119 = arith.constant 0 : index
    %128 = vector.load %arg39[%c0_118, %c0_119] : memref<32x256xf32, #tpu.memory_space<vmem>>, vector<8x256xf32>
    tpu.vector_store %arg39[%c0_118, %c0_119], %127 {strides = array<i32>} : memref<32x256xf32, #tpu.memory_space<vmem>>, vector<8x256xf32>,
    %cst_120 = arith.constant 0.000000e+00 : f32
    %129 = vector.broadcast %cst_120 : f32 to vector<72x256xf32>
    %c0_121 = arith.constant 0 : index
    %c0_122 = arith.constant 0 : index
    %130 = vector.load %arg41[%c0_121, %c0_122] : memref<216x256xf32, #tpu.memory_space<vmem>>, vector<72x256xf32>
    tpu.vector_store %arg41[%c0_121, %c0_122], %129 {strides = array<i32>} : memref<216x256xf32, #tpu.memory_space<vmem>>, vector<72x256xf32>,
    %c0_123 = arith.constant 0 : index
    %c0_124 = arith.constant 0 : index
    %131 = vector.load %arg39[%c0_123, %c0_124] : memref<32x256xf32, #tpu.memory_space<vmem>>, vector<8x239xf32>
    %c0_125 = arith.constant 0 : index
    %c17_126 = arith.constant 17 : index
    %132 = vector.load %arg2[%c0_125, %c17_126] : memref<9x256xf32, #tpu.memory_space<vmem>>, vector<1x239xf32>
    %133 = vector.broadcast %132 : vector<1x239xf32> to vector<8x239xf32>
    %134 = arith.mulf %131, %133 : vector<8x239xf32>
    %c0_127 = arith.constant 0 : index
    %c17_128 = arith.constant 17 : index
    %135 = vector.load %arg41[%c0_127, %c17_128] : memref<216x256xf32, #tpu.memory_space<vmem>>, vector<8x239xf32>
    tpu.vector_store %arg41[%c0_127, %c17_128], %134 {strides = array<i32>} : memref<216x256xf32, #tpu.memory_space<vmem>>, vector<8x239xf32>,
    %c0_129 = arith.constant 0 : index
    %c0_130 = arith.constant 0 : index
    %136 = vector.load %arg39[%c0_129, %c0_130] : memref<32x256xf32, #tpu.memory_space<vmem>>, vector<8x240xf32>
    %c1_131 = arith.constant 1 : index
    %c16_132 = arith.constant 16 : index
    %137 = vector.load %arg2[%c1_131, %c16_132] : memref<9x256xf32, #tpu.memory_space<vmem>>, vector<1x240xf32>
    %138 = vector.broadcast %137 : vector<1x240xf32> to vector<8x240xf32>
    %139 = arith.mulf %136, %138 : vector<8x240xf32>
    %c8_133 = arith.constant 8 : index
    %c16_134 = arith.constant 16 : index
    %140 = vector.load %arg41[%c8_133, %c16_134] : memref<216x256xf32, #tpu.memory_space<vmem>>, vector<8x240xf32>
    tpu.vector_store %arg41[%c8_133, %c16_134], %139 {strides = array<i32>} : memref<216x256xf32, #tpu.memory_space<vmem>>, vector<8x240xf32>,
    %c0_135 = arith.constant 0 : index
    %c0_136 = arith.constant 0 : index
    %141 = vector.load %arg39[%c0_135, %c0_136] : memref<32x256xf32, #tpu.memory_space<vmem>>, vector<8x241xf32>
    %c2_137 = arith.constant 2 : index
    %c15_138 = arith.constant 15 : index
    %142 = vector.load %arg2[%c2_137, %c15_138] : memref<9x256xf32, #tpu.memory_space<vmem>>, vector<1x241xf32>
    %143 = vector.broadcast %142 : vector<1x241xf32> to vector<8x241xf32>
    %144 = arith.mulf %141, %143 : vector<8x241xf32>
    %c16_139 = arith.constant 16 : index
    %c15_140 = arith.constant 15 : index
    %145 = vector.load %arg41[%c16_139, %c15_140] : memref<216x256xf32, #tpu.memory_space<vmem>>, vector<8x241xf32>
    tpu.vector_store %arg41[%c16_139, %c15_140], %144 {strides = array<i32>} : memref<216x256xf32, #tpu.memory_space<vmem>>, vector<8x241xf32>,
    %c0_141 = arith.constant 0 : index
    %c0_142 = arith.constant 0 : index
    %146 = vector.load %arg39[%c0_141, %c0_142] : memref<32x256xf32, #tpu.memory_space<vmem>>, vector<8x255xf32>
    %c3_143 = arith.constant 3 : index
    %c1_144 = arith.constant 1 : index
    %147 = vector.load %arg2[%c3_143, %c1_144] : memref<9x256xf32, #tpu.memory_space<vmem>>, vector<1x255xf32>
    %148 = vector.broadcast %147 : vector<1x255xf32> to vector<8x255xf32>
    %149 = arith.mulf %146, %148 : vector<8x255xf32>
    %c24_145 = arith.constant 24 : index
    %c1_146 = arith.constant 1 : index
    %150 = vector.load %arg41[%c24_145, %c1_146] : memref<216x256xf32, #tpu.memory_space<vmem>>, vector<8x255xf32>
    tpu.vector_store %arg41[%c24_145, %c1_146], %149 {strides = array<i32>} : memref<216x256xf32, #tpu.memory_space<vmem>>, vector<8x255xf32>,
    %c0_147 = arith.constant 0 : index
    %c0_148 = arith.constant 0 : index
    %151 = vector.load %arg39[%c0_147, %c0_148] : memref<32x256xf32, #tpu.memory_space<vmem>>, vector<8x256xf32>
    %c4_149 = arith.constant 4 : index
    %c0_150 = arith.constant 0 : index
    %152 = vector.load %arg2[%c4_149, %c0_150] : memref<9x256xf32, #tpu.memory_space<vmem>>, vector<1x256xf32>
    %153 = vector.broadcast %152 : vector<1x256xf32> to vector<8x256xf32>
    %154 = arith.mulf %151, %153 : vector<8x256xf32>
    %c32_151 = arith.constant 32 : index
    %c0_152 = arith.constant 0 : index
    %155 = vector.load %arg41[%c32_151, %c0_152] : memref<216x256xf32, #tpu.memory_space<vmem>>, vector<8x256xf32>
    tpu.vector_store %arg41[%c32_151, %c0_152], %154 {strides = array<i32>} : memref<216x256xf32, #tpu.memory_space<vmem>>, vector<8x256xf32>,
    %c0_153 = arith.constant 0 : index
    %c1_154 = arith.constant 1 : index
    %156 = vector.load %arg39[%c0_153, %c1_154] : memref<32x256xf32, #tpu.memory_space<vmem>>, vector<8x255xf32>
    %c5_155 = arith.constant 5 : index
    %c0_156 = arith.constant 0 : index
    %157 = vector.load %arg2[%c5_155, %c0_156] : memref<9x256xf32, #tpu.memory_space<vmem>>, vector<1x255xf32>
    %158 = vector.broadcast %157 : vector<1x255xf32> to vector<8x255xf32>
    %159 = arith.mulf %156, %158 : vector<8x255xf32>
    %c40_157 = arith.constant 40 : index
    %c0_158 = arith.constant 0 : index
    %160 = vector.load %arg41[%c40_157, %c0_158] : memref<216x256xf32, #tpu.memory_space<vmem>>, vector<8x255xf32>
    tpu.vector_store %arg41[%c40_157, %c0_158], %159 {strides = array<i32>} : memref<216x256xf32, #tpu.memory_space<vmem>>, vector<8x255xf32>,
    %c0_159 = arith.constant 0 : index
    %c15_160 = arith.constant 15 : index
    %161 = vector.load %arg39[%c0_159, %c15_160] : memref<32x256xf32, #tpu.memory_space<vmem>>, vector<8x241xf32>
    %c6_161 = arith.constant 6 : index
    %c0_162 = arith.constant 0 : index
    %162 = vector.load %arg2[%c6_161, %c0_162] : memref<9x256xf32, #tpu.memory_space<vmem>>, vector<1x241xf32>
    %163 = vector.broadcast %162 : vector<1x241xf32> to vector<8x241xf32>
    %164 = arith.mulf %161, %163 : vector<8x241xf32>
    %c48_163 = arith.constant 48 : index
    %c0_164 = arith.constant 0 : index
    %165 = vector.load %arg41[%c48_163, %c0_164] : memref<216x256xf32, #tpu.memory_space<vmem>>, vector<8x241xf32>
    tpu.vector_store %arg41[%c48_163, %c0_164], %164 {strides = array<i32>} : memref<216x256xf32, #tpu.memory_space<vmem>>, vector<8x241xf32>,
    %c0_165 = arith.constant 0 : index
    %c16_166 = arith.constant 16 : index
    %166 = vector.load %arg39[%c0_165, %c16_166] : memref<32x256xf32, #tpu.memory_space<vmem>>, vector<8x240xf32>
    %c7_167 = arith.constant 7 : index
    %c0_168 = arith.constant 0 : index
    %167 = vector.load %arg2[%c7_167, %c0_168] : memref<9x256xf32, #tpu.memory_space<vmem>>, vector<1x240xf32>
    %168 = vector.broadcast %167 : vector<1x240xf32> to vector<8x240xf32>
    %169 = arith.mulf %166, %168 : vector<8x240xf32>
    %c56_169 = arith.constant 56 : index
    %c0_170 = arith.constant 0 : index
    %170 = vector.load %arg41[%c56_169, %c0_170] : memref<216x256xf32, #tpu.memory_space<vmem>>, vector<8x240xf32>
    tpu.vector_store %arg41[%c56_169, %c0_170], %169 {strides = array<i32>} : memref<216x256xf32, #tpu.memory_space<vmem>>, vector<8x240xf32>,
    %c0_171 = arith.constant 0 : index
    %c17_172 = arith.constant 17 : index
    %171 = vector.load %arg39[%c0_171, %c17_172] : memref<32x256xf32, #tpu.memory_space<vmem>>, vector<8x239xf32>
    %c8_173 = arith.constant 8 : index
    %c0_174 = arith.constant 0 : index
    %172 = vector.load %arg2[%c8_173, %c0_174] : memref<9x256xf32, #tpu.memory_space<vmem>>, vector<1x239xf32>
    %173 = vector.broadcast %172 : vector<1x239xf32> to vector<8x239xf32>
    %174 = arith.mulf %171, %173 : vector<8x239xf32>
    %c64_175 = arith.constant 64 : index
    %c0_176 = arith.constant 0 : index
    %175 = vector.load %arg41[%c64_175, %c0_176] : memref<216x256xf32, #tpu.memory_space<vmem>>, vector<8x239xf32>
    tpu.vector_store %arg41[%c64_175, %c0_176], %174 {strides = array<i32>} : memref<216x256xf32, #tpu.memory_space<vmem>>, vector<8x239xf32>,
    %c0_177 = arith.constant 0 : index
    %c0_178 = arith.constant 0 : index
    %176 = vector.load %arg14[%c0_177, %c0_178] : memref<8x72xbf16, #tpu.memory_space<vmem>>, vector<8x72xbf16>
    %c0_179 = arith.constant 0 : index
    %c0_180 = arith.constant 0 : index
    %177 = vector.load %arg41[%c0_179, %c0_180] : memref<216x256xf32, #tpu.memory_space<vmem>>, vector<72x256xf32>
    %178 = arith.truncf %177 : vector<72x256xf32> to vector<72x256xbf16>
    %cst_181 = arith.constant dense<0.000000e+00> : vector<8x256xf32>
    %179 = tpu.matmul %176, %178, %cst_181 {dimension_numbers = #tpu.dot_dimension_numbers<[1], [0], [0], [1], [0, 0, 1, 1], [], []>} : vector<8x72xbf16>, vector<72x256xbf16>, vector<8x256xf32> -> vector<8x256xf32>
    %c0_182 = arith.constant 0 : index
    %c0_183 = arith.constant 0 : index
    %180 = vector.load %arg15[%c0_182, %c0_183] : memref<8x1xf32, #tpu.memory_space<vmem>>, vector<8x1xf32>
    %181 = vector.broadcast %180 : vector<8x1xf32> to vector<8x256xf32>
    %182 = arith.addf %179, %181 : vector<8x256xf32>
    %cst_184 = arith.constant 0.000000e+00 : f32
    %183 = vector.broadcast %cst_184 : f32 to vector<8x256xf32>
    %184 = arith.cmpf ogt, %182, %183 : vector<8x256xf32>
    %cst_185 = arith.constant 0.000000e+00 : f32
    %185 = vector.broadcast %cst_185 : f32 to vector<8x256xf32>
    %186 = arith.minimumf %182, %185 : vector<8x256xf32>
    %187 = math.exp %186 : vector<8x256xf32>
    %cst_186 = arith.constant 1.000000e+00 : f32
    %188 = vector.broadcast %cst_186 : f32 to vector<8x256xf32>
    %189 = arith.subf %187, %188 : vector<8x256xf32>
    %190 = arith.select %184, %182, %189 : vector<8x256xi1>, vector<8x256xf32>
    %c0_187 = arith.constant 0 : index
    %c0_188 = arith.constant 0 : index
    %191 = vector.load %arg40[%c0_187, %c0_188] : memref<32x256xf32, #tpu.memory_space<vmem>>, vector<8x256xf32>
    tpu.vector_store %arg40[%c0_187, %c0_188], %190 {strides = array<i32>} : memref<32x256xf32, #tpu.memory_space<vmem>>, vector<8x256xf32>,
    %c0_189 = arith.constant 0 : index
    %c0_190 = arith.constant 0 : index
    %192 = vector.load %arg16[%c0_189, %c0_190] : memref<8x8xbf16, #tpu.memory_space<vmem>>, vector<8x8xbf16>
    %c0_191 = arith.constant 0 : index
    %c0_192 = arith.constant 0 : index
    %193 = vector.load %arg40[%c0_191, %c0_192] : memref<32x256xf32, #tpu.memory_space<vmem>>, vector<8x256xf32>
    %194 = arith.truncf %193 : vector<8x256xf32> to vector<8x256xbf16>
    %cst_193 = arith.constant dense<0.000000e+00> : vector<8x256xf32>
    %195 = tpu.matmul %192, %194, %cst_193 {dimension_numbers = #tpu.dot_dimension_numbers<[1], [0], [0], [1], [0, 0, 1, 1], [], []>} : vector<8x8xbf16>, vector<8x256xbf16>, vector<8x256xf32> -> vector<8x256xf32>
    %c0_194 = arith.constant 0 : index
    %c0_195 = arith.constant 0 : index
    %196 = vector.load %arg17[%c0_194, %c0_195] : memref<8x1xf32, #tpu.memory_space<vmem>>, vector<8x1xf32>
    %197 = vector.broadcast %196 : vector<8x1xf32> to vector<8x256xf32>
    %198 = arith.addf %195, %197 : vector<8x256xf32>
    %c0_196 = arith.constant 0 : index
    %c0_197 = arith.constant 0 : index
    %199 = vector.load %arg39[%c0_196, %c0_197] : memref<32x256xf32, #tpu.memory_space<vmem>>, vector<8x256xf32>
    tpu.vector_store %arg39[%c0_196, %c0_197], %198 {strides = array<i32>} : memref<32x256xf32, #tpu.memory_space<vmem>>, vector<8x256xf32>,
    %c0_198 = arith.constant 0 : index
    %c0_199 = arith.constant 0 : index
    %200 = vector.load %arg39[%c0_198, %c0_199] : memref<32x256xf32, #tpu.memory_space<vmem>>, vector<8x256xf32>
    %201 = arith.truncf %200 : vector<8x256xf32> to vector<8x256xbf16>
    %c0_200 = arith.constant 0 : index
    %c0_201 = arith.constant 0 : index
    %202 = vector.load %arg3[%c0_200, %c0_201] : memref<256x64xbf16, #tpu.memory_space<vmem>>, vector<256x64xbf16>
    %cst_202 = arith.constant dense<0.000000e+00> : vector<8x64xf32>
    %203 = tpu.matmul %201, %202, %cst_202 {dimension_numbers = #tpu.dot_dimension_numbers<[1], [0], [0], [1], [0, 0, 1, 1], [], []>} : vector<8x256xbf16>, vector<256x64xbf16>, vector<8x64xf32> -> vector<8x64xf32>
    %c0_203 = arith.constant 0 : index
    %c0_204 = arith.constant 0 : index
    %204 = vector.load %arg40[%c0_203, %c0_204] : memref<32x256xf32, #tpu.memory_space<vmem>>, vector<8x64xf32>
    tpu.vector_store %arg40[%c0_203, %c0_204], %203 {strides = array<i32>} : memref<32x256xf32, #tpu.memory_space<vmem>>, vector<8x64xf32>,
    %cst_205 = arith.constant 0.000000e+00 : f32
    %205 = vector.broadcast %cst_205 : f32 to vector<72x64xf32>
    %c0_206 = arith.constant 0 : index
    %c0_207 = arith.constant 0 : index
    %206 = vector.load %arg41[%c0_206, %c0_207] : memref<216x256xf32, #tpu.memory_space<vmem>>, vector<72x64xf32>
    tpu.vector_store %arg41[%c0_206, %c0_207], %205 {strides = array<i32>} : memref<216x256xf32, #tpu.memory_space<vmem>>, vector<72x64xf32>,
    %c0_208 = arith.constant 0 : index
    %c0_209 = arith.constant 0 : index
    %207 = vector.load %arg40[%c0_208, %c0_209] : memref<32x256xf32, #tpu.memory_space<vmem>>, vector<8x55xf32>
    %c0_210 = arith.constant 0 : index
    %c9_211 = arith.constant 9 : index
    %208 = vector.load %arg4[%c0_210, %c9_211] : memref<9x64xf32, #tpu.memory_space<vmem>>, vector<1x55xf32>
    %209 = vector.broadcast %208 : vector<1x55xf32> to vector<8x55xf32>
    %210 = arith.mulf %207, %209 : vector<8x55xf32>
    %c0_212 = arith.constant 0 : index
    %c9_213 = arith.constant 9 : index
    %211 = vector.load %arg41[%c0_212, %c9_213] : memref<216x256xf32, #tpu.memory_space<vmem>>, vector<8x55xf32>
    tpu.vector_store %arg41[%c0_212, %c9_213], %210 {strides = array<i32>} : memref<216x256xf32, #tpu.memory_space<vmem>>, vector<8x55xf32>,
    %c0_214 = arith.constant 0 : index
    %c0_215 = arith.constant 0 : index
    %212 = vector.load %arg40[%c0_214, %c0_215] : memref<32x256xf32, #tpu.memory_space<vmem>>, vector<8x56xf32>
    %c1_216 = arith.constant 1 : index
    %c8_217 = arith.constant 8 : index
    %213 = vector.load %arg4[%c1_216, %c8_217] : memref<9x64xf32, #tpu.memory_space<vmem>>, vector<1x56xf32>
    %214 = vector.broadcast %213 : vector<1x56xf32> to vector<8x56xf32>
    %215 = arith.mulf %212, %214 : vector<8x56xf32>
    %c8_218 = arith.constant 8 : index
    %c8_219 = arith.constant 8 : index
    %216 = vector.load %arg41[%c8_218, %c8_219] : memref<216x256xf32, #tpu.memory_space<vmem>>, vector<8x56xf32>
    tpu.vector_store %arg41[%c8_218, %c8_219], %215 {strides = array<i32>} : memref<216x256xf32, #tpu.memory_space<vmem>>, vector<8x56xf32>,
    %c0_220 = arith.constant 0 : index
    %c0_221 = arith.constant 0 : index
    %217 = vector.load %arg40[%c0_220, %c0_221] : memref<32x256xf32, #tpu.memory_space<vmem>>, vector<8x57xf32>
    %c2_222 = arith.constant 2 : index
    %c7_223 = arith.constant 7 : index
    %218 = vector.load %arg4[%c2_222, %c7_223] : memref<9x64xf32, #tpu.memory_space<vmem>>, vector<1x57xf32>
    %219 = vector.broadcast %218 : vector<1x57xf32> to vector<8x57xf32>
    %220 = arith.mulf %217, %219 : vector<8x57xf32>
    %c16_224 = arith.constant 16 : index
    %c7_225 = arith.constant 7 : index
    %221 = vector.load %arg41[%c16_224, %c7_225] : memref<216x256xf32, #tpu.memory_space<vmem>>, vector<8x57xf32>
    tpu.vector_store %arg41[%c16_224, %c7_225], %220 {strides = array<i32>} : memref<216x256xf32, #tpu.memory_space<vmem>>, vector<8x57xf32>,
    %c0_226 = arith.constant 0 : index
    %c0_227 = arith.constant 0 : index
    %222 = vector.load %arg40[%c0_226, %c0_227] : memref<32x256xf32, #tpu.memory_space<vmem>>, vector<8x63xf32>
    %c3_228 = arith.constant 3 : index
    %c1_229 = arith.constant 1 : index
    %223 = vector.load %arg4[%c3_228, %c1_229] : memref<9x64xf32, #tpu.memory_space<vmem>>, vector<1x63xf32>
    %224 = vector.broadcast %223 : vector<1x63xf32> to vector<8x63xf32>
    %225 = arith.mulf %222, %224 : vector<8x63xf32>
    %c24_230 = arith.constant 24 : index
    %c1_231 = arith.constant 1 : index
    %226 = vector.load %arg41[%c24_230, %c1_231] : memref<216x256xf32, #tpu.memory_space<vmem>>, vector<8x63xf32>
    tpu.vector_store %arg41[%c24_230, %c1_231], %225 {strides = array<i32>} : memref<216x256xf32, #tpu.memory_space<vmem>>, vector<8x63xf32>,
    %c0_232 = arith.constant 0 : index
    %c0_233 = arith.constant 0 : index
    %227 = vector.load %arg40[%c0_232, %c0_233] : memref<32x256xf32, #tpu.memory_space<vmem>>, vector<8x64xf32>
    %c4_234 = arith.constant 4 : index
    %c0_235 = arith.constant 0 : index
    %228 = vector.load %arg4[%c4_234, %c0_235] : memref<9x64xf32, #tpu.memory_space<vmem>>, vector<1x64xf32>
    %229 = vector.broadcast %228 : vector<1x64xf32> to vector<8x64xf32>
    %230 = arith.mulf %227, %229 : vector<8x64xf32>
    %c32_236 = arith.constant 32 : index
    %c0_237 = arith.constant 0 : index
    %231 = vector.load %arg41[%c32_236, %c0_237] : memref<216x256xf32, #tpu.memory_space<vmem>>, vector<8x64xf32>
    tpu.vector_store %arg41[%c32_236, %c0_237], %230 {strides = array<i32>} : memref<216x256xf32, #tpu.memory_space<vmem>>, vector<8x64xf32>,
    %c0_238 = arith.constant 0 : index
    %c1_239 = arith.constant 1 : index
    %232 = vector.load %arg40[%c0_238, %c1_239] : memref<32x256xf32, #tpu.memory_space<vmem>>, vector<8x63xf32>
    %c5_240 = arith.constant 5 : index
    %c0_241 = arith.constant 0 : index
    %233 = vector.load %arg4[%c5_240, %c0_241] : memref<9x64xf32, #tpu.memory_space<vmem>>, vector<1x63xf32>
    %234 = vector.broadcast %233 : vector<1x63xf32> to vector<8x63xf32>
    %235 = arith.mulf %232, %234 : vector<8x63xf32>
    %c40_242 = arith.constant 40 : index
    %c0_243 = arith.constant 0 : index
    %236 = vector.load %arg41[%c40_242, %c0_243] : memref<216x256xf32, #tpu.memory_space<vmem>>, vector<8x63xf32>
    tpu.vector_store %arg41[%c40_242, %c0_243], %235 {strides = array<i32>} : memref<216x256xf32, #tpu.memory_space<vmem>>, vector<8x63xf32>,
    %c0_244 = arith.constant 0 : index
    %c7_245 = arith.constant 7 : index
    %237 = vector.load %arg40[%c0_244, %c7_245] : memref<32x256xf32, #tpu.memory_space<vmem>>, vector<8x57xf32>
    %c6_246 = arith.constant 6 : index
    %c0_247 = arith.constant 0 : index
    %238 = vector.load %arg4[%c6_246, %c0_247] : memref<9x64xf32, #tpu.memory_space<vmem>>, vector<1x57xf32>
    %239 = vector.broadcast %238 : vector<1x57xf32> to vector<8x57xf32>
    %240 = arith.mulf %237, %239 : vector<8x57xf32>
    %c48_248 = arith.constant 48 : index
    %c0_249 = arith.constant 0 : index
    %241 = vector.load %arg41[%c48_248, %c0_249] : memref<216x256xf32, #tpu.memory_space<vmem>>, vector<8x57xf32>
    tpu.vector_store %arg41[%c48_248, %c0_249], %240 {strides = array<i32>} : memref<216x256xf32, #tpu.memory_space<vmem>>, vector<8x57xf32>,
    %c0_250 = arith.constant 0 : index
    %c8_251 = arith.constant 8 : index
    %242 = vector.load %arg40[%c0_250, %c8_251] : memref<32x256xf32, #tpu.memory_space<vmem>>, vector<8x56xf32>
    %c7_252 = arith.constant 7 : index
    %c0_253 = arith.constant 0 : index
    %243 = vector.load %arg4[%c7_252, %c0_253] : memref<9x64xf32, #tpu.memory_space<vmem>>, vector<1x56xf32>
    %244 = vector.broadcast %243 : vector<1x56xf32> to vector<8x56xf32>
    %245 = arith.mulf %242, %244 : vector<8x56xf32>
    %c56_254 = arith.constant 56 : index
    %c0_255 = arith.constant 0 : index
    %246 = vector.load %arg41[%c56_254, %c0_255] : memref<216x256xf32, #tpu.memory_space<vmem>>, vector<8x56xf32>
    tpu.vector_store %arg41[%c56_254, %c0_255], %245 {strides = array<i32>} : memref<216x256xf32, #tpu.memory_space<vmem>>, vector<8x56xf32>,
    %c0_256 = arith.constant 0 : index
    %c9_257 = arith.constant 9 : index
    %247 = vector.load %arg40[%c0_256, %c9_257] : memref<32x256xf32, #tpu.memory_space<vmem>>, vector<8x55xf32>
    %c8_258 = arith.constant 8 : index
    %c0_259 = arith.constant 0 : index
    %248 = vector.load %arg4[%c8_258, %c0_259] : memref<9x64xf32, #tpu.memory_space<vmem>>, vector<1x55xf32>
    %249 = vector.broadcast %248 : vector<1x55xf32> to vector<8x55xf32>
    %250 = arith.mulf %247, %249 : vector<8x55xf32>
    %c64_260 = arith.constant 64 : index
    %c0_261 = arith.constant 0 : index
    %251 = vector.load %arg41[%c64_260, %c0_261] : memref<216x256xf32, #tpu.memory_space<vmem>>, vector<8x55xf32>
    tpu.vector_store %arg41[%c64_260, %c0_261], %250 {strides = array<i32>} : memref<216x256xf32, #tpu.memory_space<vmem>>, vector<8x55xf32>,
    %c0_262 = arith.constant 0 : index
    %c0_263 = arith.constant 0 : index
    %252 = vector.load %arg18[%c0_262, %c0_263] : memref<8x72xbf16, #tpu.memory_space<vmem>>, vector<8x72xbf16>
    %c0_264 = arith.constant 0 : index
    %c0_265 = arith.constant 0 : index
    %253 = vector.load %arg41[%c0_264, %c0_265] : memref<216x256xf32, #tpu.memory_space<vmem>>, vector<72x64xf32>
    %254 = arith.truncf %253 : vector<72x64xf32> to vector<72x64xbf16>
    %cst_266 = arith.constant dense<0.000000e+00> : vector<8x64xf32>
    %255 = tpu.matmul %252, %254, %cst_266 {dimension_numbers = #tpu.dot_dimension_numbers<[1], [0], [0], [1], [0, 0, 1, 1], [], []>} : vector<8x72xbf16>, vector<72x64xbf16>, vector<8x64xf32> -> vector<8x64xf32>
    %c0_267 = arith.constant 0 : index
    %c0_268 = arith.constant 0 : index
    %256 = vector.load %arg19[%c0_267, %c0_268] : memref<8x1xf32, #tpu.memory_space<vmem>>, vector<8x1xf32>
    %257 = vector.broadcast %256 : vector<8x1xf32> to vector<8x64xf32>
    %258 = arith.addf %255, %257 : vector<8x64xf32>
    %cst_269 = arith.constant 0.000000e+00 : f32
    %259 = vector.broadcast %cst_269 : f32 to vector<8x64xf32>
    %260 = arith.cmpf ogt, %258, %259 : vector<8x64xf32>
    %cst_270 = arith.constant 0.000000e+00 : f32
    %261 = vector.broadcast %cst_270 : f32 to vector<8x64xf32>
    %262 = arith.minimumf %258, %261 : vector<8x64xf32>
    %263 = math.exp %262 : vector<8x64xf32>
    %cst_271 = arith.constant 1.000000e+00 : f32
    %264 = vector.broadcast %cst_271 : f32 to vector<8x64xf32>
    %265 = arith.subf %263, %264 : vector<8x64xf32>
    %266 = arith.select %260, %258, %265 : vector<8x64xi1>, vector<8x64xf32>
    %c0_272 = arith.constant 0 : index
    %c0_273 = arith.constant 0 : index
    %267 = vector.load %arg39[%c0_272, %c0_273] : memref<32x256xf32, #tpu.memory_space<vmem>>, vector<8x64xf32>
    tpu.vector_store %arg39[%c0_272, %c0_273], %266 {strides = array<i32>} : memref<32x256xf32, #tpu.memory_space<vmem>>, vector<8x64xf32>,
    %cst_274 = arith.constant 0.000000e+00 : f32
    %268 = vector.broadcast %cst_274 : f32 to vector<72x64xf32>
    %c0_275 = arith.constant 0 : index
    %c0_276 = arith.constant 0 : index
    %269 = vector.load %arg41[%c0_275, %c0_276] : memref<216x256xf32, #tpu.memory_space<vmem>>, vector<72x64xf32>
    tpu.vector_store %arg41[%c0_275, %c0_276], %268 {strides = array<i32>} : memref<216x256xf32, #tpu.memory_space<vmem>>, vector<72x64xf32>,
    %c0_277 = arith.constant 0 : index
    %c0_278 = arith.constant 0 : index
    %270 = vector.load %arg39[%c0_277, %c0_278] : memref<32x256xf32, #tpu.memory_space<vmem>>, vector<8x55xf32>
    %c0_279 = arith.constant 0 : index
    %c9_280 = arith.constant 9 : index
    %271 = vector.load %arg4[%c0_279, %c9_280] : memref<9x64xf32, #tpu.memory_space<vmem>>, vector<1x55xf32>
    %272 = vector.broadcast %271 : vector<1x55xf32> to vector<8x55xf32>
    %273 = arith.mulf %270, %272 : vector<8x55xf32>
    %c0_281 = arith.constant 0 : index
    %c9_282 = arith.constant 9 : index
    %274 = vector.load %arg41[%c0_281, %c9_282] : memref<216x256xf32, #tpu.memory_space<vmem>>, vector<8x55xf32>
    tpu.vector_store %arg41[%c0_281, %c9_282], %273 {strides = array<i32>} : memref<216x256xf32, #tpu.memory_space<vmem>>, vector<8x55xf32>,
    %c0_283 = arith.constant 0 : index
    %c0_284 = arith.constant 0 : index
    %275 = vector.load %arg39[%c0_283, %c0_284] : memref<32x256xf32, #tpu.memory_space<vmem>>, vector<8x56xf32>
    %c1_285 = arith.constant 1 : index
    %c8_286 = arith.constant 8 : index
    %276 = vector.load %arg4[%c1_285, %c8_286] : memref<9x64xf32, #tpu.memory_space<vmem>>, vector<1x56xf32>
    %277 = vector.broadcast %276 : vector<1x56xf32> to vector<8x56xf32>
    %278 = arith.mulf %275, %277 : vector<8x56xf32>
    %c8_287 = arith.constant 8 : index
    %c8_288 = arith.constant 8 : index
    %279 = vector.load %arg41[%c8_287, %c8_288] : memref<216x256xf32, #tpu.memory_space<vmem>>, vector<8x56xf32>
    tpu.vector_store %arg41[%c8_287, %c8_288], %278 {strides = array<i32>} : memref<216x256xf32, #tpu.memory_space<vmem>>, vector<8x56xf32>,
    %c0_289 = arith.constant 0 : index
    %c0_290 = arith.constant 0 : index
    %280 = vector.load %arg39[%c0_289, %c0_290] : memref<32x256xf32, #tpu.memory_space<vmem>>, vector<8x57xf32>
    %c2_291 = arith.constant 2 : index
    %c7_292 = arith.constant 7 : index
    %281 = vector.load %arg4[%c2_291, %c7_292] : memref<9x64xf32, #tpu.memory_space<vmem>>, vector<1x57xf32>
    %282 = vector.broadcast %281 : vector<1x57xf32> to vector<8x57xf32>
    %283 = arith.mulf %280, %282 : vector<8x57xf32>
    %c16_293 = arith.constant 16 : index
    %c7_294 = arith.constant 7 : index
    %284 = vector.load %arg41[%c16_293, %c7_294] : memref<216x256xf32, #tpu.memory_space<vmem>>, vector<8x57xf32>
    tpu.vector_store %arg41[%c16_293, %c7_294], %283 {strides = array<i32>} : memref<216x256xf32, #tpu.memory_space<vmem>>, vector<8x57xf32>,
    %c0_295 = arith.constant 0 : index
    %c0_296 = arith.constant 0 : index
    %285 = vector.load %arg39[%c0_295, %c0_296] : memref<32x256xf32, #tpu.memory_space<vmem>>, vector<8x63xf32>
    %c3_297 = arith.constant 3 : index
    %c1_298 = arith.constant 1 : index
    %286 = vector.load %arg4[%c3_297, %c1_298] : memref<9x64xf32, #tpu.memory_space<vmem>>, vector<1x63xf32>
    %287 = vector.broadcast %286 : vector<1x63xf32> to vector<8x63xf32>
    %288 = arith.mulf %285, %287 : vector<8x63xf32>
    %c24_299 = arith.constant 24 : index
    %c1_300 = arith.constant 1 : index
    %289 = vector.load %arg41[%c24_299, %c1_300] : memref<216x256xf32, #tpu.memory_space<vmem>>, vector<8x63xf32>
    tpu.vector_store %arg41[%c24_299, %c1_300], %288 {strides = array<i32>} : memref<216x256xf32, #tpu.memory_space<vmem>>, vector<8x63xf32>,
    %c0_301 = arith.constant 0 : index
    %c0_302 = arith.constant 0 : index
    %290 = vector.load %arg39[%c0_301, %c0_302] : memref<32x256xf32, #tpu.memory_space<vmem>>, vector<8x64xf32>
    %c4_303 = arith.constant 4 : index
    %c0_304 = arith.constant 0 : index
    %291 = vector.load %arg4[%c4_303, %c0_304] : memref<9x64xf32, #tpu.memory_space<vmem>>, vector<1x64xf32>
    %292 = vector.broadcast %291 : vector<1x64xf32> to vector<8x64xf32>
    %293 = arith.mulf %290, %292 : vector<8x64xf32>
    %c32_305 = arith.constant 32 : index
    %c0_306 = arith.constant 0 : index
    %294 = vector.load %arg41[%c32_305, %c0_306] : memref<216x256xf32, #tpu.memory_space<vmem>>, vector<8x64xf32>
    tpu.vector_store %arg41[%c32_305, %c0_306], %293 {strides = array<i32>} : memref<216x256xf32, #tpu.memory_space<vmem>>, vector<8x64xf32>,
    %c0_307 = arith.constant 0 : index
    %c1_308 = arith.constant 1 : index
    %295 = vector.load %arg39[%c0_307, %c1_308] : memref<32x256xf32, #tpu.memory_space<vmem>>, vector<8x63xf32>
    %c5_309 = arith.constant 5 : index
    %c0_310 = arith.constant 0 : index
    %296 = vector.load %arg4[%c5_309, %c0_310] : memref<9x64xf32, #tpu.memory_space<vmem>>, vector<1x63xf32>
    %297 = vector.broadcast %296 : vector<1x63xf32> to vector<8x63xf32>
    %298 = arith.mulf %295, %297 : vector<8x63xf32>
    %c40_311 = arith.constant 40 : index
    %c0_312 = arith.constant 0 : index
    %299 = vector.load %arg41[%c40_311, %c0_312] : memref<216x256xf32, #tpu.memory_space<vmem>>, vector<8x63xf32>
    tpu.vector_store %arg41[%c40_311, %c0_312], %298 {strides = array<i32>} : memref<216x256xf32, #tpu.memory_space<vmem>>, vector<8x63xf32>,
    %c0_313 = arith.constant 0 : index
    %c7_314 = arith.constant 7 : index
    %300 = vector.load %arg39[%c0_313, %c7_314] : memref<32x256xf32, #tpu.memory_space<vmem>>, vector<8x57xf32>
    %c6_315 = arith.constant 6 : index
    %c0_316 = arith.constant 0 : index
    %301 = vector.load %arg4[%c6_315, %c0_316] : memref<9x64xf32, #tpu.memory_space<vmem>>, vector<1x57xf32>
    %302 = vector.broadcast %301 : vector<1x57xf32> to vector<8x57xf32>
    %303 = arith.mulf %300, %302 : vector<8x57xf32>
    %c48_317 = arith.constant 48 : index
    %c0_318 = arith.constant 0 : index
    %304 = vector.load %arg41[%c48_317, %c0_318] : memref<216x256xf32, #tpu.memory_space<vmem>>, vector<8x57xf32>
    tpu.vector_store %arg41[%c48_317, %c0_318], %303 {strides = array<i32>} : memref<216x256xf32, #tpu.memory_space<vmem>>, vector<8x57xf32>,
    %c0_319 = arith.constant 0 : index
    %c8_320 = arith.constant 8 : index
    %305 = vector.load %arg39[%c0_319, %c8_320] : memref<32x256xf32, #tpu.memory_space<vmem>>, vector<8x56xf32>
    %c7_321 = arith.constant 7 : index
    %c0_322 = arith.constant 0 : index
    %306 = vector.load %arg4[%c7_321, %c0_322] : memref<9x64xf32, #tpu.memory_space<vmem>>, vector<1x56xf32>
    %307 = vector.broadcast %306 : vector<1x56xf32> to vector<8x56xf32>
    %308 = arith.mulf %305, %307 : vector<8x56xf32>
    %c56_323 = arith.constant 56 : index
    %c0_324 = arith.constant 0 : index
    %309 = vector.load %arg41[%c56_323, %c0_324] : memref<216x256xf32, #tpu.memory_space<vmem>>, vector<8x56xf32>
    tpu.vector_store %arg41[%c56_323, %c0_324], %308 {strides = array<i32>} : memref<216x256xf32, #tpu.memory_space<vmem>>, vector<8x56xf32>,
    %c0_325 = arith.constant 0 : index
    %c9_326 = arith.constant 9 : index
    %310 = vector.load %arg39[%c0_325, %c9_326] : memref<32x256xf32, #tpu.memory_space<vmem>>, vector<8x55xf32>
    %c8_327 = arith.constant 8 : index
    %c0_328 = arith.constant 0 : index
    %311 = vector.load %arg4[%c8_327, %c0_328] : memref<9x64xf32, #tpu.memory_space<vmem>>, vector<1x55xf32>
    %312 = vector.broadcast %311 : vector<1x55xf32> to vector<8x55xf32>
    %313 = arith.mulf %310, %312 : vector<8x55xf32>
    %c64_329 = arith.constant 64 : index
    %c0_330 = arith.constant 0 : index
    %314 = vector.load %arg41[%c64_329, %c0_330] : memref<216x256xf32, #tpu.memory_space<vmem>>, vector<8x55xf32>
    tpu.vector_store %arg41[%c64_329, %c0_330], %313 {strides = array<i32>} : memref<216x256xf32, #tpu.memory_space<vmem>>, vector<8x55xf32>,
    %c0_331 = arith.constant 0 : index
    %c0_332 = arith.constant 0 : index
    %315 = vector.load %arg20[%c0_331, %c0_332] : memref<8x72xbf16, #tpu.memory_space<vmem>>, vector<8x72xbf16>
    %c0_333 = arith.constant 0 : index
    %c0_334 = arith.constant 0 : index
    %316 = vector.load %arg41[%c0_333, %c0_334] : memref<216x256xf32, #tpu.memory_space<vmem>>, vector<72x64xf32>
    %317 = arith.truncf %316 : vector<72x64xf32> to vector<72x64xbf16>
    %cst_335 = arith.constant dense<0.000000e+00> : vector<8x64xf32>
    %318 = tpu.matmul %315, %317, %cst_335 {dimension_numbers = #tpu.dot_dimension_numbers<[1], [0], [0], [1], [0, 0, 1, 1], [], []>} : vector<8x72xbf16>, vector<72x64xbf16>, vector<8x64xf32> -> vector<8x64xf32>
    %c0_336 = arith.constant 0 : index
    %c0_337 = arith.constant 0 : index
    %319 = vector.load %arg21[%c0_336, %c0_337] : memref<8x1xf32, #tpu.memory_space<vmem>>, vector<8x1xf32>
    %320 = vector.broadcast %319 : vector<8x1xf32> to vector<8x64xf32>
    %321 = arith.addf %318, %320 : vector<8x64xf32>
    %cst_338 = arith.constant 0.000000e+00 : f32
    %322 = vector.broadcast %cst_338 : f32 to vector<8x64xf32>
    %323 = arith.cmpf ogt, %321, %322 : vector<8x64xf32>
    %cst_339 = arith.constant 0.000000e+00 : f32
    %324 = vector.broadcast %cst_339 : f32 to vector<8x64xf32>
    %325 = arith.minimumf %321, %324 : vector<8x64xf32>
    %326 = math.exp %325 : vector<8x64xf32>
    %cst_340 = arith.constant 1.000000e+00 : f32
    %327 = vector.broadcast %cst_340 : f32 to vector<8x64xf32>
    %328 = arith.subf %326, %327 : vector<8x64xf32>
    %329 = arith.select %323, %321, %328 : vector<8x64xi1>, vector<8x64xf32>
    %c0_341 = arith.constant 0 : index
    %c0_342 = arith.constant 0 : index
    %330 = vector.load %arg40[%c0_341, %c0_342] : memref<32x256xf32, #tpu.memory_space<vmem>>, vector<8x64xf32>
    tpu.vector_store %arg40[%c0_341, %c0_342], %329 {strides = array<i32>} : memref<32x256xf32, #tpu.memory_space<vmem>>, vector<8x64xf32>,
    %c0_343 = arith.constant 0 : index
    %c0_344 = arith.constant 0 : index
    %331 = vector.load %arg22[%c0_343, %c0_344] : memref<16x8xbf16, #tpu.memory_space<vmem>>, vector<16x8xbf16>
    %c0_345 = arith.constant 0 : index
    %c0_346 = arith.constant 0 : index
    %332 = vector.load %arg40[%c0_345, %c0_346] : memref<32x256xf32, #tpu.memory_space<vmem>>, vector<8x64xf32>
    %333 = arith.truncf %332 : vector<8x64xf32> to vector<8x64xbf16>
    %cst_347 = arith.constant dense<0.000000e+00> : vector<16x64xf32>
    %334 = tpu.matmul %331, %333, %cst_347 {dimension_numbers = #tpu.dot_dimension_numbers<[1], [0], [0], [1], [0, 0, 1, 1], [], []>} : vector<16x8xbf16>, vector<8x64xbf16>, vector<16x64xf32> -> vector<16x64xf32>
    %c0_348 = arith.constant 0 : index
    %c0_349 = arith.constant 0 : index
    %335 = vector.load %arg23[%c0_348, %c0_349] : memref<16x1xf32, #tpu.memory_space<vmem>>, vector<16x1xf32>
    %336 = vector.broadcast %335 : vector<16x1xf32> to vector<16x64xf32>
    %337 = arith.addf %334, %336 : vector<16x64xf32>
    %c0_350 = arith.constant 0 : index
    %c0_351 = arith.constant 0 : index
    %338 = vector.load %arg39[%c0_350, %c0_351] : memref<32x256xf32, #tpu.memory_space<vmem>>, vector<16x64xf32>
    tpu.vector_store %arg39[%c0_350, %c0_351], %337 {strides = array<i32>} : memref<32x256xf32, #tpu.memory_space<vmem>>, vector<16x64xf32>,
    %c0_352 = arith.constant 0 : index
    %c0_353 = arith.constant 0 : index
    %339 = vector.load %arg39[%c0_352, %c0_353] : memref<32x256xf32, #tpu.memory_space<vmem>>, vector<16x64xf32>
    %340 = arith.truncf %339 : vector<16x64xf32> to vector<16x64xbf16>
    %c0_354 = arith.constant 0 : index
    %c0_355 = arith.constant 0 : index
    %341 = vector.load %arg5[%c0_354, %c0_355] : memref<64x16xbf16, #tpu.memory_space<vmem>>, vector<64x16xbf16>
    %cst_356 = arith.constant dense<0.000000e+00> : vector<16x16xf32>
    %342 = tpu.matmul %340, %341, %cst_356 {dimension_numbers = #tpu.dot_dimension_numbers<[1], [0], [0], [1], [0, 0, 1, 1], [], []>} : vector<16x64xbf16>, vector<64x16xbf16>, vector<16x16xf32> -> vector<16x16xf32>
    %c0_357 = arith.constant 0 : index
    %c0_358 = arith.constant 0 : index
    %343 = vector.load %arg40[%c0_357, %c0_358] : memref<32x256xf32, #tpu.memory_space<vmem>>, vector<16x16xf32>
    tpu.vector_store %arg40[%c0_357, %c0_358], %342 {strides = array<i32>} : memref<32x256xf32, #tpu.memory_space<vmem>>, vector<16x16xf32>,
    %cst_359 = arith.constant 0.000000e+00 : f32
    %344 = vector.broadcast %cst_359 : f32 to vector<144x16xf32>
    %c0_360 = arith.constant 0 : index
    %c0_361 = arith.constant 0 : index
    %345 = vector.load %arg41[%c0_360, %c0_361] : memref<216x256xf32, #tpu.memory_space<vmem>>, vector<144x16xf32>
    tpu.vector_store %arg41[%c0_360, %c0_361], %344 {strides = array<i32>} : memref<216x256xf32, #tpu.memory_space<vmem>>, vector<144x16xf32>,
    %c0_362 = arith.constant 0 : index
    %c0_363 = arith.constant 0 : index
    %346 = vector.load %arg40[%c0_362, %c0_363] : memref<32x256xf32, #tpu.memory_space<vmem>>, vector<16x11xf32>
    %c0_364 = arith.constant 0 : index
    %c5_365 = arith.constant 5 : index
    %347 = vector.load %arg6[%c0_364, %c5_365] : memref<9x16xf32, #tpu.memory_space<vmem>>, vector<1x11xf32>
    %348 = vector.broadcast %347 : vector<1x11xf32> to vector<16x11xf32>
    %349 = arith.mulf %346, %348 : vector<16x11xf32>
    %c0_366 = arith.constant 0 : index
    %c5_367 = arith.constant 5 : index
    %350 = vector.load %arg41[%c0_366, %c5_367] : memref<216x256xf32, #tpu.memory_space<vmem>>, vector<16x11xf32>
    tpu.vector_store %arg41[%c0_366, %c5_367], %349 {strides = array<i32>} : memref<216x256xf32, #tpu.memory_space<vmem>>, vector<16x11xf32>,
    %c0_368 = arith.constant 0 : index
    %c0_369 = arith.constant 0 : index
    %351 = vector.load %arg40[%c0_368, %c0_369] : memref<32x256xf32, #tpu.memory_space<vmem>>, vector<16x12xf32>
    %c1_370 = arith.constant 1 : index
    %c4_371 = arith.constant 4 : index
    %352 = vector.load %arg6[%c1_370, %c4_371] : memref<9x16xf32, #tpu.memory_space<vmem>>, vector<1x12xf32>
    %353 = vector.broadcast %352 : vector<1x12xf32> to vector<16x12xf32>
    %354 = arith.mulf %351, %353 : vector<16x12xf32>
    %c16_372 = arith.constant 16 : index
    %c4_373 = arith.constant 4 : index
    %355 = vector.load %arg41[%c16_372, %c4_373] : memref<216x256xf32, #tpu.memory_space<vmem>>, vector<16x12xf32>
    tpu.vector_store %arg41[%c16_372, %c4_373], %354 {strides = array<i32>} : memref<216x256xf32, #tpu.memory_space<vmem>>, vector<16x12xf32>,
    %c0_374 = arith.constant 0 : index
    %c0_375 = arith.constant 0 : index
    %356 = vector.load %arg40[%c0_374, %c0_375] : memref<32x256xf32, #tpu.memory_space<vmem>>, vector<16x13xf32>
    %c2_376 = arith.constant 2 : index
    %c3_377 = arith.constant 3 : index
    %357 = vector.load %arg6[%c2_376, %c3_377] : memref<9x16xf32, #tpu.memory_space<vmem>>, vector<1x13xf32>
    %358 = vector.broadcast %357 : vector<1x13xf32> to vector<16x13xf32>
    %359 = arith.mulf %356, %358 : vector<16x13xf32>
    %c32_378 = arith.constant 32 : index
    %c3_379 = arith.constant 3 : index
    %360 = vector.load %arg41[%c32_378, %c3_379] : memref<216x256xf32, #tpu.memory_space<vmem>>, vector<16x13xf32>
    tpu.vector_store %arg41[%c32_378, %c3_379], %359 {strides = array<i32>} : memref<216x256xf32, #tpu.memory_space<vmem>>, vector<16x13xf32>,
    %c0_380 = arith.constant 0 : index
    %c0_381 = arith.constant 0 : index
    %361 = vector.load %arg40[%c0_380, %c0_381] : memref<32x256xf32, #tpu.memory_space<vmem>>, vector<16x15xf32>
    %c3_382 = arith.constant 3 : index
    %c1_383 = arith.constant 1 : index
    %362 = vector.load %arg6[%c3_382, %c1_383] : memref<9x16xf32, #tpu.memory_space<vmem>>, vector<1x15xf32>
    %363 = vector.broadcast %362 : vector<1x15xf32> to vector<16x15xf32>
    %364 = arith.mulf %361, %363 : vector<16x15xf32>
    %c48_384 = arith.constant 48 : index
    %c1_385 = arith.constant 1 : index
    %365 = vector.load %arg41[%c48_384, %c1_385] : memref<216x256xf32, #tpu.memory_space<vmem>>, vector<16x15xf32>
    tpu.vector_store %arg41[%c48_384, %c1_385], %364 {strides = array<i32>} : memref<216x256xf32, #tpu.memory_space<vmem>>, vector<16x15xf32>,
    %c0_386 = arith.constant 0 : index
    %c0_387 = arith.constant 0 : index
    %366 = vector.load %arg40[%c0_386, %c0_387] : memref<32x256xf32, #tpu.memory_space<vmem>>, vector<16x16xf32>
    %c4_388 = arith.constant 4 : index
    %c0_389 = arith.constant 0 : index
    %367 = vector.load %arg6[%c4_388, %c0_389] : memref<9x16xf32, #tpu.memory_space<vmem>>, vector<1x16xf32>
    %368 = vector.broadcast %367 : vector<1x16xf32> to vector<16x16xf32>
    %369 = arith.mulf %366, %368 : vector<16x16xf32>
    %c64_390 = arith.constant 64 : index
    %c0_391 = arith.constant 0 : index
    %370 = vector.load %arg41[%c64_390, %c0_391] : memref<216x256xf32, #tpu.memory_space<vmem>>, vector<16x16xf32>
    tpu.vector_store %arg41[%c64_390, %c0_391], %369 {strides = array<i32>} : memref<216x256xf32, #tpu.memory_space<vmem>>, vector<16x16xf32>,
    %c0_392 = arith.constant 0 : index
    %c1_393 = arith.constant 1 : index
    %371 = vector.load %arg40[%c0_392, %c1_393] : memref<32x256xf32, #tpu.memory_space<vmem>>, vector<16x15xf32>
    %c5_394 = arith.constant 5 : index
    %c0_395 = arith.constant 0 : index
    %372 = vector.load %arg6[%c5_394, %c0_395] : memref<9x16xf32, #tpu.memory_space<vmem>>, vector<1x15xf32>
    %373 = vector.broadcast %372 : vector<1x15xf32> to vector<16x15xf32>
    %374 = arith.mulf %371, %373 : vector<16x15xf32>
    %c80 = arith.constant 80 : index
    %c0_396 = arith.constant 0 : index
    %375 = vector.load %arg41[%c80, %c0_396] : memref<216x256xf32, #tpu.memory_space<vmem>>, vector<16x15xf32>
    tpu.vector_store %arg41[%c80, %c0_396], %374 {strides = array<i32>} : memref<216x256xf32, #tpu.memory_space<vmem>>, vector<16x15xf32>,
    %c0_397 = arith.constant 0 : index
    %c3_398 = arith.constant 3 : index
    %376 = vector.load %arg40[%c0_397, %c3_398] : memref<32x256xf32, #tpu.memory_space<vmem>>, vector<16x13xf32>
    %c6_399 = arith.constant 6 : index
    %c0_400 = arith.constant 0 : index
    %377 = vector.load %arg6[%c6_399, %c0_400] : memref<9x16xf32, #tpu.memory_space<vmem>>, vector<1x13xf32>
    %378 = vector.broadcast %377 : vector<1x13xf32> to vector<16x13xf32>
    %379 = arith.mulf %376, %378 : vector<16x13xf32>
    %c96 = arith.constant 96 : index
    %c0_401 = arith.constant 0 : index
    %380 = vector.load %arg41[%c96, %c0_401] : memref<216x256xf32, #tpu.memory_space<vmem>>, vector<16x13xf32>
    tpu.vector_store %arg41[%c96, %c0_401], %379 {strides = array<i32>} : memref<216x256xf32, #tpu.memory_space<vmem>>, vector<16x13xf32>,
    %c0_402 = arith.constant 0 : index
    %c4_403 = arith.constant 4 : index
    %381 = vector.load %arg40[%c0_402, %c4_403] : memref<32x256xf32, #tpu.memory_space<vmem>>, vector<16x12xf32>
    %c7_404 = arith.constant 7 : index
    %c0_405 = arith.constant 0 : index
    %382 = vector.load %arg6[%c7_404, %c0_405] : memref<9x16xf32, #tpu.memory_space<vmem>>, vector<1x12xf32>
    %383 = vector.broadcast %382 : vector<1x12xf32> to vector<16x12xf32>
    %384 = arith.mulf %381, %383 : vector<16x12xf32>
    %c112 = arith.constant 112 : index
    %c0_406 = arith.constant 0 : index
    %385 = vector.load %arg41[%c112, %c0_406] : memref<216x256xf32, #tpu.memory_space<vmem>>, vector<16x12xf32>
    tpu.vector_store %arg41[%c112, %c0_406], %384 {strides = array<i32>} : memref<216x256xf32, #tpu.memory_space<vmem>>, vector<16x12xf32>,
    %c0_407 = arith.constant 0 : index
    %c5_408 = arith.constant 5 : index
    %386 = vector.load %arg40[%c0_407, %c5_408] : memref<32x256xf32, #tpu.memory_space<vmem>>, vector<16x11xf32>
    %c8_409 = arith.constant 8 : index
    %c0_410 = arith.constant 0 : index
    %387 = vector.load %arg6[%c8_409, %c0_410] : memref<9x16xf32, #tpu.memory_space<vmem>>, vector<1x11xf32>
    %388 = vector.broadcast %387 : vector<1x11xf32> to vector<16x11xf32>
    %389 = arith.mulf %386, %388 : vector<16x11xf32>
    %c128 = arith.constant 128 : index
    %c0_411 = arith.constant 0 : index
    %390 = vector.load %arg41[%c128, %c0_411] : memref<216x256xf32, #tpu.memory_space<vmem>>, vector<16x11xf32>
    tpu.vector_store %arg41[%c128, %c0_411], %389 {strides = array<i32>} : memref<216x256xf32, #tpu.memory_space<vmem>>, vector<16x11xf32>,
    %c0_412 = arith.constant 0 : index
    %c0_413 = arith.constant 0 : index
    %391 = vector.load %arg24[%c0_412, %c0_413] : memref<16x144xbf16, #tpu.memory_space<vmem>>, vector<16x144xbf16>
    %c0_414 = arith.constant 0 : index
    %c0_415 = arith.constant 0 : index
    %392 = vector.load %arg41[%c0_414, %c0_415] : memref<216x256xf32, #tpu.memory_space<vmem>>, vector<144x16xf32>
    %393 = arith.truncf %392 : vector<144x16xf32> to vector<144x16xbf16>
    %cst_416 = arith.constant dense<0.000000e+00> : vector<16x16xf32>
    %394 = tpu.matmul %391, %393, %cst_416 {dimension_numbers = #tpu.dot_dimension_numbers<[1], [0], [0], [1], [0, 0, 1, 1], [], []>} : vector<16x144xbf16>, vector<144x16xbf16>, vector<16x16xf32> -> vector<16x16xf32>
    %c0_417 = arith.constant 0 : index
    %c0_418 = arith.constant 0 : index
    %395 = vector.load %arg25[%c0_417, %c0_418] : memref<16x1xf32, #tpu.memory_space<vmem>>, vector<16x1xf32>
    %396 = vector.broadcast %395 : vector<16x1xf32> to vector<16x16xf32>
    %397 = arith.addf %394, %396 : vector<16x16xf32>
    %cst_419 = arith.constant 0.000000e+00 : f32
    %398 = vector.broadcast %cst_419 : f32 to vector<16x16xf32>
    %399 = arith.cmpf ogt, %397, %398 : vector<16x16xf32>
    %cst_420 = arith.constant 0.000000e+00 : f32
    %400 = vector.broadcast %cst_420 : f32 to vector<16x16xf32>
    %401 = arith.minimumf %397, %400 : vector<16x16xf32>
    %402 = math.exp %401 : vector<16x16xf32>
    %cst_421 = arith.constant 1.000000e+00 : f32
    %403 = vector.broadcast %cst_421 : f32 to vector<16x16xf32>
    %404 = arith.subf %402, %403 : vector<16x16xf32>
    %405 = arith.select %399, %397, %404 : vector<16x16xi1>, vector<16x16xf32>
    %c0_422 = arith.constant 0 : index
    %c0_423 = arith.constant 0 : index
    %406 = vector.load %arg39[%c0_422, %c0_423] : memref<32x256xf32, #tpu.memory_space<vmem>>, vector<16x16xf32>
    tpu.vector_store %arg39[%c0_422, %c0_423], %405 {strides = array<i32>} : memref<32x256xf32, #tpu.memory_space<vmem>>, vector<16x16xf32>,
    %cst_424 = arith.constant 0.000000e+00 : f32
    %407 = vector.broadcast %cst_424 : f32 to vector<144x16xf32>
    %c0_425 = arith.constant 0 : index
    %c0_426 = arith.constant 0 : index
    %408 = vector.load %arg41[%c0_425, %c0_426] : memref<216x256xf32, #tpu.memory_space<vmem>>, vector<144x16xf32>
    tpu.vector_store %arg41[%c0_425, %c0_426], %407 {strides = array<i32>} : memref<216x256xf32, #tpu.memory_space<vmem>>, vector<144x16xf32>,
    %c0_427 = arith.constant 0 : index
    %c0_428 = arith.constant 0 : index
    %409 = vector.load %arg39[%c0_427, %c0_428] : memref<32x256xf32, #tpu.memory_space<vmem>>, vector<16x11xf32>
    %c0_429 = arith.constant 0 : index
    %c5_430 = arith.constant 5 : index
    %410 = vector.load %arg6[%c0_429, %c5_430] : memref<9x16xf32, #tpu.memory_space<vmem>>, vector<1x11xf32>
    %411 = vector.broadcast %410 : vector<1x11xf32> to vector<16x11xf32>
    %412 = arith.mulf %409, %411 : vector<16x11xf32>
    %c0_431 = arith.constant 0 : index
    %c5_432 = arith.constant 5 : index
    %413 = vector.load %arg41[%c0_431, %c5_432] : memref<216x256xf32, #tpu.memory_space<vmem>>, vector<16x11xf32>
    tpu.vector_store %arg41[%c0_431, %c5_432], %412 {strides = array<i32>} : memref<216x256xf32, #tpu.memory_space<vmem>>, vector<16x11xf32>,
    %c0_433 = arith.constant 0 : index
    %c0_434 = arith.constant 0 : index
    %414 = vector.load %arg39[%c0_433, %c0_434] : memref<32x256xf32, #tpu.memory_space<vmem>>, vector<16x12xf32>
    %c1_435 = arith.constant 1 : index
    %c4_436 = arith.constant 4 : index
    %415 = vector.load %arg6[%c1_435, %c4_436] : memref<9x16xf32, #tpu.memory_space<vmem>>, vector<1x12xf32>
    %416 = vector.broadcast %415 : vector<1x12xf32> to vector<16x12xf32>
    %417 = arith.mulf %414, %416 : vector<16x12xf32>
    %c16_437 = arith.constant 16 : index
    %c4_438 = arith.constant 4 : index
    %418 = vector.load %arg41[%c16_437, %c4_438] : memref<216x256xf32, #tpu.memory_space<vmem>>, vector<16x12xf32>
    tpu.vector_store %arg41[%c16_437, %c4_438], %417 {strides = array<i32>} : memref<216x256xf32, #tpu.memory_space<vmem>>, vector<16x12xf32>,
    %c0_439 = arith.constant 0 : index
    %c0_440 = arith.constant 0 : index
    %419 = vector.load %arg39[%c0_439, %c0_440] : memref<32x256xf32, #tpu.memory_space<vmem>>, vector<16x13xf32>
    %c2_441 = arith.constant 2 : index
    %c3_442 = arith.constant 3 : index
    %420 = vector.load %arg6[%c2_441, %c3_442] : memref<9x16xf32, #tpu.memory_space<vmem>>, vector<1x13xf32>
    %421 = vector.broadcast %420 : vector<1x13xf32> to vector<16x13xf32>
    %422 = arith.mulf %419, %421 : vector<16x13xf32>
    %c32_443 = arith.constant 32 : index
    %c3_444 = arith.constant 3 : index
    %423 = vector.load %arg41[%c32_443, %c3_444] : memref<216x256xf32, #tpu.memory_space<vmem>>, vector<16x13xf32>
    tpu.vector_store %arg41[%c32_443, %c3_444], %422 {strides = array<i32>} : memref<216x256xf32, #tpu.memory_space<vmem>>, vector<16x13xf32>,
    %c0_445 = arith.constant 0 : index
    %c0_446 = arith.constant 0 : index
    %424 = vector.load %arg39[%c0_445, %c0_446] : memref<32x256xf32, #tpu.memory_space<vmem>>, vector<16x15xf32>
    %c3_447 = arith.constant 3 : index
    %c1_448 = arith.constant 1 : index
    %425 = vector.load %arg6[%c3_447, %c1_448] : memref<9x16xf32, #tpu.memory_space<vmem>>, vector<1x15xf32>
    %426 = vector.broadcast %425 : vector<1x15xf32> to vector<16x15xf32>
    %427 = arith.mulf %424, %426 : vector<16x15xf32>
    %c48_449 = arith.constant 48 : index
    %c1_450 = arith.constant 1 : index
    %428 = vector.load %arg41[%c48_449, %c1_450] : memref<216x256xf32, #tpu.memory_space<vmem>>, vector<16x15xf32>
    tpu.vector_store %arg41[%c48_449, %c1_450], %427 {strides = array<i32>} : memref<216x256xf32, #tpu.memory_space<vmem>>, vector<16x15xf32>,
    %c0_451 = arith.constant 0 : index
    %c0_452 = arith.constant 0 : index
    %429 = vector.load %arg39[%c0_451, %c0_452] : memref<32x256xf32, #tpu.memory_space<vmem>>, vector<16x16xf32>
    %c4_453 = arith.constant 4 : index
    %c0_454 = arith.constant 0 : index
    %430 = vector.load %arg6[%c4_453, %c0_454] : memref<9x16xf32, #tpu.memory_space<vmem>>, vector<1x16xf32>
    %431 = vector.broadcast %430 : vector<1x16xf32> to vector<16x16xf32>
    %432 = arith.mulf %429, %431 : vector<16x16xf32>
    %c64_455 = arith.constant 64 : index
    %c0_456 = arith.constant 0 : index
    %433 = vector.load %arg41[%c64_455, %c0_456] : memref<216x256xf32, #tpu.memory_space<vmem>>, vector<16x16xf32>
    tpu.vector_store %arg41[%c64_455, %c0_456], %432 {strides = array<i32>} : memref<216x256xf32, #tpu.memory_space<vmem>>, vector<16x16xf32>,
    %c0_457 = arith.constant 0 : index
    %c1_458 = arith.constant 1 : index
    %434 = vector.load %arg39[%c0_457, %c1_458] : memref<32x256xf32, #tpu.memory_space<vmem>>, vector<16x15xf32>
    %c5_459 = arith.constant 5 : index
    %c0_460 = arith.constant 0 : index
    %435 = vector.load %arg6[%c5_459, %c0_460] : memref<9x16xf32, #tpu.memory_space<vmem>>, vector<1x15xf32>
    %436 = vector.broadcast %435 : vector<1x15xf32> to vector<16x15xf32>
    %437 = arith.mulf %434, %436 : vector<16x15xf32>
    %c80_461 = arith.constant 80 : index
    %c0_462 = arith.constant 0 : index
    %438 = vector.load %arg41[%c80_461, %c0_462] : memref<216x256xf32, #tpu.memory_space<vmem>>, vector<16x15xf32>
    tpu.vector_store %arg41[%c80_461, %c0_462], %437 {strides = array<i32>} : memref<216x256xf32, #tpu.memory_space<vmem>>, vector<16x15xf32>,
    %c0_463 = arith.constant 0 : index
    %c3_464 = arith.constant 3 : index
    %439 = vector.load %arg39[%c0_463, %c3_464] : memref<32x256xf32, #tpu.memory_space<vmem>>, vector<16x13xf32>
    %c6_465 = arith.constant 6 : index
    %c0_466 = arith.constant 0 : index
    %440 = vector.load %arg6[%c6_465, %c0_466] : memref<9x16xf32, #tpu.memory_space<vmem>>, vector<1x13xf32>
    %441 = vector.broadcast %440 : vector<1x13xf32> to vector<16x13xf32>
    %442 = arith.mulf %439, %441 : vector<16x13xf32>
    %c96_467 = arith.constant 96 : index
    %c0_468 = arith.constant 0 : index
    %443 = vector.load %arg41[%c96_467, %c0_468] : memref<216x256xf32, #tpu.memory_space<vmem>>, vector<16x13xf32>
    tpu.vector_store %arg41[%c96_467, %c0_468], %442 {strides = array<i32>} : memref<216x256xf32, #tpu.memory_space<vmem>>, vector<16x13xf32>,
    %c0_469 = arith.constant 0 : index
    %c4_470 = arith.constant 4 : index
    %444 = vector.load %arg39[%c0_469, %c4_470] : memref<32x256xf32, #tpu.memory_space<vmem>>, vector<16x12xf32>
    %c7_471 = arith.constant 7 : index
    %c0_472 = arith.constant 0 : index
    %445 = vector.load %arg6[%c7_471, %c0_472] : memref<9x16xf32, #tpu.memory_space<vmem>>, vector<1x12xf32>
    %446 = vector.broadcast %445 : vector<1x12xf32> to vector<16x12xf32>
    %447 = arith.mulf %444, %446 : vector<16x12xf32>
    %c112_473 = arith.constant 112 : index
    %c0_474 = arith.constant 0 : index
    %448 = vector.load %arg41[%c112_473, %c0_474] : memref<216x256xf32, #tpu.memory_space<vmem>>, vector<16x12xf32>
    tpu.vector_store %arg41[%c112_473, %c0_474], %447 {strides = array<i32>} : memref<216x256xf32, #tpu.memory_space<vmem>>, vector<16x12xf32>,
    %c0_475 = arith.constant 0 : index
    %c5_476 = arith.constant 5 : index
    %449 = vector.load %arg39[%c0_475, %c5_476] : memref<32x256xf32, #tpu.memory_space<vmem>>, vector<16x11xf32>
    %c8_477 = arith.constant 8 : index
    %c0_478 = arith.constant 0 : index
    %450 = vector.load %arg6[%c8_477, %c0_478] : memref<9x16xf32, #tpu.memory_space<vmem>>, vector<1x11xf32>
    %451 = vector.broadcast %450 : vector<1x11xf32> to vector<16x11xf32>
    %452 = arith.mulf %449, %451 : vector<16x11xf32>
    %c128_479 = arith.constant 128 : index
    %c0_480 = arith.constant 0 : index
    %453 = vector.load %arg41[%c128_479, %c0_480] : memref<216x256xf32, #tpu.memory_space<vmem>>, vector<16x11xf32>
    tpu.vector_store %arg41[%c128_479, %c0_480], %452 {strides = array<i32>} : memref<216x256xf32, #tpu.memory_space<vmem>>, vector<16x11xf32>,
    %c0_481 = arith.constant 0 : index
    %c0_482 = arith.constant 0 : index
    %454 = vector.load %arg26[%c0_481, %c0_482] : memref<16x144xbf16, #tpu.memory_space<vmem>>, vector<16x144xbf16>
    %c0_483 = arith.constant 0 : index
    %c0_484 = arith.constant 0 : index
    %455 = vector.load %arg41[%c0_483, %c0_484] : memref<216x256xf32, #tpu.memory_space<vmem>>, vector<144x16xf32>
    %456 = arith.truncf %455 : vector<144x16xf32> to vector<144x16xbf16>
    %cst_485 = arith.constant dense<0.000000e+00> : vector<16x16xf32>
    %457 = tpu.matmul %454, %456, %cst_485 {dimension_numbers = #tpu.dot_dimension_numbers<[1], [0], [0], [1], [0, 0, 1, 1], [], []>} : vector<16x144xbf16>, vector<144x16xbf16>, vector<16x16xf32> -> vector<16x16xf32>
    %c0_486 = arith.constant 0 : index
    %c0_487 = arith.constant 0 : index
    %458 = vector.load %arg27[%c0_486, %c0_487] : memref<16x1xf32, #tpu.memory_space<vmem>>, vector<16x1xf32>
    %459 = vector.broadcast %458 : vector<16x1xf32> to vector<16x16xf32>
    %460 = arith.addf %457, %459 : vector<16x16xf32>
    %cst_488 = arith.constant 0.000000e+00 : f32
    %461 = vector.broadcast %cst_488 : f32 to vector<16x16xf32>
    %462 = arith.cmpf ogt, %460, %461 : vector<16x16xf32>
    %cst_489 = arith.constant 0.000000e+00 : f32
    %463 = vector.broadcast %cst_489 : f32 to vector<16x16xf32>
    %464 = arith.minimumf %460, %463 : vector<16x16xf32>
    %465 = math.exp %464 : vector<16x16xf32>
    %cst_490 = arith.constant 1.000000e+00 : f32
    %466 = vector.broadcast %cst_490 : f32 to vector<16x16xf32>
    %467 = arith.subf %465, %466 : vector<16x16xf32>
    %468 = arith.select %462, %460, %467 : vector<16x16xi1>, vector<16x16xf32>
    %c0_491 = arith.constant 0 : index
    %c0_492 = arith.constant 0 : index
    %469 = vector.load %arg40[%c0_491, %c0_492] : memref<32x256xf32, #tpu.memory_space<vmem>>, vector<16x16xf32>
    tpu.vector_store %arg40[%c0_491, %c0_492], %468 {strides = array<i32>} : memref<32x256xf32, #tpu.memory_space<vmem>>, vector<16x16xf32>,
    %c0_493 = arith.constant 0 : index
    %c0_494 = arith.constant 0 : index
    %470 = vector.load %arg28[%c0_493, %c0_494] : memref<24x16xbf16, #tpu.memory_space<vmem>>, vector<24x16xbf16>
    %c0_495 = arith.constant 0 : index
    %c0_496 = arith.constant 0 : index
    %471 = vector.load %arg40[%c0_495, %c0_496] : memref<32x256xf32, #tpu.memory_space<vmem>>, vector<16x16xf32>
    %472 = arith.truncf %471 : vector<16x16xf32> to vector<16x16xbf16>
    %cst_497 = arith.constant dense<0.000000e+00> : vector<24x16xf32>
    %473 = tpu.matmul %470, %472, %cst_497 {dimension_numbers = #tpu.dot_dimension_numbers<[1], [0], [0], [1], [0, 0, 1, 1], [], []>} : vector<24x16xbf16>, vector<16x16xbf16>, vector<24x16xf32> -> vector<24x16xf32>
    %c0_498 = arith.constant 0 : index
    %c0_499 = arith.constant 0 : index
    %474 = vector.load %arg29[%c0_498, %c0_499] : memref<24x1xf32, #tpu.memory_space<vmem>>, vector<24x1xf32>
    %475 = vector.broadcast %474 : vector<24x1xf32> to vector<24x16xf32>
    %476 = arith.addf %473, %475 : vector<24x16xf32>
    %c0_500 = arith.constant 0 : index
    %c0_501 = arith.constant 0 : index
    %477 = vector.load %arg39[%c0_500, %c0_501] : memref<32x256xf32, #tpu.memory_space<vmem>>, vector<24x16xf32>
    tpu.vector_store %arg39[%c0_500, %c0_501], %476 {strides = array<i32>} : memref<32x256xf32, #tpu.memory_space<vmem>>, vector<24x16xf32>,
    %c0_502 = arith.constant 0 : index
    %c0_503 = arith.constant 0 : index
    %478 = vector.load %arg39[%c0_502, %c0_503] : memref<32x256xf32, #tpu.memory_space<vmem>>, vector<24x16xf32>
    %479 = arith.truncf %478 : vector<24x16xf32> to vector<24x16xbf16>
    %c0_504 = arith.constant 0 : index
    %c0_505 = arith.constant 0 : index
    %480 = vector.load %arg7[%c0_504, %c0_505] : memref<16x4xbf16, #tpu.memory_space<vmem>>, vector<16x4xbf16>
    %cst_506 = arith.constant dense<0.000000e+00> : vector<24x4xf32>
    %481 = tpu.matmul %479, %480, %cst_506 {dimension_numbers = #tpu.dot_dimension_numbers<[1], [0], [0], [1], [0, 0, 1, 1], [], []>} : vector<24x16xbf16>, vector<16x4xbf16>, vector<24x4xf32> -> vector<24x4xf32>
    %c0_507 = arith.constant 0 : index
    %c0_508 = arith.constant 0 : index
    %482 = vector.load %arg40[%c0_507, %c0_508] : memref<32x256xf32, #tpu.memory_space<vmem>>, vector<24x4xf32>
    tpu.vector_store %arg40[%c0_507, %c0_508], %481 {strides = array<i32>} : memref<32x256xf32, #tpu.memory_space<vmem>>, vector<24x4xf32>,
    %cst_509 = arith.constant 0.000000e+00 : f32
    %483 = vector.broadcast %cst_509 : f32 to vector<216x4xf32>
    %c0_510 = arith.constant 0 : index
    %c0_511 = arith.constant 0 : index
    %484 = vector.load %arg41[%c0_510, %c0_511] : memref<216x256xf32, #tpu.memory_space<vmem>>, vector<216x4xf32>
    tpu.vector_store %arg41[%c0_510, %c0_511], %483 {strides = array<i32>} : memref<216x256xf32, #tpu.memory_space<vmem>>, vector<216x4xf32>,
    %c0_512 = arith.constant 0 : index
    %c0_513 = arith.constant 0 : index
    %485 = vector.load %arg40[%c0_512, %c0_513] : memref<32x256xf32, #tpu.memory_space<vmem>>, vector<24x1xf32>
    %c0_514 = arith.constant 0 : index
    %c3_515 = arith.constant 3 : index
    %486 = vector.load %arg8[%c0_514, %c3_515] : memref<9x4xf32, #tpu.memory_space<vmem>>, vector<1x1xf32>
    %487 = vector.broadcast %486 : vector<1x1xf32> to vector<24x1xf32>
    %488 = arith.mulf %485, %487 : vector<24x1xf32>
    %c0_516 = arith.constant 0 : index
    %c3_517 = arith.constant 3 : index
    %489 = vector.load %arg41[%c0_516, %c3_517] : memref<216x256xf32, #tpu.memory_space<vmem>>, vector<24x1xf32>
    tpu.vector_store %arg41[%c0_516, %c3_517], %488 {strides = array<i32>} : memref<216x256xf32, #tpu.memory_space<vmem>>, vector<24x1xf32>,
    %c0_518 = arith.constant 0 : index
    %c0_519 = arith.constant 0 : index
    %490 = vector.load %arg40[%c0_518, %c0_519] : memref<32x256xf32, #tpu.memory_space<vmem>>, vector<24x2xf32>
    %c1_520 = arith.constant 1 : index
    %c2_521 = arith.constant 2 : index
    %491 = vector.load %arg8[%c1_520, %c2_521] : memref<9x4xf32, #tpu.memory_space<vmem>>, vector<1x2xf32>
    %492 = vector.broadcast %491 : vector<1x2xf32> to vector<24x2xf32>
    %493 = arith.mulf %490, %492 : vector<24x2xf32>
    %c24_522 = arith.constant 24 : index
    %c2_523 = arith.constant 2 : index
    %494 = vector.load %arg41[%c24_522, %c2_523] : memref<216x256xf32, #tpu.memory_space<vmem>>, vector<24x2xf32>
    tpu.vector_store %arg41[%c24_522, %c2_523], %493 {strides = array<i32>} : memref<216x256xf32, #tpu.memory_space<vmem>>, vector<24x2xf32>,
    %c0_524 = arith.constant 0 : index
    %c0_525 = arith.constant 0 : index
    %495 = vector.load %arg40[%c0_524, %c0_525] : memref<32x256xf32, #tpu.memory_space<vmem>>, vector<24x3xf32>
    %c2_526 = arith.constant 2 : index
    %c1_527 = arith.constant 1 : index
    %496 = vector.load %arg8[%c2_526, %c1_527] : memref<9x4xf32, #tpu.memory_space<vmem>>, vector<1x3xf32>
    %497 = vector.broadcast %496 : vector<1x3xf32> to vector<24x3xf32>
    %498 = arith.mulf %495, %497 : vector<24x3xf32>
    %c48_528 = arith.constant 48 : index
    %c1_529 = arith.constant 1 : index
    %499 = vector.load %arg41[%c48_528, %c1_529] : memref<216x256xf32, #tpu.memory_space<vmem>>, vector<24x3xf32>
    tpu.vector_store %arg41[%c48_528, %c1_529], %498 {strides = array<i32>} : memref<216x256xf32, #tpu.memory_space<vmem>>, vector<24x3xf32>,
    %c0_530 = arith.constant 0 : index
    %c0_531 = arith.constant 0 : index
    %500 = vector.load %arg40[%c0_530, %c0_531] : memref<32x256xf32, #tpu.memory_space<vmem>>, vector<24x3xf32>
    %c3_532 = arith.constant 3 : index
    %c1_533 = arith.constant 1 : index
    %501 = vector.load %arg8[%c3_532, %c1_533] : memref<9x4xf32, #tpu.memory_space<vmem>>, vector<1x3xf32>
    %502 = vector.broadcast %501 : vector<1x3xf32> to vector<24x3xf32>
    %503 = arith.mulf %500, %502 : vector<24x3xf32>
    %c72 = arith.constant 72 : index
    %c1_534 = arith.constant 1 : index
    %504 = vector.load %arg41[%c72, %c1_534] : memref<216x256xf32, #tpu.memory_space<vmem>>, vector<24x3xf32>
    tpu.vector_store %arg41[%c72, %c1_534], %503 {strides = array<i32>} : memref<216x256xf32, #tpu.memory_space<vmem>>, vector<24x3xf32>,
    %c0_535 = arith.constant 0 : index
    %c0_536 = arith.constant 0 : index
    %505 = vector.load %arg40[%c0_535, %c0_536] : memref<32x256xf32, #tpu.memory_space<vmem>>, vector<24x4xf32>
    %c4_537 = arith.constant 4 : index
    %c0_538 = arith.constant 0 : index
    %506 = vector.load %arg8[%c4_537, %c0_538] : memref<9x4xf32, #tpu.memory_space<vmem>>, vector<1x4xf32>
    %507 = vector.broadcast %506 : vector<1x4xf32> to vector<24x4xf32>
    %508 = arith.mulf %505, %507 : vector<24x4xf32>
    %c96_539 = arith.constant 96 : index
    %c0_540 = arith.constant 0 : index
    %509 = vector.load %arg41[%c96_539, %c0_540] : memref<216x256xf32, #tpu.memory_space<vmem>>, vector<24x4xf32>
    tpu.vector_store %arg41[%c96_539, %c0_540], %508 {strides = array<i32>} : memref<216x256xf32, #tpu.memory_space<vmem>>, vector<24x4xf32>,
    %c0_541 = arith.constant 0 : index
    %c1_542 = arith.constant 1 : index
    %510 = vector.load %arg40[%c0_541, %c1_542] : memref<32x256xf32, #tpu.memory_space<vmem>>, vector<24x3xf32>
    %c5_543 = arith.constant 5 : index
    %c0_544 = arith.constant 0 : index
    %511 = vector.load %arg8[%c5_543, %c0_544] : memref<9x4xf32, #tpu.memory_space<vmem>>, vector<1x3xf32>
    %512 = vector.broadcast %511 : vector<1x3xf32> to vector<24x3xf32>
    %513 = arith.mulf %510, %512 : vector<24x3xf32>
    %c120 = arith.constant 120 : index
    %c0_545 = arith.constant 0 : index
    %514 = vector.load %arg41[%c120, %c0_545] : memref<216x256xf32, #tpu.memory_space<vmem>>, vector<24x3xf32>
    tpu.vector_store %arg41[%c120, %c0_545], %513 {strides = array<i32>} : memref<216x256xf32, #tpu.memory_space<vmem>>, vector<24x3xf32>,
    %c0_546 = arith.constant 0 : index
    %c1_547 = arith.constant 1 : index
    %515 = vector.load %arg40[%c0_546, %c1_547] : memref<32x256xf32, #tpu.memory_space<vmem>>, vector<24x3xf32>
    %c6_548 = arith.constant 6 : index
    %c0_549 = arith.constant 0 : index
    %516 = vector.load %arg8[%c6_548, %c0_549] : memref<9x4xf32, #tpu.memory_space<vmem>>, vector<1x3xf32>
    %517 = vector.broadcast %516 : vector<1x3xf32> to vector<24x3xf32>
    %518 = arith.mulf %515, %517 : vector<24x3xf32>
    %c144 = arith.constant 144 : index
    %c0_550 = arith.constant 0 : index
    %519 = vector.load %arg41[%c144, %c0_550] : memref<216x256xf32, #tpu.memory_space<vmem>>, vector<24x3xf32>
    tpu.vector_store %arg41[%c144, %c0_550], %518 {strides = array<i32>} : memref<216x256xf32, #tpu.memory_space<vmem>>, vector<24x3xf32>,
    %c0_551 = arith.constant 0 : index
    %c2_552 = arith.constant 2 : index
    %520 = vector.load %arg40[%c0_551, %c2_552] : memref<32x256xf32, #tpu.memory_space<vmem>>, vector<24x2xf32>
    %c7_553 = arith.constant 7 : index
    %c0_554 = arith.constant 0 : index
    %521 = vector.load %arg8[%c7_553, %c0_554] : memref<9x4xf32, #tpu.memory_space<vmem>>, vector<1x2xf32>
    %522 = vector.broadcast %521 : vector<1x2xf32> to vector<24x2xf32>
    %523 = arith.mulf %520, %522 : vector<24x2xf32>
    %c168 = arith.constant 168 : index
    %c0_555 = arith.constant 0 : index
    %524 = vector.load %arg41[%c168, %c0_555] : memref<216x256xf32, #tpu.memory_space<vmem>>, vector<24x2xf32>
    tpu.vector_store %arg41[%c168, %c0_555], %523 {strides = array<i32>} : memref<216x256xf32, #tpu.memory_space<vmem>>, vector<24x2xf32>,
    %c0_556 = arith.constant 0 : index
    %c3_557 = arith.constant 3 : index
    %525 = vector.load %arg40[%c0_556, %c3_557] : memref<32x256xf32, #tpu.memory_space<vmem>>, vector<24x1xf32>
    %c8_558 = arith.constant 8 : index
    %c0_559 = arith.constant 0 : index
    %526 = vector.load %arg8[%c8_558, %c0_559] : memref<9x4xf32, #tpu.memory_space<vmem>>, vector<1x1xf32>
    %527 = vector.broadcast %526 : vector<1x1xf32> to vector<24x1xf32>
    %528 = arith.mulf %525, %527 : vector<24x1xf32>
    %c192 = arith.constant 192 : index
    %c0_560 = arith.constant 0 : index
    %529 = vector.load %arg41[%c192, %c0_560] : memref<216x256xf32, #tpu.memory_space<vmem>>, vector<24x1xf32>
    tpu.vector_store %arg41[%c192, %c0_560], %528 {strides = array<i32>} : memref<216x256xf32, #tpu.memory_space<vmem>>, vector<24x1xf32>,
    %c0_561 = arith.constant 0 : index
    %c0_562 = arith.constant 0 : index
    %530 = vector.load %arg30[%c0_561, %c0_562] : memref<24x216xbf16, #tpu.memory_space<vmem>>, vector<24x216xbf16>
    %c0_563 = arith.constant 0 : index
    %c0_564 = arith.constant 0 : index
    %531 = vector.load %arg41[%c0_563, %c0_564] : memref<216x256xf32, #tpu.memory_space<vmem>>, vector<216x4xf32>
    %532 = arith.truncf %531 : vector<216x4xf32> to vector<216x4xbf16>
    %cst_565 = arith.constant dense<0.000000e+00> : vector<24x4xf32>
    %533 = tpu.matmul %530, %532, %cst_565 {dimension_numbers = #tpu.dot_dimension_numbers<[1], [0], [0], [1], [0, 0, 1, 1], [], []>} : vector<24x216xbf16>, vector<216x4xbf16>, vector<24x4xf32> -> vector<24x4xf32>
    %c0_566 = arith.constant 0 : index
    %c0_567 = arith.constant 0 : index
    %534 = vector.load %arg31[%c0_566, %c0_567] : memref<24x1xf32, #tpu.memory_space<vmem>>, vector<24x1xf32>
    %535 = vector.broadcast %534 : vector<24x1xf32> to vector<24x4xf32>
    %536 = arith.addf %533, %535 : vector<24x4xf32>
    %cst_568 = arith.constant 0.000000e+00 : f32
    %537 = vector.broadcast %cst_568 : f32 to vector<24x4xf32>
    %538 = arith.cmpf ogt, %536, %537 : vector<24x4xf32>
    %cst_569 = arith.constant 0.000000e+00 : f32
    %539 = vector.broadcast %cst_569 : f32 to vector<24x4xf32>
    %540 = arith.minimumf %536, %539 : vector<24x4xf32>
    %541 = math.exp %540 : vector<24x4xf32>
    %cst_570 = arith.constant 1.000000e+00 : f32
    %542 = vector.broadcast %cst_570 : f32 to vector<24x4xf32>
    %543 = arith.subf %541, %542 : vector<24x4xf32>
    %544 = arith.select %538, %536, %543 : vector<24x4xi1>, vector<24x4xf32>
    %c0_571 = arith.constant 0 : index
    %c0_572 = arith.constant 0 : index
    %545 = vector.load %arg39[%c0_571, %c0_572] : memref<32x256xf32, #tpu.memory_space<vmem>>, vector<24x4xf32>
    tpu.vector_store %arg39[%c0_571, %c0_572], %544 {strides = array<i32>} : memref<32x256xf32, #tpu.memory_space<vmem>>, vector<24x4xf32>,
    %cst_573 = arith.constant 0.000000e+00 : f32
    %546 = vector.broadcast %cst_573 : f32 to vector<216x4xf32>
    %c0_574 = arith.constant 0 : index
    %c0_575 = arith.constant 0 : index
    %547 = vector.load %arg41[%c0_574, %c0_575] : memref<216x256xf32, #tpu.memory_space<vmem>>, vector<216x4xf32>
    tpu.vector_store %arg41[%c0_574, %c0_575], %546 {strides = array<i32>} : memref<216x256xf32, #tpu.memory_space<vmem>>, vector<216x4xf32>,
    %c0_576 = arith.constant 0 : index
    %c0_577 = arith.constant 0 : index
    %548 = vector.load %arg39[%c0_576, %c0_577] : memref<32x256xf32, #tpu.memory_space<vmem>>, vector<24x1xf32>
    %c0_578 = arith.constant 0 : index
    %c3_579 = arith.constant 3 : index
    %549 = vector.load %arg8[%c0_578, %c3_579] : memref<9x4xf32, #tpu.memory_space<vmem>>, vector<1x1xf32>
    %550 = vector.broadcast %549 : vector<1x1xf32> to vector<24x1xf32>
    %551 = arith.mulf %548, %550 : vector<24x1xf32>
    %c0_580 = arith.constant 0 : index
    %c3_581 = arith.constant 3 : index
    %552 = vector.load %arg41[%c0_580, %c3_581] : memref<216x256xf32, #tpu.memory_space<vmem>>, vector<24x1xf32>
    tpu.vector_store %arg41[%c0_580, %c3_581], %551 {strides = array<i32>} : memref<216x256xf32, #tpu.memory_space<vmem>>, vector<24x1xf32>,
    %c0_582 = arith.constant 0 : index
    %c0_583 = arith.constant 0 : index
    %553 = vector.load %arg39[%c0_582, %c0_583] : memref<32x256xf32, #tpu.memory_space<vmem>>, vector<24x2xf32>
    %c1_584 = arith.constant 1 : index
    %c2_585 = arith.constant 2 : index
    %554 = vector.load %arg8[%c1_584, %c2_585] : memref<9x4xf32, #tpu.memory_space<vmem>>, vector<1x2xf32>
    %555 = vector.broadcast %554 : vector<1x2xf32> to vector<24x2xf32>
    %556 = arith.mulf %553, %555 : vector<24x2xf32>
    %c24_586 = arith.constant 24 : index
    %c2_587 = arith.constant 2 : index
    %557 = vector.load %arg41[%c24_586, %c2_587] : memref<216x256xf32, #tpu.memory_space<vmem>>, vector<24x2xf32>
    tpu.vector_store %arg41[%c24_586, %c2_587], %556 {strides = array<i32>} : memref<216x256xf32, #tpu.memory_space<vmem>>, vector<24x2xf32>,
    %c0_588 = arith.constant 0 : index
    %c0_589 = arith.constant 0 : index
    %558 = vector.load %arg39[%c0_588, %c0_589] : memref<32x256xf32, #tpu.memory_space<vmem>>, vector<24x3xf32>
    %c2_590 = arith.constant 2 : index
    %c1_591 = arith.constant 1 : index
    %559 = vector.load %arg8[%c2_590, %c1_591] : memref<9x4xf32, #tpu.memory_space<vmem>>, vector<1x3xf32>
    %560 = vector.broadcast %559 : vector<1x3xf32> to vector<24x3xf32>
    %561 = arith.mulf %558, %560 : vector<24x3xf32>
    %c48_592 = arith.constant 48 : index
    %c1_593 = arith.constant 1 : index
    %562 = vector.load %arg41[%c48_592, %c1_593] : memref<216x256xf32, #tpu.memory_space<vmem>>, vector<24x3xf32>
    tpu.vector_store %arg41[%c48_592, %c1_593], %561 {strides = array<i32>} : memref<216x256xf32, #tpu.memory_space<vmem>>, vector<24x3xf32>,
    %c0_594 = arith.constant 0 : index
    %c0_595 = arith.constant 0 : index
    %563 = vector.load %arg39[%c0_594, %c0_595] : memref<32x256xf32, #tpu.memory_space<vmem>>, vector<24x3xf32>
    %c3_596 = arith.constant 3 : index
    %c1_597 = arith.constant 1 : index
    %564 = vector.load %arg8[%c3_596, %c1_597] : memref<9x4xf32, #tpu.memory_space<vmem>>, vector<1x3xf32>
    %565 = vector.broadcast %564 : vector<1x3xf32> to vector<24x3xf32>
    %566 = arith.mulf %563, %565 : vector<24x3xf32>
    %c72_598 = arith.constant 72 : index
    %c1_599 = arith.constant 1 : index
    %567 = vector.load %arg41[%c72_598, %c1_599] : memref<216x256xf32, #tpu.memory_space<vmem>>, vector<24x3xf32>
    tpu.vector_store %arg41[%c72_598, %c1_599], %566 {strides = array<i32>} : memref<216x256xf32, #tpu.memory_space<vmem>>, vector<24x3xf32>,
    %c0_600 = arith.constant 0 : index
    %c0_601 = arith.constant 0 : index
    %568 = vector.load %arg39[%c0_600, %c0_601] : memref<32x256xf32, #tpu.memory_space<vmem>>, vector<24x4xf32>
    %c4_602 = arith.constant 4 : index
    %c0_603 = arith.constant 0 : index
    %569 = vector.load %arg8[%c4_602, %c0_603] : memref<9x4xf32, #tpu.memory_space<vmem>>, vector<1x4xf32>
    %570 = vector.broadcast %569 : vector<1x4xf32> to vector<24x4xf32>
    %571 = arith.mulf %568, %570 : vector<24x4xf32>
    %c96_604 = arith.constant 96 : index
    %c0_605 = arith.constant 0 : index
    %572 = vector.load %arg41[%c96_604, %c0_605] : memref<216x256xf32, #tpu.memory_space<vmem>>, vector<24x4xf32>
    tpu.vector_store %arg41[%c96_604, %c0_605], %571 {strides = array<i32>} : memref<216x256xf32, #tpu.memory_space<vmem>>, vector<24x4xf32>,
    %c0_606 = arith.constant 0 : index
    %c1_607 = arith.constant 1 : index
    %573 = vector.load %arg39[%c0_606, %c1_607] : memref<32x256xf32, #tpu.memory_space<vmem>>, vector<24x3xf32>
    %c5_608 = arith.constant 5 : index
    %c0_609 = arith.constant 0 : index
    %574 = vector.load %arg8[%c5_608, %c0_609] : memref<9x4xf32, #tpu.memory_space<vmem>>, vector<1x3xf32>
    %575 = vector.broadcast %574 : vector<1x3xf32> to vector<24x3xf32>
    %576 = arith.mulf %573, %575 : vector<24x3xf32>
    %c120_610 = arith.constant 120 : index
    %c0_611 = arith.constant 0 : index
    %577 = vector.load %arg41[%c120_610, %c0_611] : memref<216x256xf32, #tpu.memory_space<vmem>>, vector<24x3xf32>
    tpu.vector_store %arg41[%c120_610, %c0_611], %576 {strides = array<i32>} : memref<216x256xf32, #tpu.memory_space<vmem>>, vector<24x3xf32>,
    %c0_612 = arith.constant 0 : index
    %c1_613 = arith.constant 1 : index
    %578 = vector.load %arg39[%c0_612, %c1_613] : memref<32x256xf32, #tpu.memory_space<vmem>>, vector<24x3xf32>
    %c6_614 = arith.constant 6 : index
    %c0_615 = arith.constant 0 : index
    %579 = vector.load %arg8[%c6_614, %c0_615] : memref<9x4xf32, #tpu.memory_space<vmem>>, vector<1x3xf32>
    %580 = vector.broadcast %579 : vector<1x3xf32> to vector<24x3xf32>
    %581 = arith.mulf %578, %580 : vector<24x3xf32>
    %c144_616 = arith.constant 144 : index
    %c0_617 = arith.constant 0 : index
    %582 = vector.load %arg41[%c144_616, %c0_617] : memref<216x256xf32, #tpu.memory_space<vmem>>, vector<24x3xf32>
    tpu.vector_store %arg41[%c144_616, %c0_617], %581 {strides = array<i32>} : memref<216x256xf32, #tpu.memory_space<vmem>>, vector<24x3xf32>,
    %c0_618 = arith.constant 0 : index
    %c2_619 = arith.constant 2 : index
    %583 = vector.load %arg39[%c0_618, %c2_619] : memref<32x256xf32, #tpu.memory_space<vmem>>, vector<24x2xf32>
    %c7_620 = arith.constant 7 : index
    %c0_621 = arith.constant 0 : index
    %584 = vector.load %arg8[%c7_620, %c0_621] : memref<9x4xf32, #tpu.memory_space<vmem>>, vector<1x2xf32>
    %585 = vector.broadcast %584 : vector<1x2xf32> to vector<24x2xf32>
    %586 = arith.mulf %583, %585 : vector<24x2xf32>
    %c168_622 = arith.constant 168 : index
    %c0_623 = arith.constant 0 : index
    %587 = vector.load %arg41[%c168_622, %c0_623] : memref<216x256xf32, #tpu.memory_space<vmem>>, vector<24x2xf32>
    tpu.vector_store %arg41[%c168_622, %c0_623], %586 {strides = array<i32>} : memref<216x256xf32, #tpu.memory_space<vmem>>, vector<24x2xf32>,
    %c0_624 = arith.constant 0 : index
    %c3_625 = arith.constant 3 : index
    %588 = vector.load %arg39[%c0_624, %c3_625] : memref<32x256xf32, #tpu.memory_space<vmem>>, vector<24x1xf32>
    %c8_626 = arith.constant 8 : index
    %c0_627 = arith.constant 0 : index
    %589 = vector.load %arg8[%c8_626, %c0_627] : memref<9x4xf32, #tpu.memory_space<vmem>>, vector<1x1xf32>
    %590 = vector.broadcast %589 : vector<1x1xf32> to vector<24x1xf32>
    %591 = arith.mulf %588, %590 : vector<24x1xf32>
    %c192_628 = arith.constant 192 : index
    %c0_629 = arith.constant 0 : index
    %592 = vector.load %arg41[%c192_628, %c0_629] : memref<216x256xf32, #tpu.memory_space<vmem>>, vector<24x1xf32>
    tpu.vector_store %arg41[%c192_628, %c0_629], %591 {strides = array<i32>} : memref<216x256xf32, #tpu.memory_space<vmem>>, vector<24x1xf32>,
    %c0_630 = arith.constant 0 : index
    %c0_631 = arith.constant 0 : index
    %593 = vector.load %arg32[%c0_630, %c0_631] : memref<24x216xbf16, #tpu.memory_space<vmem>>, vector<24x216xbf16>
    %c0_632 = arith.constant 0 : index
    %c0_633 = arith.constant 0 : index
    %594 = vector.load %arg41[%c0_632, %c0_633] : memref<216x256xf32, #tpu.memory_space<vmem>>, vector<216x4xf32>
    %595 = arith.truncf %594 : vector<216x4xf32> to vector<216x4xbf16>
    %cst_634 = arith.constant dense<0.000000e+00> : vector<24x4xf32>
    %596 = tpu.matmul %593, %595, %cst_634 {dimension_numbers = #tpu.dot_dimension_numbers<[1], [0], [0], [1], [0, 0, 1, 1], [], []>} : vector<24x216xbf16>, vector<216x4xbf16>, vector<24x4xf32> -> vector<24x4xf32>
    %c0_635 = arith.constant 0 : index
    %c0_636 = arith.constant 0 : index
    %597 = vector.load %arg33[%c0_635, %c0_636] : memref<24x1xf32, #tpu.memory_space<vmem>>, vector<24x1xf32>
    %598 = vector.broadcast %597 : vector<24x1xf32> to vector<24x4xf32>
    %599 = arith.addf %596, %598 : vector<24x4xf32>
    %cst_637 = arith.constant 0.000000e+00 : f32
    %600 = vector.broadcast %cst_637 : f32 to vector<24x4xf32>
    %601 = arith.cmpf ogt, %599, %600 : vector<24x4xf32>
    %cst_638 = arith.constant 0.000000e+00 : f32
    %602 = vector.broadcast %cst_638 : f32 to vector<24x4xf32>
    %603 = arith.minimumf %599, %602 : vector<24x4xf32>
    %604 = math.exp %603 : vector<24x4xf32>
    %cst_639 = arith.constant 1.000000e+00 : f32
    %605 = vector.broadcast %cst_639 : f32 to vector<24x4xf32>
    %606 = arith.subf %604, %605 : vector<24x4xf32>
    %607 = arith.select %601, %599, %606 : vector<24x4xi1>, vector<24x4xf32>
    %c0_640 = arith.constant 0 : index
    %c0_641 = arith.constant 0 : index
    %608 = vector.load %arg40[%c0_640, %c0_641] : memref<32x256xf32, #tpu.memory_space<vmem>>, vector<24x4xf32>
    tpu.vector_store %arg40[%c0_640, %c0_641], %607 {strides = array<i32>} : memref<32x256xf32, #tpu.memory_space<vmem>>, vector<24x4xf32>,
    %c0_642 = arith.constant 0 : index
    %c0_643 = arith.constant 0 : index
    %609 = vector.load %arg34[%c0_642, %c0_643] : memref<32x24xbf16, #tpu.memory_space<vmem>>, vector<32x24xbf16>
    %c0_644 = arith.constant 0 : index
    %c0_645 = arith.constant 0 : index
    %610 = vector.load %arg40[%c0_644, %c0_645] : memref<32x256xf32, #tpu.memory_space<vmem>>, vector<24x4xf32>
    %611 = arith.truncf %610 : vector<24x4xf32> to vector<24x4xbf16>
    %cst_646 = arith.constant dense<0.000000e+00> : vector<32x4xf32>
    %612 = tpu.matmul %609, %611, %cst_646 {dimension_numbers = #tpu.dot_dimension_numbers<[1], [0], [0], [1], [0, 0, 1, 1], [], []>} : vector<32x24xbf16>, vector<24x4xbf16>, vector<32x4xf32> -> vector<32x4xf32>
    %c0_647 = arith.constant 0 : index
    %c0_648 = arith.constant 0 : index
    %613 = vector.load %arg35[%c0_647, %c0_648] : memref<32x1xf32, #tpu.memory_space<vmem>>, vector<32x1xf32>
    %614 = vector.broadcast %613 : vector<32x1xf32> to vector<32x4xf32>
    %615 = arith.addf %612, %614 : vector<32x4xf32>
    %c0_649 = arith.constant 0 : index
    %c0_650 = arith.constant 0 : index
    %616 = vector.load %arg39[%c0_649, %c0_650] : memref<32x256xf32, #tpu.memory_space<vmem>>, vector<32x4xf32>
    tpu.vector_store %arg39[%c0_649, %c0_650], %615 {strides = array<i32>} : memref<32x256xf32, #tpu.memory_space<vmem>>, vector<32x4xf32>,
    %c0_651 = arith.constant 0 : index
    %c0_652 = arith.constant 0 : index
    %617 = vector.load %arg39[%c0_651, %c0_652] : memref<32x256xf32, #tpu.memory_space<vmem>>, vector<32x4xf32>
    %618 = arith.truncf %617 : vector<32x4xf32> to vector<32x4xbf16>
    %c0_653 = arith.constant 0 : index
    %c0_654 = arith.constant 0 : index
    %619 = vector.load %arg9[%c0_653, %c0_654] : memref<4x1xbf16, #tpu.memory_space<vmem>>, vector<4x1xbf16>
    %cst_655 = arith.constant dense<0.000000e+00> : vector<32x1xf32>
    %620 = tpu.matmul %618, %619, %cst_655 {dimension_numbers = #tpu.dot_dimension_numbers<[1], [0], [0], [1], [0, 0, 1, 1], [], []>} : vector<32x4xbf16>, vector<4x1xbf16>, vector<32x1xf32> -> vector<32x1xf32>
    %c0_656 = arith.constant 0 : index
    %c0_657 = arith.constant 0 : index
    %621 = vector.load %arg40[%c0_656, %c0_657] : memref<32x256xf32, #tpu.memory_space<vmem>>, vector<32x1xf32>
    tpu.vector_store %arg40[%c0_656, %c0_657], %620 {strides = array<i32>} : memref<32x256xf32, #tpu.memory_space<vmem>>, vector<32x1xf32>,
    %cst_658 = arith.constant 0.000000e+00 : f32
    %622 = vector.broadcast %cst_658 : f32 to vector<32x1xf32>
    %c0_659 = arith.constant 0 : index
    %c0_660 = arith.constant 0 : index
    %623 = vector.load %arg41[%c0_659, %c0_660] : memref<216x256xf32, #tpu.memory_space<vmem>>, vector<32x1xf32>
    tpu.vector_store %arg41[%c0_659, %c0_660], %622 {strides = array<i32>} : memref<216x256xf32, #tpu.memory_space<vmem>>, vector<32x1xf32>,
    %c0_661 = arith.constant 0 : index
    %c0_662 = arith.constant 0 : index
    %624 = vector.load %arg40[%c0_661, %c0_662] : memref<32x256xf32, #tpu.memory_space<vmem>>, vector<32x1xf32>
    %c0_663 = arith.constant 0 : index
    %c0_664 = arith.constant 0 : index
    %625 = vector.load %arg41[%c0_663, %c0_664] : memref<216x256xf32, #tpu.memory_space<vmem>>, vector<32x1xf32>
    tpu.vector_store %arg41[%c0_663, %c0_664], %624 {strides = array<i32>} : memref<216x256xf32, #tpu.memory_space<vmem>>, vector<32x1xf32>,
    %c0_665 = arith.constant 0 : index
    %c0_666 = arith.constant 0 : index
    %626 = vector.load %arg36[%c0_665, %c0_666] : memref<16x32xbf16, #tpu.memory_space<vmem>>, vector<16x32xbf16>
    %c0_667 = arith.constant 0 : index
    %c0_668 = arith.constant 0 : index
    %627 = vector.load %arg41[%c0_667, %c0_668] : memref<216x256xf32, #tpu.memory_space<vmem>>, vector<32x1xf32>
    %628 = arith.truncf %627 : vector<32x1xf32> to vector<32x1xbf16>
    %cst_669 = arith.constant dense<0.000000e+00> : vector<16x1xf32>
    %629 = tpu.matmul %626, %628, %cst_669 {dimension_numbers = #tpu.dot_dimension_numbers<[1], [0], [0], [1], [0, 0, 1, 1], [], []>} : vector<16x32xbf16>, vector<32x1xbf16>, vector<16x1xf32> -> vector<16x1xf32>
    %c0_670 = arith.constant 0 : index
    %c0_671 = arith.constant 0 : index
    %630 = vector.load %arg37[%c0_670, %c0_671] : memref<16x1xf32, #tpu.memory_space<vmem>>, vector<16x1xf32>
    %631 = arith.addf %629, %630 : vector<16x1xf32>
    %c0_672 = arith.constant 0 : index
    %c0_673 = arith.constant 0 : index
    %c0_674 = arith.constant 0 : index
    %632 = vector.load %arg38[%c0_672, %c0_673, %c0_674] : memref<1x16x1xf32, #tpu.memory_space<vmem>>, vector<1x16x1xf32>
    %633 = vector.shape_cast %632 : vector<1x16x1xf32> to vector<16x1xf32>
    %634 = vector.shape_cast %631 : vector<16x1xf32> to vector<1x16x1xf32>
    tpu.vector_store %arg38[%c0_672, %c0_673, %c0_674], %634 {strides = array<i32>} : memref<1x16x1xf32, #tpu.memory_space<vmem>>, vector<1x16x1xf32>,
    return
  }
  func.func @transform_0(%arg0: i32) -> (i32, i32, i32) {
    %c0_i32 = arith.constant 0 : i32
    %c0_i32_0 = arith.constant 0 : i32
    %c0_i32_1 = arith.constant 0 : i32
    return %arg0, %c0_i32, %c0_i32_0 : i32, i32, i32
  }
  func.func @transform_1(%arg0: i32) -> (i32, i32) {
    %c0_i32 = arith.constant 0 : i32
    %c0_i32_0 = arith.constant 0 : i32
    %c0_i32_1 = arith.constant 0 : i32
    return %c0_i32, %c0_i32_0 : i32, i32
  }
  func.func @transform_2(%arg0: i32) -> (i32, i32) {
    %c0_i32 = arith.constant 0 : i32
    %c0_i32_0 = arith.constant 0 : i32
    %c0_i32_1 = arith.constant 0 : i32
    return %c0_i32, %c0_i32_0 : i32, i32
  }
  func.func @transform_3(%arg0: i32) -> (i32, i32) {
    %c0_i32 = arith.constant 0 : i32
    %c0_i32_0 = arith.constant 0 : i32
    %c0_i32_1 = arith.constant 0 : i32
    return %c0_i32, %c0_i32_0 : i32, i32
  }
  func.func @transform_4(%arg0: i32) -> (i32, i32) {
    %c0_i32 = arith.constant 0 : i32
    %c0_i32_0 = arith.constant 0 : i32
    %c0_i32_1 = arith.constant 0 : i32
    return %c0_i32, %c0_i32_0 : i32, i32
  }
  func.func @transform_5(%arg0: i32) -> (i32, i32) {
    %c0_i32 = arith.constant 0 : i32
    %c0_i32_0 = arith.constant 0 : i32
    %c0_i32_1 = arith.constant 0 : i32
    return %c0_i32, %c0_i32_0 : i32, i32
  }
  func.func @transform_6(%arg0: i32) -> (i32, i32) {
    %c0_i32 = arith.constant 0 : i32
    %c0_i32_0 = arith.constant 0 : i32
    %c0_i32_1 = arith.constant 0 : i32
    return %c0_i32, %c0_i32_0 : i32, i32
  }
  func.func @transform_7(%arg0: i32) -> (i32, i32) {
    %c0_i32 = arith.constant 0 : i32
    %c0_i32_0 = arith.constant 0 : i32
    %c0_i32_1 = arith.constant 0 : i32
    return %c0_i32, %c0_i32_0 : i32, i32
  }
  func.func @transform_8(%arg0: i32) -> (i32, i32) {
    %c0_i32 = arith.constant 0 : i32
    %c0_i32_0 = arith.constant 0 : i32
    %c0_i32_1 = arith.constant 0 : i32
    return %c0_i32, %c0_i32_0 : i32, i32
  }
  func.func @transform_9(%arg0: i32) -> (i32, i32) {
    %c0_i32 = arith.constant 0 : i32
    %c0_i32_0 = arith.constant 0 : i32
    %c0_i32_1 = arith.constant 0 : i32
    return %c0_i32, %c0_i32_0 : i32, i32
  }
  func.func @transform_10(%arg0: i32) -> (i32, i32) {
    %c0_i32 = arith.constant 0 : i32
    %c0_i32_0 = arith.constant 0 : i32
    %c0_i32_1 = arith.constant 0 : i32
    return %c0_i32, %c0_i32_0 : i32, i32
  }
  func.func @transform_11(%arg0: i32) -> (i32, i32) {
    %c0_i32 = arith.constant 0 : i32
    %c0_i32_0 = arith.constant 0 : i32
    %c0_i32_1 = arith.constant 0 : i32
    return %c0_i32, %c0_i32_0 : i32, i32
  }
  func.func @transform_12(%arg0: i32) -> (i32, i32) {
    %c0_i32 = arith.constant 0 : i32
    %c0_i32_0 = arith.constant 0 : i32
    %c0_i32_1 = arith.constant 0 : i32
    return %c0_i32, %c0_i32_0 : i32, i32
  }
  func.func @transform_13(%arg0: i32) -> (i32, i32) {
    %c0_i32 = arith.constant 0 : i32
    %c0_i32_0 = arith.constant 0 : i32
    %c0_i32_1 = arith.constant 0 : i32
    return %c0_i32, %c0_i32_0 : i32, i32
  }
  func.func @transform_14(%arg0: i32) -> (i32, i32) {
    %c0_i32 = arith.constant 0 : i32
    %c0_i32_0 = arith.constant 0 : i32
    %c0_i32_1 = arith.constant 0 : i32
    return %c0_i32, %c0_i32_0 : i32, i32
  }
  func.func @transform_15(%arg0: i32) -> (i32, i32) {
    %c0_i32 = arith.constant 0 : i32
    %c0_i32_0 = arith.constant 0 : i32
    %c0_i32_1 = arith.constant 0 : i32
    return %c0_i32, %c0_i32_0 : i32, i32
  }
  func.func @transform_16(%arg0: i32) -> (i32, i32) {
    %c0_i32 = arith.constant 0 : i32
    %c0_i32_0 = arith.constant 0 : i32
    %c0_i32_1 = arith.constant 0 : i32
    return %c0_i32, %c0_i32_0 : i32, i32
  }
  func.func @transform_17(%arg0: i32) -> (i32, i32) {
    %c0_i32 = arith.constant 0 : i32
    %c0_i32_0 = arith.constant 0 : i32
    %c0_i32_1 = arith.constant 0 : i32
    return %c0_i32, %c0_i32_0 : i32, i32
  }
  func.func @transform_18(%arg0: i32) -> (i32, i32) {
    %c0_i32 = arith.constant 0 : i32
    %c0_i32_0 = arith.constant 0 : i32
    %c0_i32_1 = arith.constant 0 : i32
    return %c0_i32, %c0_i32_0 : i32, i32
  }
  func.func @transform_19(%arg0: i32) -> (i32, i32) {
    %c0_i32 = arith.constant 0 : i32
    %c0_i32_0 = arith.constant 0 : i32
    %c0_i32_1 = arith.constant 0 : i32
    return %c0_i32, %c0_i32_0 : i32, i32
  }
  func.func @transform_20(%arg0: i32) -> (i32, i32) {
    %c0_i32 = arith.constant 0 : i32
    %c0_i32_0 = arith.constant 0 : i32
    %c0_i32_1 = arith.constant 0 : i32
    return %c0_i32, %c0_i32_0 : i32, i32
  }
  func.func @transform_21(%arg0: i32) -> (i32, i32) {
    %c0_i32 = arith.constant 0 : i32
    %c0_i32_0 = arith.constant 0 : i32
    %c0_i32_1 = arith.constant 0 : i32
    return %c0_i32, %c0_i32_0 : i32, i32
  }
  func.func @transform_22(%arg0: i32) -> (i32, i32) {
    %c0_i32 = arith.constant 0 : i32
    %c0_i32_0 = arith.constant 0 : i32
    %c0_i32_1 = arith.constant 0 : i32
    return %c0_i32, %c0_i32_0 : i32, i32
  }
  func.func @transform_23(%arg0: i32) -> (i32, i32) {
    %c0_i32 = arith.constant 0 : i32
    %c0_i32_0 = arith.constant 0 : i32
    %c0_i32_1 = arith.constant 0 : i32
    return %c0_i32, %c0_i32_0 : i32, i32
  }
  func.func @transform_24(%arg0: i32) -> (i32, i32) {
    %c0_i32 = arith.constant 0 : i32
    %c0_i32_0 = arith.constant 0 : i32
    %c0_i32_1 = arith.constant 0 : i32
    return %c0_i32, %c0_i32_0 : i32, i32
  }
  func.func @transform_25(%arg0: i32) -> (i32, i32) {
    %c0_i32 = arith.constant 0 : i32
    %c0_i32_0 = arith.constant 0 : i32
    %c0_i32_1 = arith.constant 0 : i32
    return %c0_i32, %c0_i32_0 : i32, i32
  }
  func.func @transform_26(%arg0: i32) -> (i32, i32) {
    %c0_i32 = arith.constant 0 : i32
    %c0_i32_0 = arith.constant 0 : i32
    %c0_i32_1 = arith.constant 0 : i32
    return %c0_i32, %c0_i32_0 : i32, i32
  }
  func.func @transform_27(%arg0: i32) -> (i32, i32) {
    %c0_i32 = arith.constant 0 : i32
    %c0_i32_0 = arith.constant 0 : i32
    %c0_i32_1 = arith.constant 0 : i32
    return %c0_i32, %c0_i32_0 : i32, i32
  }
  func.func @transform_28(%arg0: i32) -> (i32, i32) {
    %c0_i32 = arith.constant 0 : i32
    %c0_i32_0 = arith.constant 0 : i32
    %c0_i32_1 = arith.constant 0 : i32
    return %c0_i32, %c0_i32_0 : i32, i32
  }
  func.func @transform_29(%arg0: i32) -> (i32, i32) {
    %c0_i32 = arith.constant 0 : i32
    %c0_i32_0 = arith.constant 0 : i32
    %c0_i32_1 = arith.constant 0 : i32
    return %c0_i32, %c0_i32_0 : i32, i32
  }
  func.func @transform_30(%arg0: i32) -> (i32, i32) {
    %c0_i32 = arith.constant 0 : i32
    %c0_i32_0 = arith.constant 0 : i32
    %c0_i32_1 = arith.constant 0 : i32
    return %c0_i32, %c0_i32_0 : i32, i32
  }
  func.func @transform_31(%arg0: i32) -> (i32, i32) {
    %c0_i32 = arith.constant 0 : i32
    %c0_i32_0 = arith.constant 0 : i32
    %c0_i32_1 = arith.constant 0 : i32
    return %c0_i32, %c0_i32_0 : i32, i32
  }
  func.func @transform_32(%arg0: i32) -> (i32, i32) {
    %c0_i32 = arith.constant 0 : i32
    %c0_i32_0 = arith.constant 0 : i32
    %c0_i32_1 = arith.constant 0 : i32
    return %c0_i32, %c0_i32_0 : i32, i32
  }
  func.func @transform_33(%arg0: i32) -> (i32, i32) {
    %c0_i32 = arith.constant 0 : i32
    %c0_i32_0 = arith.constant 0 : i32
    %c0_i32_1 = arith.constant 0 : i32
    return %c0_i32, %c0_i32_0 : i32, i32
  }
  func.func @transform_34(%arg0: i32) -> (i32, i32) {
    %c0_i32 = arith.constant 0 : i32
    %c0_i32_0 = arith.constant 0 : i32
    %c0_i32_1 = arith.constant 0 : i32
    return %c0_i32, %c0_i32_0 : i32, i32
  }
  func.func @transform_35(%arg0: i32) -> (i32, i32) {
    %c0_i32 = arith.constant 0 : i32
    %c0_i32_0 = arith.constant 0 : i32
    %c0_i32_1 = arith.constant 0 : i32
    return %c0_i32, %c0_i32_0 : i32, i32
  }
  func.func @transform_36(%arg0: i32) -> (i32, i32) {
    %c0_i32 = arith.constant 0 : i32
    %c0_i32_0 = arith.constant 0 : i32
    %c0_i32_1 = arith.constant 0 : i32
    return %c0_i32, %c0_i32_0 : i32, i32
  }
  func.func @transform_37(%arg0: i32) -> (i32, i32, i32) {
    %c0_i32 = arith.constant 0 : i32
    %c0_i32_0 = arith.constant 0 : i32
    %c0_i32_1 = arith.constant 0 : i32
    return %arg0, %c0_i32, %c0_i32_0 : i32, i32, i32
  }
}

</mosaic_0001>

<bundles_post_ra>
// kernel: fwd.1
= control target key start
LH: loop header
LB: loop body
LE: loop exit
PB: predicated region body
PF: predicated region fallthrough
CT: control target
= control target key end

     0   :  { %s5678_s6 = smov 1   ;;  %s5679_s10 = smov 2   ;;  %s7188_s0 = inlined_call_operand.smem [shape: u32[38], index: -1, kind: input, shape index: {}] }
   0x1   :  { %s5749_s5 = sld [smem:[%s7188_s0]]   ;;  %s5680_s14 = smov 3  }
   0x2   :  { %s5754_s9 = sld [smem:[%s7188_s0 + %s5678_s6]]   ;;  %s5681_s18 = smov 4  }
   0x3   :  { %s5759_s13 = sld [smem:[%s7188_s0 + %s5679_s10]]   ;;  %s5682_s22 = smov 5  }
   0x4   :  { %s5764_s17 = sld [smem:[%s7188_s0 + %s5680_s14]]   ;;  %s5683_s26 = smov 6  }
   0x5   :  { %s5769_s21 = sld [smem:[%s7188_s0 + %s5681_s18]]   ;;  %s5684_s30 = smov 7  }
   0x6   :  { %s5774_s25 = sld [smem:[%s7188_s0 + %s5682_s22]]   ;;  %s5685_s4 = smov 8  }
   0x7   :  { %7226 = sst [smem:[#allocation5_spill]] %s5749_s5  ;;  %s5686_s10 = smov 9  }
   0x8   :  { %s5779_s29 = sld [smem:[%s7188_s0 + %s5683_s26]]   ;;  %s5687_s15 = smov 10  }
   0x9   :  { %s5784_s3 = sld [smem:[%s7188_s0 + %s5684_s30]]   ;;  %s5688_s20 = smov 11  }
   0xa   :  { %s5789_s8 = sld [smem:[%s7188_s0 + %s5685_s4]]   ;;  %s5689_s26 = smov 12  }
   0xb   :  { %7227 = sst [smem:[#allocation6_spill]] %s5769_s21  ;;  %s5690_s1 = smov 13  }
   0xc   :  { %7228 = sst [smem:[#allocation7_spill]] %s5774_s25  ;;  %s5691_s7 = smov 14  }
   0xd   :  { %s5794_s14 = sld [smem:[%s7188_s0 + %s5686_s10]]   ;;  %s5693_s22 = smov 16  }
   0xe   :  { %7229 = sst [smem:[#allocation8_spill]] %s5779_s29  ;;  %s5694_s28 = smov 17  }
   0xf   :  { %7230 = sst [smem:[#allocation9_spill]] %s5784_s3 }
  0x10   :  { %7231 = sst [smem:[#allocation10_spill]] %s5789_s8 }
  0x11   :  { %s5799_s19 = sld [smem:[%s7188_s0 + %s5687_s15]]   ;;  %s5692_s15 = smov 15  }
  0x12   :  { %s5804_s24 = sld [smem:[%s7188_s0 + %s5688_s20]]  }
  0x13   :  { %s5809_s30 = sld [smem:[%s7188_s0 + %s5689_s26]]  }
  0x14   :  { %s5814_s6 = sld [smem:[%s7188_s0 + %s5690_s1]]  }
  0x15   :  { %s5819_s12 = sld [smem:[%s7188_s0 + %s5691_s7]]   ;;  %s5695_s7 = smov 18  }
  0x16   :  { %s5824_s20 = sld [smem:[%s7188_s0 + %s5692_s15]]   ;;  %s5696_s15 = smov 19  }
  0x17   :  { %s5829_s27 = sld [smem:[%s7188_s0 + %s5693_s22]]   ;;  %s5697_s22 = smov 20  }
  0x18   :  { %s5834_s4 = sld [smem:[%s7188_s0 + %s5694_s28]]   ;;  %s5698_s28 = smov 21  }
  0x19   :  { %s5839_s8 = sld [smem:[%s7188_s0 + %s5695_s7]]   ;;  %s5699_s7 = smov 22  }
  0x1a   :  { %s5844_s3 = sld [smem:[%s7188_s0 + %s5696_s15]]   ;;  %s5700_s15 = smov 23  }
  0x1b   :  { %s5849_s29 = sld [smem:[%s7188_s0 + %s5697_s22]]   ;;  %s5701_s22 = smov 24  }
  0x1c   :  { %s5854_s25 = sld [smem:[%s7188_s0 + %s5698_s28]]   ;;  %s5702_s28 = smov 25  }
  0x1d   :  { %s5859_s21 = sld [smem:[%s7188_s0 + %s5699_s7]]   ;;  %s5703_s7 = smov 26  }
  0x1e   :  { %7232 = sst [smem:[#allocation11_spill]] %s5834_s4 }
  0x20   :  { %7233 = sst [smem:[#allocation12_spill]] %s5844_s3 }
  0x21   :  { %7234 = sst [smem:[#allocation13_spill]] %s5849_s29 }
  0x22   :  { %7235 = sst [smem:[#allocation14_spill]] %s5854_s25 }
  0x23   :  { %7236 = sst [smem:[#allocation15_spill]] %s5859_s21 }
  0x24   :  { %s5864_s3 = sld [smem:[%s7188_s0 + %s5700_s15]]   ;;  %s5704_s15 = smov 27  }
  0x25   :  { %s5869_s29 = sld [smem:[%s7188_s0 + %s5701_s22]]   ;;  %s5705_s22 = smov 28  }
  0x26   :  { %s5874_s25 = sld [smem:[%s7188_s0 + %s5702_s28]]   ;;  %s5706_s28 = smov 29  }
  0x27   :  { %s5879_s21 = sld [smem:[%s7188_s0 + %s5703_s7]]   ;;  %s5707_s7 = smov 30  }
  0x2a   :  { %7237 = sst [smem:[#allocation16_spill]] %s5864_s3 }
  0x2b   :  { %7238 = sst [smem:[#allocation17_spill]] %s5869_s29 }
  0x2c   :  { %7239 = sst [smem:[#allocation18_spill]] %s5874_s25 }
  0x2d   :  { %7240 = sst [smem:[#allocation19_spill]] %s5879_s21 }
  0x2e   :  { %s5884_s3 = sld [smem:[%s7188_s0 + %s5704_s15]]   ;;  %s5708_s15 = smov 31  }
  0x2f   :  { %s5889_s29 = sld [smem:[%s7188_s0 + %s5705_s22]]   ;;  %s5709_s22 = smov 32  }
  0x30   :  { %s5894_s25 = sld [smem:[%s7188_s0 + %s5706_s28]]   ;;  %s5710_s28 = smov 33  }
  0x31   :  { %s5899_s21 = sld [smem:[%s7188_s0 + %s5707_s7]]   ;;  %s5711_s7 = smov 34  }
  0x34   :  { %7241 = sst [smem:[#allocation20_spill]] %s5884_s3 }
  0x35   :  { %7242 = sst [smem:[#allocation21_spill]] %s5889_s29 }
  0x36   :  { %7243 = sst [smem:[#allocation22_spill]] %s5894_s25 }
  0x37   :  { %7244 = sst [smem:[#allocation23_spill]] %s5899_s21 }
  0x38   :  { %s5904_s3 = sld [smem:[%s7188_s0 + %s5708_s15]]   ;;  %s5712_s15 = smov 35  }
  0x39   :  { %s5909_s29 = sld [smem:[%s7188_s0 + %s5709_s22]]   ;;  %s5713_s22 = smov 36  }
  0x3a   :  { %s5914_s25 = sld [smem:[%s7188_s0 + %s5710_s28]]   ;;  %s5714_s28 = smov 37  }
  0x3b   :  { %s5919_s21 = sld [smem:[%s7188_s0 + %s5711_s7]]   ;;  %s5936_s7 = smov 0  }
  0x3e   :  { %7245 = sst [smem:[#allocation24_spill]] %s5904_s3 }
  0x3f   :  { %7246 = sst [smem:[#allocation25_spill]] %s5909_s29 }
  0x40   :  { %7247 = sst [smem:[#allocation26_spill]] %s5914_s25 }
  0x41   :  { %s5924_s3 = sld [smem:[%s7188_s0 + %s5712_s15]]  }
  0x42   :  { %s5929_s29 = sld [smem:[%s7188_s0 + %s5713_s22]]  }
  0x43   :  { %s5934_s25 = sld [smem:[%s7188_s0 + %s5714_s28]]  }
  0x44 LB: > { %s5204_s10 = sadd.s32 4294967295, %s5676_s7   ;;  %p5208_p0 = scmp.ge.s32.totalorder %s5676_s7, 1  ;;  %s5676_s7 = sphi %s5936_s7, %s85_s7  }
  0x45   : > { %p1025_p1 = scmp.lt.s32.totalorder %s5676_s7, 3 }
  0x47   : > { %p1026_p2 = pnand %p5208_p0, %p1025_p1 }
  0x48   : > { %s7248_s5 = sld [smem:[#allocation5_spill]] (!%p1026_p2)  ;;  %p1117_p3 = scmp.lt.s32.totalorder (!%p1026_p2), %s5204_s10, 1 }
  0x49   : > { %1029 = sbr.rel (%p1026_p2) target bundleno = 5595 (0x15db), region = 168  ;;  %s5715_s0 = smov (!%p1026_p2), 15  }
  0x4a   : > { %s7218_s11 = smov (!%p1026_p2), 1   ;;  %s5717_s18 = smov (!%p1026_p2), 16  }
  0x4b   : > { %s5718_s22 = smov (!%p1026_p2), 17   ;;  %s5719_s23 = smov (!%p1026_p2), 112  }
  0x4c   : > { %s5720_s26 = smov (!%p1026_p2), 113   ;;  %s7214_s28 = smov (!%p1026_p2), 127  }
  0x4d   : > { %s5722_s1 = smov (!%p1026_p2), 111   ;;  %s5726_s2 = smov (!%p1026_p2), 7  }
  0x4e   : > { %v1146_v0 = vlaneseq  ;;  %v5218_v2 = vld [vmem:[%s5754_s9 + $0x6] ss:$8 sm:$0x3]  ;;  %v5217_v3 = vld [vmem:[%s5754_s9 + $0x5] ss:$8 sm:$0x3] }
  0x4f   : > { %v5219_v8 = vld [vmem:[%s5754_s9 + $0x7] ss:$8 sm:$0x3]  ;;  %s7298_s10 = smov (!%p1117_p3, %s5204_s10), 1  ;;  %vm1208_vm0 = vcmask 130048   ;;  %v5723_v42 = vmov 0.0  }
  0x50   : > { %v1147_v1 = vshrl.u32 %v1146_v0, 7  ;;  %s5376_s15 = sshll.u32 %s7298_s10, 3  ;;  %v5220_v11 = vld [vmem:[%s5754_s9 + $0x10] ss:$8 sm:$0x3]  ;;  %1134 = vst [vmem:[#allocation4] sm:$0xff] %v5723_v42 }
  0x51   : > { %s1121_s16 = scalar_lea.vmem %s7248_s5, %s5376_s15  ;;  %v5213_v16 = vld [vmem:[%s5754_s9 + $0x1] ss:$8 sm:$0x3]  ;;  %v5214_v21 = vld [vmem:[%s5754_s9 + $0x2] ss:$8 sm:$0x3] }
  0x52   : > { %v5946_v4 = vsub.s32 0, %v1147_v1  ;;  %v5948_v5 = vsub.s32 1, %v1147_v1  ;;  %v1128_v14 = vld [vmem:[%s1121_s16] sm:$0x77]  ;;  %1135 = vst [vmem:[#allocation4 + $0x8] sm:$0xff] %v5723_v42  ;;  %1136 = vst [vmem:[#allocation4 + $0x10] sm:$0xff] %v5723_v42 }
  0x53   : > { %1132 = vst [vmem:[#allocation2] sm:$0x7] %v1128_v14  ;;  %v1130_v15 = vcombine.high %v1128_v14, %v1128_v14  ;;  %v5215_v24 = vld [vmem:[%s5754_s9 + $0x3] ss:$8 sm:$0x3]  ;;  %1137 = vst [vmem:[#allocation4 + $0x18] sm:$0xff] %v5723_v42 }
  0x54   : > { %v1366_v6 = vrot.slane %v5218_v2, %v5946_v4  ;;  %v1327_v7 = vrot.slane %v5217_v3, %v5946_v4  ;;  %v1370_v9 = vrot.slane %v5218_v2, %v5948_v5  ;;  %v1331_v10 = vrot.slane %v5217_v3, %v5948_v5  ;;  %v1144_v25 = vld [vmem:[%s5754_s9] ss:$8 sm:$0x3]  ;;  %1138 = vst [vmem:[#allocation4 + $0x20] sm:$0xff] %v5723_v42  ;;  %s5728_s15 = smov 8   ;;  %s5729_s16 = smov 121  }
  0x55   : > { %v1406_v12 = vrot.slane %v5219_v8, %v5948_v5  ;;  %v1402_v13 = vrot.slane %v5219_v8, %v5946_v4  ;;  %1133 = vst [vmem:[#allocation2 + $0x8] sm:$0x7] %v1130_v15  ;;  %v1442_v17 = vrot.slane %v5220_v11, %v5948_v5  ;;  %v1438_v18 = vrot.slane %v5220_v11, %v5946_v4  ;;  %v5216_v52 = vld [vmem:[%s5754_s9 + $0x4] ss:$8 sm:$0x3]  ;;  %s7249_s4 = sld [smem:[#allocation11_spill]] }
  0x56   : > { %1371 = vrot.lane.b32.xlu1 %v1366_v6, %s5715_s0  ;;  %1332 = vrot.lane.b32.xlu0 %v1327_v7, %s7218_s11  ;;  %v1189_v19 = vrot.slane %v5213_v16, %v5948_v5  ;;  %v1185_v20 = vrot.slane %v5213_v16, %v5946_v4  ;;  %v1227_v22 = vrot.slane %v5214_v21, %v5948_v5  ;;  %vm1158_vm1 = vcmask 908288   ;;  %s7264_s5 = sld [smem:[#allocation18_spill]] }
  0x57   : > { %v1223_v23 = vrot.slane %v5214_v21, %v5946_v4  ;;  %v1268_v26 = vrot.slane %v5215_v24, %v5948_v5  ;;  %v1264_v27 = vrot.slane %v5215_v24, %v5946_v4  ;;  %v1153_v28 = vrot.slane %v1144_v25, %v5948_v5  ;;  %1139 = vst [vmem:[#allocation4 + $0x28] sm:$0xff] %v5723_v42 }
  0x58   : > { %v1149_v29 = vrot.slane %v1144_v25, %v5946_v4  ;;  %1140 = vst [vmem:[#allocation4 + $0x30] sm:$0x7] %v5723_v42  ;;  %1141 = vst [vmem:[#allocation4 + $0x38] sm:$0x7] %v5723_v42  ;;  %vm1170_vm2 = vcmask 138240   ;;  %v1302_v55 = vrot.slane %v5216_v52, %v5946_v4  ;;  %v1306_v56 = vrot.slane %v5216_v52, %v5948_v5 }
  0x59   : > { %1563 = vst [vmem:[#allocation4 + $0x58] sm:$0xff] %v5723_v42  ;;  %1565 = vst [vmem:[#allocation4 + $0x68] sm:$0xff] %v5723_v42  ;;  %vm7204_vm3 = vcmask 7168   ;;  %vm1246_vm4 = vcmask 121856   ;;  %vm1194_vm5 = vcmask 916480   ;;  %vm1232_vm6 = vcmask 924672  }
  0x5a   : > { %1373 = vrot.lane.b32.xlu1 %v1370_v9, %s5715_s0  ;;  %1334 = vrot.lane.b32.xlu0 %v1331_v10, %s7218_s11  ;;  %v1430_v36 = vld [vmem:[#allocation2] sm:$0x7]  ;;  %1567 = vst [vmem:[#allocation4 + $0x78] sm:$0xff] %v5723_v42  ;;  %1569 = vst [vmem:[#allocation4 + $0x88] sm:$0xff] %v5723_v42  ;;  %vm1273_vm7 = vcmask 1039360   ;;  %vm1174_vm8 = vcmask 1042568  }
  0x5b   : > { %3184 = vst.msk [vmem:[#allocation4 + $0x90] sm:$0xff] %vm1208_vm0, %v5723_v42  ;;  %3185 = vst.msk [vmem:[#allocation4 + $0xa0] sm:$0xff] %vm1208_vm0, %v5723_v42  ;;  %v1319_v47 = vld [vmem:[#allocation2] sm:$0x7]  ;;  %vm1462_vm9 = vcmask 903168   ;;  %vm1353_vm10 = vcmask 1039367  }
  0x5c   : > { %3186 = vst.msk [vmem:[#allocation4 + $0xb0] sm:$0xff] %vm1208_vm0, %v5723_v42  ;;  %3187 = vst.msk [vmem:[#allocation4 + $0xc0] sm:$0xff] %vm1208_vm0, %v5723_v42  ;;  %v1143_v48 = vld [vmem:[#allocation2 + $0x8] sm:$0x7]  ;;  %v1142_v49 = vld [vmem:[#allocation2] sm:$0x7] }
  0x5d   : > { %3188 = vst.msk [vmem:[#allocation4 + $0xd0] sm:$0xff] %vm1208_vm0, %v5723_v42  ;;  %3189 = vst.msk [vmem:[#allocation4 + $0xe0] sm:$0xff] %vm1208_vm0, %v5723_v42  ;;  %v1294_v50 = vld [vmem:[#allocation2] sm:$0x7]  ;;  %v1295_v51 = vld [vmem:[#allocation2 + $0x8] sm:$0x7] }
  0x5e   : > { %1409 = vrot.lane.b32.xlu1 %v1406_v12, %s5717_s18  ;;  %1407 = vrot.lane.b32.xlu0 %v1402_v13, %s5717_s18  ;;  %3190 = vst.msk [vmem:[#allocation4 + $0xf0] sm:$0xff] %vm1208_vm0, %v5723_v42  ;;  %3191 = vst.msk [vmem:[#allocation4 + $0x100] sm:$0xff] %vm1208_vm0, %v5723_v42  ;;  %v1178_v61 = vld [vmem:[#allocation2 + $0x8] sm:$0x7]  ;;  %v1309_v0 = vmul.f32 %v1302_v55, %v1294_v50  ;;  %v1310_v1 = vmul.f32 %v1306_v56, %v1295_v51  ;;  %v1358_v2 = vld [vmem:[#allocation2] sm:$0x7] }
  0x5f   : > { %3192 = vst.msk [vmem:[#allocation4 + $0x110] sm:$0xff] %vm1208_vm0, %v5723_v42  ;;  %v1431_v63 = vld [vmem:[#allocation2 + $0x8] sm:$0x7]  ;;  %v1394_v13 = vld [vmem:[#allocation2] sm:$0x7]  ;;  %vm1356_vm11 = vcmask 1033216  }
  0x60   : > { %v1313_v3 = vrot.slane %v1309_v0, 4  ;;  %v1314_v6 = vrot.slane %v1310_v1, 4  ;;  %v1320_v10 = vld [vmem:[#allocation2 + $0x8] sm:$0x7]  ;;  %vm1392_vm12 = vcmask 921602   ;;  %vm1212_vm13 = vcmask 1045635  }
  0x61   : > { %v1359_v16 = vld [vmem:[#allocation2 + $0x8] sm:$0x7]  ;;  %v5229_v51 = vld [vmem:[%s5754_s9 + $0x6] ss:$8 sm:$0x3]  ;;  %vm1428_vm14 = vcmask 916485  }
  0x62   : > { %1445 = vrot.lane.b32.xlu1 %v1442_v17, %s5718_s22  ;;  %1443 = vrot.lane.b32.xlu0 %v1438_v18, %s5718_s22  ;;  %1317 = vst [vmem:[#allocation4 + $0x10] sm:$0x70] %v1313_v3  ;;  %1318 = vst [vmem:[#allocation4 + $0x18] sm:$0x70] %v1314_v6  ;;  %v1759_v52 = vrot.slane %v5229_v51, %v5946_v4  ;;  %vm1250_vm15 = vcmask 1047678  }
  0x63   : > { %v5228_v56 = vld [vmem:[%s5754_s9 + $0x5] ss:$8 sm:$0x3]  ;;  %v1572_v1 = vld [vmem:[%s5754_s9] ss:$8 sm:$0x3] }
  0x64   : > { %v1577_v3 = vrot.slane %v1572_v1, %v5946_v4  ;;  %v5224_v6 = vld [vmem:[%s5754_s9 + $0x1] ss:$8 sm:$0x3] }
  0x66   : > { %1192 = vrot.lane.b32.xlu1 %v1189_v19, %s5719_s23  ;;  %1190 = vrot.lane.b32.xlu0 %v1185_v20, %s5719_s23  ;;  %v1177_v20 = vld [vmem:[#allocation2] sm:$0x7] }
  0x6a   : > { %1230 = vrot.lane.b32.xlu1 %v1227_v22, %s5720_s26  ;;  %1228 = vrot.lane.b32.xlu0 %v1223_v23, %s5720_s26 }
  0x6e   : > { %1271 = vrot.lane.b32.xlu1 %v1268_v26, %s7214_s28  ;;  %1269 = vrot.lane.b32.xlu0 %v1264_v27, %s7214_s28  ;;  %v1395_v27 = vld [vmem:[#allocation2 + $0x8] sm:$0x7] }
  0x72   : > { %1156 = vrot.lane.b32.xlu1 %v1153_v28, %s5722_s1  ;;  %1154 = vrot.lane.b32.xlu0 %v1149_v29, %s5722_s1  ;;  %v1215_v28 = vld [vmem:[#allocation2] sm:$0x7] }
  0xc8   : > { %v5992_v30 = vpop.permute.xlu1 %1371  ;;  %v5994_v31 = vpop.permute.xlu0 %1332 }
  0xc9   : > { %v1339_v57 = vmul.f32 %v5994_v31, %v1319_v47  ;;  %v1378_v9 = vmul.f32 %v5992_v30, %v1358_v2 }
  0xcb   : > { %v1343_v12 = vrot.slane %v1339_v57, 1  ;;  %v1382_v19 = vrot.slane %v1378_v9, 6  ;;  %v1763_v57 = vrot.slane %v5229_v51, %v5948_v5  ;;  %v1581_v9 = vrot.slane %v1572_v1, %v5948_v5 }
  0xcc   : > { %v5996_v32 = vpop.permute.xlu1 %1373  ;;  %v5998_v33 = vpop.permute.xlu0 %1334 }
  0xcd   : > { %v1336_v11 = vsel %vm7204_vm3, %v5994_v31, %v5998_v33  ;;  %v1375_v17 = vsel %vm1246_vm4, %v5992_v30, %v5996_v32  ;;  %v1216_v33 = vld [vmem:[#allocation2 + $0x8] sm:$0x7] }
  0xce   : > { %v1340_v14 = vmul.f32 %v1336_v11, %v1320_v10  ;;  %v1379_v22 = vmul.f32 %v1375_v17, %v1359_v16  ;;  %v1614_v10 = vrot.slane %v5224_v6, %v5948_v5 }
  0xd0   : > { %v6000_v34 = vpop.permute.xlu1 %1409  ;;  %v6002_v35 = vpop.permute.xlu0 %1407  ;;  %v1344_v23 = vrot.slane %v1340_v14, 1  ;;  %v1383_v30 = vrot.slane %v1379_v22, 6 }
  0xd1   : > { %v1414_v18 = vmul.f32 %v6002_v35, %v1394_v13  ;;  %v1411_v24 = vsel %vm1208_vm0, %v6002_v35, %v6000_v34 }
  0xd2   : > { %v1415_v31 = vmul.f32 %v1411_v24, %v1395_v27 }
  0xd3   : > { %v1418_v26 = vrot.slane %v1414_v18, 3 }
  0xd4   : > { %v1446_v37 = vpop.permute.xlu1 %1445  ;;  %v1444_v38 = vpop.permute.xlu0 %1443 }
  0xd5   : > { %v1450_v39 = vmul.f32 %v1444_v38, %v1430_v36  ;;  %v1447_v60 = vsel %vm1170_vm2, %v1444_v38, %v1446_v37  ;;  %v1256_v37 = vld [vmem:[#allocation2] sm:$0x7]  ;;  %v1419_v38 = vrot.slane %v1415_v31, 3 }
  0xd6   : > { %v1451_v8 = vmul.f32 %v1447_v60, %v1431_v63  ;;  %v1731_v63 = vrot.slane %v5228_v56, %v5948_v5 }
  0xd7   : > { %1454 = vrot.lane.b32.xlu0 %v1450_v39, %s5722_s1 }
  0xd8   : > { %v6005_v40 = vpop.permute.xlu1 %1192  ;;  %v6007_v41 = vpop.permute.xlu0 %1190 }
  0xd9   : > { %v1199_v7 = vmul.f32 %v6005_v40, %v1178_v61  ;;  %v1195_v21 = vsel %vm1194_vm5, %v6007_v41, %v6005_v40  ;;  %v1257_v40 = vld [vmem:[#allocation2 + $0x8] sm:$0x7] }
  0xda   : > { %v1198_v25 = vmul.f32 %v1195_v21, %v1177_v20 }
  0xdb   : > { %v1203_v15 = vrot.slane %v1199_v7, 5 }
  0xdc   : > { %v6039_v43 = vpop.permute.xlu1 %1230  ;;  %v1229_v44 = vpop.permute.xlu0 %1228  ;;  %v1202_v32 = vrot.slane %v1198_v25, 5 }
  0xdd   : > { %v1233_v29 = vsel %vm1232_vm6, %v1229_v44, %v6039_v43  ;;  %v1237_v35 = vmul.f32 %v6039_v43, %v1216_v33 }
  0xde   : > { %v1236_v36 = vmul.f32 %v1233_v29, %v1215_v28 }
  0xe0   : > { %v6041_v45 = vpop.permute.xlu1 %1271  ;;  %v6043_v46 = vpop.permute.xlu0 %1269  ;;  %v1240_v39 = vrot.slane %v1236_v36, 2  ;;  %v5725_v36 = vmov 65535  }
  0xe1   : > { %v1274_v34 = vsel %vm1273_vm7, %v6043_v46, %v6041_v45  ;;  %v1278_v44 = vmul.f32 %v6041_v45, %v1257_v40  ;;  %v1241_v46 = vrot.slane %v1237_v35, 2  ;;  %v1477_v45 = vld [vmem:[%s5799_s19] sm:$0xff] }
  0xe2   : > { %v1277_v41 = vmul.f32 %v1274_v34, %v1256_v37 }
  0xe3   : > { %v1282_v43 = vrot.slane %v1278_v44, 7 }
  0xe4   : > { %v1157_v53 = vpop.permute.xlu1 %1156  ;;  %v1155_v54 = vpop.permute.xlu0 %1154  ;;  %v1281_v47 = vrot.slane %v1277_v41, 7 }
  0xe5   : > { %v1163_v58 = vmul.f32 %v1157_v53, %v1143_v48  ;;  %v1159_v59 = vsel %vm1158_vm1, %v1155_v54, %v1157_v53  ;;  %v5724_v48 = vmov 0   ;;  %v5230_v53 = vld [vmem:[%s5754_s9 + $0x7] ss:$8 sm:$0x3] }
  0xe6   : > { %v1162_v62 = vmul.f32 %v1159_v59, %v1142_v49  ;;  %1529 = vmatprep.mubr.bf16.mxu0 %v5724_v48  ;;  %5588 = vset.pattern.permute.xlu0 %v5724_v48  ;;  %v5231_v49 = vld [vmem:[%s5754_s9 + $0x10] ss:$8 sm:$0x3]  ;;  %v1791_v55 = vrot.slane %v5230_v53, %v5946_v4  ;;  %v5225_v59 = vld [vmem:[%s5754_s9 + $0x2] ss:$8 sm:$0x3]  ;;  %v1795_v60 = vrot.slane %v5230_v53, %v5948_v5 }
  0xe7   : > { %1168 = vrot.lane.b32.xlu1 %v1163_v58, %s5718_s22  ;;  %1926 = vmatprep.mubr.bf16.mxu1 %v5724_v48  ;;  %v1823_v50 = vrot.slane %v5231_v49, %v5946_v4  ;;  %v1827_v54 = vrot.slane %v5231_v49, %v5948_v5  ;;  %v1727_v58 = vrot.slane %v5228_v56, %v5946_v4 }
  0xe8   : > { %1166 = vrot.lane.b32.xlu0 %v1162_v62, %s5718_s22  ;;  %5589 = vset.pattern.permute.xlu1 %v5724_v48  ;;  %v1643_v61 = vrot.slane %v5225_v59, %v5946_v4  ;;  %v5226_v62 = vld [vmem:[%s5754_s9 + $0x3] ss:$8 sm:$0x3]  ;;  %v1647_v2 = vrot.slane %v5225_v59, %v5948_v5 }
  0xe9   : > { %v1676_v0 = vrot.slane %v5226_v62, %v5946_v4  ;;  %v1680_v7 = vrot.slane %v5226_v62, %v5948_v5 }
  0xeb   : > { %1456 = vrot.lane.b32.xlu1 %v1451_v8, %s5722_s1  ;;  %v1610_v8 = vrot.slane %v5224_v6, %v5946_v4 }
  0xec   : > { %1345 = vrot.lane.b32.xlu0 %v1343_v12, %s7214_s28 }
  0xef   : > { %1206 = vrot.lane.b32.xlu1 %v1203_v15, %s5717_s18 }
  0xf0   : > { %1384 = vrot.lane.b32.xlu0 %v1382_v19, %s5720_s26 }
  0xf3   : > { %1347 = vrot.lane.b32.xlu1 %v1344_v23, %s7214_s28 }
  0xf4   : > { %1420 = vrot.lane.b32.xlu0 %v1418_v26, %s5719_s23 }
  0xf7   : > { %1386 = vrot.lane.b32.xlu1 %v1383_v30, %s5720_s26 }
  0xf8   : > { %1204 = vrot.lane.b32.xlu0 %v1202_v32, %s5717_s18 }
  0xfb   : > { %1422 = vrot.lane.b32.xlu1 %v1419_v38, %s5719_s23 }
  0xfc   : > { %1242 = vrot.lane.b32.xlu0 %v1240_v39, %s5715_s0 }
  0xff   : > { %1244 = vrot.lane.b32.xlu1 %v1241_v46, %s5715_s0 }
 0x100   : > { %1283 = vrot.lane.b32.xlu0 %v1281_v47, %s7218_s11 }
 0x103   : > { %1285 = vrot.lane.b32.xlu1 %v1282_v43, %s7218_s11 }
 0x104   : > { %1480 = vperm.xlu0 %5588, %v1477_v45  }
 0x107   : > { %1828 = vrot.lane.b32.xlu1 %v1823_v50, %s5718_s22 }
 0x108   : > { %1764 = vrot.lane.b32.xlu0 %v1759_v52, %s5715_s0 }
 0x10b   : > { %1830 = vrot.lane.b32.xlu1 %v1827_v54, %s5718_s22  ;;  %v1464_v54 = vld [vmem:[%s5794_s14] sm:$0xf] }
 0x10c   : > { %1796 = vrot.lane.b32.xlu0 %v1791_v55, %s5717_s18 }
 0x10f   : > { %1766 = vrot.lane.b32.xlu1 %v1763_v57, %s5715_s0 }
 0x110   : > { %1732 = vrot.lane.b32.xlu0 %v1727_v58, %s7218_s11 }
 0x113   : > { %1798 = vrot.lane.b32.xlu1 %v1795_v60, %s5717_s18 }
 0x114   : > { %1648 = vrot.lane.b32.xlu0 %v1643_v61, %s5720_s26 }
 0x117   : > { %1734 = vrot.lane.b32.xlu1 %v1731_v63, %s7218_s11 }
 0x118   : > { %1681 = vrot.lane.b32.xlu0 %v1676_v0, %s7214_s28 }
 0x11b   : > { %1650 = vrot.lane.b32.xlu1 %v1647_v2, %s5720_s26 }
 0x11c   : > { %1582 = vrot.lane.b32.xlu0 %v1577_v3, %s5722_s1 }
 0x11f   : > { %1683 = vrot.lane.b32.xlu1 %v1680_v7, %s7214_s28 }
 0x120   : > { %1615 = vrot.lane.b32.xlu0 %v1610_v8, %s5719_s23 }
 0x123   : > { %1584 = vrot.lane.b32.xlu1 %v1581_v9, %s5722_s1 }
 0x127   : > { %1617 = vrot.lane.b32.xlu1 %v1614_v10, %s5719_s23 }
 0x149   : > { %v1455_v11 = vpop.permute.xlu0 %1454 }
 0x159   : > { %v1169_v12 = vpop.permute.xlu1 %1168 }
 0x15a   : > { %v1167_v13 = vpop.permute.xlu0 %1166 }
 0x15b   : > { %v1171_v14 = vsel %vm1170_vm2, %v1167_v13, %v1169_v12  ;;  %1175 = vst.msk [vmem:[#allocation4] sm:$0x7] %vm1174_vm8, %v1167_v13  ;;  %vm1253_vm8 = vcmask 1040504  }
 0x15c   : > { %1176 = vst [vmem:[#allocation4 + $0x8] sm:$0x7] %v1171_v14 }
 0x15d   : > { %v1457_v15 = vpop.permute.xlu1 %1456 }
 0x15e   : > { %v1458_v16 = vsel %vm1158_vm1, %v1455_v11, %v1457_v15  ;;  %1463 = vst.msk [vmem:[#allocation4 + $0x38] sm:$0x7] %vm1462_vm9, %v1457_v15  ;;  %v1346_v17 = vpop.permute.xlu0 %1345  ;;  %vm1487_vm9 = vcmask 1044480  }
 0x15f   : > { %1461 = vst [vmem:[#allocation4 + $0x30] sm:$0x7] %v1458_v16  ;;  %v1489_v37 = vsel %vm1487_vm9, 4294967295, %v5725_v36  ;;  %vm1699_vm9 = vcmask 1047560  }
 0x161   : > { %v1207_v18 = vpop.permute.xlu1 %1206 }
 0x162   : > { %v1385_v19 = vpop.permute.xlu0 %1384 }
 0x165   : > { %v1348_v20 = vpop.permute.xlu1 %1347  ;;  %v1472_v38 = vld [vmem:[#allocation4 + $0x38] sm:$0x7] }
 0x166   : > { %v1349_v21 = vsel %vm1273_vm7, %v1346_v17, %v1348_v20  ;;  %1354 = vst.msk [vmem:[#allocation4 + $0x18] sm:$0x80] %vm1353_vm10, %v1348_v20  ;;  %v1421_v22 = vpop.permute.xlu0 %1420  ;;  %v1471_v23 = vld [vmem:[#allocation4 + $0x30] sm:$0x7]  ;;  %vm1291_vm10 = vcmask 1043465  }
 0x167   : > { %1357 = vst.msk [vmem:[#allocation4 + $0x28] sm:$0x3] %vm1356_vm11, %v1348_v20  ;;  %1352 = vst [vmem:[#allocation4 + $0x20] ss:$-12 sps:$4 sm:$0x83] %v1349_v21   ;;  %vm1488_vm11 = vcmask 1045504  }
 0x168   : > { %1558 = vst [vmem:[#allocation4 + $0x30] sm:$0xff] %v5723_v42  ;;  %v1490_v39 = vsel %vm1488_vm11, %v1489_v37, 0  ;;  %vm1633_vm11 = vcmask 1047680  }
 0x169   : > { %v1387_v24 = vpop.permute.xlu1 %1386 }
 0x16a   : > { %v1388_v25 = vsel %vm1232_vm6, %v1385_v19, %v1387_v24  ;;  %1393 = vst.msk [vmem:[#allocation4 + $0x28] sm:$0x1c] %vm1392_vm12, %v1387_v24  ;;  %v1205_v26 = vpop.permute.xlu0 %1204  ;;  %vm1483_vm12 = vcmask 220160  }
 0x16b   : > { %1391 = vst [vmem:[#allocation4 + $0x20] sm:$0x1c] %v1388_v25  ;;  %v1209_v27 = vsel %vm1208_vm0, %v1205_v26, %v1207_v18  ;;  %1213 = vst.msk [vmem:[#allocation4] sm:$0x38] %vm1212_vm13, %v1205_v26 }
 0x16c   : > { %1214 = vst [vmem:[#allocation4 + $0x8] sm:$0x38] %v1209_v27 }
 0x16d   : > { %v1423_v28 = vpop.permute.xlu1 %1422 }
 0x16e   : > { %v1424_v29 = vsel %vm1194_vm5, %v1421_v22, %v1423_v28  ;;  %1429 = vst.msk [vmem:[#allocation4 + $0x28] sm:$0xe0] %vm1428_vm14, %v1423_v28  ;;  %v1243_v30 = vpop.permute.xlu0 %1242 }
 0x16f   : > { %1427 = vst [vmem:[#allocation4 + $0x20] sm:$0xe0] %v1424_v29  ;;  %1251 = vst.msk [vmem:[#allocation4] sm:$0xc0] %vm1250_vm15, %v1243_v30  ;;  %vm1887_vm15 = vcmask 1043456  }
 0x170   : > { %1254 = vst.msk [vmem:[#allocation4 + $0x10] sm:$0x1] %vm1253_vm8, %v1243_v30  ;;  %vm1666_vm8 = vcmask 1047672  }
 0x171   : > { %v1245_v31 = vpop.permute.xlu1 %1244 }
 0x172   : > { %v1247_v32 = vsel %vm1246_vm4, %v1243_v30, %v1245_v31  ;;  %v1284_v33 = vpop.permute.xlu0 %1283 }
 0x173   : > { %1252 = vst [vmem:[#allocation4 + $0x18] ss:$-12 sps:$4 sm:$0xc1] %v1247_v32   ;;  %1292 = vst.msk [vmem:[#allocation4 + $0x10] sm:$0xe] %vm1291_vm10, %v1284_v33  ;;  %vm1600_vm10 = vcmask 1047688  }
 0x175   : > { %v1286_v34 = vpop.permute.xlu1 %1285  ;;  %v1470_v35 = vld [vmem:[#allocation4 + $0x28] sm:$0xff] }
 0x176   : > { %v1288_v40 = vsel %vm7204_vm3, %v1284_v33, %v1286_v34  ;;  %v1476_v41 = vpack.c.bf16 %v1472_v38, %v1470_v35  ;;  %v1469_v44 = vld [vmem:[#allocation4 + $0x20] sm:$0xff] }
 0x177   : > { %v1465_v46 = vld [vmem:[#allocation4] sm:$0xff]  ;;  %1293 = vst [vmem:[#allocation4 + $0x18] sm:$0xe] %v1288_v40  ;;  %v1475_v47 = vpack.c.bf16 %v1471_v23, %v1469_v44  ;;  %1556 = vst [vmem:[#allocation4 + $0x20] sm:$0xff] %v5723_v42 }
 0x178   : > { %1552 = vst [vmem:[#allocation4] sm:$0xff] %v5723_v42  ;;  %v1495_v43 = vand.u32 %v1490_v39, %v1476_v41 }
 0x179   : > { %v1492_v45 = vand.u32 %v1490_v39, %v1475_v47  ;;  %v1829_v55 = vpop.permute.xlu1 %1828 }
 0x17a   : > { %1509 = vmatprep.subr.bf16.mxu0 %v1495_v43  ;;  %v1467_v49 = vld [vmem:[#allocation4 + $0x10] sm:$0xff]  ;;  %v1466_v50 = vld [vmem:[#allocation4 + $0x8] sm:$0xff] }
 0x17b   : > { %1510 = vmatpush1.bf16.msra.mxu0 %v1492_v45  ;;  %1554 = vst [vmem:[#allocation4 + $0x10] sm:$0xff] %v5723_v42  ;;  %v1473_v53 = vpack.c.bf16 %v1467_v49, %v1465_v46 }
 0x17d   : > { %v1831_v62 = vpop.permute.xlu1 %1830 }
 0x17e   : > { %v1468_v51 = vld [vmem:[#allocation4 + $0x18] sm:$0xff]  ;;  %v1832_v19 = vsel %vm1170_vm2, %v1829_v55, %v1831_v62 }
 0x17f   : > { %v1474_v52 = vpack.c.bf16 %v1468_v51, %v1466_v50  ;;  %v1481_v56 = vpop.permute.xlu0 %1480 }
 0x181   : > { %1511 = vmatprep.subr.bf16.mxu0 %v1474_v52  ;;  %v1767_v7 = vpop.permute.xlu1 %1766  ;;  %v5243_v52 = vld [vmem:[%s5754_s9 + $0x10] ss:$8 sm:$0x3] }
 0x182   : > { %1512 = vmatpush1.bf16.msra.mxu0 %v1473_v53  ;;  %v1877_v53 = vld [vmem:[%s5809_s30] sm:$0xff] }
 0x183   : > { %v1765_v6 = vpop.permute.xlu0 %1764 }
 0x184   : > { %v1768_v21 = vsel %vm1246_vm4, %v1765_v6, %v1767_v7 }
 0x185   : > { %5221 = vmatmul.mubr.msk.bf16.vlgmr.msra.gmra.mxu0 %vm1483_vm12, %v1464_v54  ;;  %v1799_v9 = vpop.permute.xlu1 %1798  ;;  %v2216_v54 = vrot.slane %v5243_v52, %v5946_v4  ;;  %vm1883_vm12 = vcmask 588800  }
 0x186   : > { %2317 = vmatprep.mubr.bf16.mxu0 %v5724_v48 }
 0x187   : > { %v1797_v8 = vpop.permute.xlu0 %1796 }
 0x188   : > { %v1800_v26 = vsel %vm1208_vm0, %v1797_v8, %v1799_v9 }
 0x189   : > { %v1735_v14 = vpop.permute.xlu1 %1734 }
 0x18b   : > { %v1733_v13 = vpop.permute.xlu0 %1732 }
 0x18c   : > { %v1736_v31 = vsel %vm7204_vm3, %v1733_v13, %v1735_v14 }
 0x18d   : > { %v1651_v24 = vpop.permute.xlu1 %1650 }
 0x18f   : > { %v1649_v23 = vpop.permute.xlu0 %1648 }
 0x190   : > { %v1652_v33 = vsel %vm1232_vm6, %v1649_v23, %v1651_v24 }
 0x191   : > { %v1684_v30 = vpop.permute.xlu1 %1683 }
 0x193   : > { %v1682_v29 = vpop.permute.xlu0 %1681 }
 0x194   : > { %v1685_v38 = vsel %vm1273_vm7, %v1682_v29, %v1684_v30 }
 0x195   : > { %v1585_v34 = vpop.permute.xlu1 %1584 }
 0x197   : > { %v1583_v37 = vpop.permute.xlu0 %1582 }
 0x198   : > { %v1586_v41 = vsel %vm1158_vm1, %v1583_v37, %v1585_v34 }
 0x199   : > { %v1618_v47 = vpop.permute.xlu1 %1617 }
 0x19b   : > { %v1616_v46 = vpop.permute.xlu0 %1615 }
 0x19c   : > { %v1619_v45 = vsel %vm1194_vm5, %v1616_v46, %v1618_v47 }
 0x245   : > { %v1531_v57 = vpop.f32.mrf.mxu0 }
 0x246   : > { %v1532_v58 = vadd.f32 %v1531_v57, %v1481_v56 }
 0x247   : > { %v1533_v59 = vpop.f32.mrf.mxu0 }
 0x248   : > { %v1540_v60 = vmin.f32 %v1532_v58, 0.0  ;;  %v1534_v61 = vadd.f32 %v1533_v59, %v1481_v56  ;;  %vm1538_vm13 = vcmp.gt.f32.partialorder %v1532_v58, 0.0  ;;  %v2220_v56 = vrot.slane %v5243_v52, %v5948_v5 }
 0x249   : > { %v1535_v63 = vpop.f32.mrf.mxu0 }
 0x24a   : > { %v1542_v0 = vmul.f32 1.442695, %v1540_v60  ;;  %v1541_v1 = vmin.f32 %v1534_v61, 0.0  ;;  %vm1539_vm14 = vcmp.gt.f32.partialorder %v1534_v61, 0.0 }
 0x24b   : > { %v1536_v2 = vpop.f32.mrf.mxu0 }
 0x24c   : > { %5634 = vpow2.f32 %v1542_v0  ;;  %v1544_v3 = vmul.f32 1.442695, %v1541_v1  ;;  %v5237_v0 = vld [vmem:[%s5754_s9 + $0x2] ss:$8 sm:$0x3] }
 0x24d   : > { %v2038_v2 = vrot.slane %v5237_v0, %v5946_v4 }
 0x24e   : > { %5636 = vpow2.f32 %v1544_v3  ;;  %v5238_v3 = vld [vmem:[%s5754_s9 + $0x3] ss:$8 sm:$0x3] }
 0x24f   : > { %v2070_v7 = vrot.slane %v5238_v3, %v5946_v4  ;;  %v2074_v9 = vrot.slane %v5238_v3, %v5948_v5 }
 0x259   : > { %v5635_v10 = vpop.eup %5634 }
 0x25a   : > { %v5222_v11 = vadd.f32 -1.0, %v5635_v10 }
 0x25b   : > { %v5637_v12 = vpop.eup %5636 }
 0x25c   : > { %v6147_v15 = vsel %vm1538_vm13, %v1532_v58, %v5222_v11  ;;  %v5223_v16 = vadd.f32 -1.0, %v5637_v12  ;;  %v5242_v58 = vld [vmem:[%s5754_s9 + $0x7] ss:$8 sm:$0x3] }
 0x25d   : > { %v1835_v17 = vmul.f32 %v1829_v55, %v6147_v15  ;;  %v1771_v22 = vmul.f32 %v1765_v6, %v6147_v15  ;;  %v1803_v27 = vmul.f32 %v1797_v8, %v6147_v15  ;;  %v1739_v32 = vmul.f32 %v1733_v13, %v6147_v15  ;;  %v5241_v55 = vld [vmem:[%s5754_s9 + $0x6] ss:$8 sm:$0x3]  ;;  %v1969_v8 = vld [vmem:[%s5754_s9] ss:$8 sm:$0x3] }
 0x25e   : > { %v6150_v18 = vsel %vm1539_vm14, %v1534_v61, %v5223_v16  ;;  %v1655_v35 = vmul.f32 %v1652_v33, %v6147_v15  ;;  %v1688_v40 = vmul.f32 %v1685_v38, %v6147_v15  ;;  %v1589_v43 = vmul.f32 %v1586_v41, %v6147_v15  ;;  %v5240_v61 = vld [vmem:[%s5754_s9 + $0x5] ss:$8 sm:$0x3]  ;;  %v5236_v11 = vld [vmem:[%s5754_s9 + $0x1] ss:$8 sm:$0x3] }
 0x25f   : > { %v1836_v20 = vmul.f32 %v1832_v19, %v6150_v18  ;;  %1839 = vrot.lane.b32.xlu0 %v1835_v17, %s5722_s1  ;;  %v1772_v25 = vmul.f32 %v1768_v21, %v6150_v18  ;;  %v1804_v28 = vmul.f32 %v1800_v26, %v6150_v18  ;;  %v1740_v36 = vmul.f32 %v1736_v31, %v6150_v18  ;;  %v5227_v31 = vld [vmem:[%s5754_s9 + $0x4] ss:$8 sm:$0x3] }
 0x260   : > { %v1656_v39 = vmul.f32 %v1651_v24, %v6150_v18  ;;  %v1689_v44 = vmul.f32 %v1684_v30, %v6150_v18  ;;  %v1590_v49 = vmul.f32 %v1585_v34, %v6150_v18  ;;  %v1622_v50 = vmul.f32 %v1619_v45, %v6147_v15 }
 0x261   : > { %1841 = vrot.lane.b32.xlu1 %v1836_v20, %s5722_s1  ;;  %v1623_v51 = vmul.f32 %v1618_v47, %v6150_v18  ;;  %v2152_v57 = vrot.slane %v5241_v55, %v5946_v4  ;;  %v2156_v59 = vrot.slane %v5241_v55, %v5948_v5  ;;  %v2184_v60 = vrot.slane %v5242_v58, %v5946_v4 }
 0x262   : > { %v2188_v62 = vrot.slane %v5242_v58, %v5948_v5  ;;  %v2120_v63 = vrot.slane %v5240_v61, %v5946_v4  ;;  %v2124_v1 = vrot.slane %v5240_v61, %v5948_v5  ;;  %v2042_v6 = vrot.slane %v5237_v0, %v5948_v5 }
 0x263   : > { %1775 = vrot.lane.b32.xlu0 %v1771_v22, %s5720_s26  ;;  %v1974_v10 = vrot.slane %v1969_v8, %v5946_v4  ;;  %v1978_v12 = vrot.slane %v1969_v8, %v5948_v5  ;;  %v2006_v13 = vrot.slane %v5236_v11, %v5946_v4  ;;  %v2010_v14 = vrot.slane %v5236_v11, %v5948_v5 }
 0x265   : > { %1777 = vrot.lane.b32.xlu1 %v1772_v25, %s5720_s26 }
 0x267   : > { %1807 = vrot.lane.b32.xlu0 %v1803_v27, %s5719_s23 }
 0x269   : > { %1809 = vrot.lane.b32.xlu1 %v1804_v28, %s5719_s23 }
 0x26b   : > { %1743 = vrot.lane.b32.xlu0 %v1739_v32, %s7214_s28 }
 0x26d   : > { %1745 = vrot.lane.b32.xlu1 %v1740_v36, %s7214_s28  ;;  %v1713_v36 = vrot.slane %v5227_v31, %v5948_v5 }
 0x26f   : > { %1659 = vrot.lane.b32.xlu0 %v1655_v35, %s5715_s0  ;;  %v1709_v35 = vrot.slane %v5227_v31, %v5946_v4  ;;  %v1717_v46 = vmul.f32 %v1713_v36, %v6150_v18 }
 0x271   : > { %1661 = vrot.lane.b32.xlu1 %v1656_v39, %s5715_s0  ;;  %v1716_v45 = vmul.f32 %v1709_v35, %v6147_v15 }
 0x273   : > { %1692 = vrot.lane.b32.xlu0 %v1688_v40, %s7218_s11 }
 0x275   : > { %1694 = vrot.lane.b32.xlu1 %v1689_v44, %s7218_s11 }
 0x277   : > { %1593 = vrot.lane.b32.xlu0 %v1589_v43, %s5718_s22 }
 0x279   : > { %1595 = vrot.lane.b32.xlu1 %v1590_v49, %s5718_s22 }
 0x27b   : > { %1626 = vrot.lane.b32.xlu0 %v1622_v50, %s5717_s18 }
 0x27d   : > { %1628 = vrot.lane.b32.xlu1 %v1623_v51, %s5717_s18 }
 0x27f   : > { %1880 = vperm.xlu0 %5588, %v1877_v53  }
 0x281   : > { %2221 = vrot.lane.b32.xlu1 %v2216_v54, %s5718_s22 }
 0x283   : > { %2223 = vrot.lane.b32.xlu0 %v2220_v56, %s5718_s22 }
 0x285   : > { %2157 = vrot.lane.b32.xlu1 %v2152_v57, %s5715_s0 }
 0x287   : > { %2159 = vrot.lane.b32.xlu0 %v2156_v59, %s5715_s0 }
 0x289   : > { %2189 = vrot.lane.b32.xlu1 %v2184_v60, %s5717_s18 }
 0x28b   : > { %2191 = vrot.lane.b32.xlu0 %v2188_v62, %s5717_s18 }
 0x28d   : > { %2125 = vrot.lane.b32.xlu1 %v2120_v63, %s7218_s11 }
 0x28f   : > { %2127 = vrot.lane.b32.xlu0 %v2124_v1, %s7218_s11  ;;  %v1848_v1 = vld [vmem:[%s5804_s24] sm:$0xf] }
 0x291   : > { %2043 = vrot.lane.b32.xlu1 %v2038_v2, %s5720_s26 }
 0x293   : > { %2045 = vrot.lane.b32.xlu0 %v2042_v6, %s5720_s26 }
 0x295   : > { %2075 = vrot.lane.b32.xlu1 %v2070_v7, %s7214_s28 }
 0x297   : > { %2077 = vrot.lane.b32.xlu0 %v2074_v9, %s7214_s28 }
 0x299   : > { %1979 = vrot.lane.b32.xlu1 %v1974_v10, %s5722_s1 }
 0x29b   : > { %1981 = vrot.lane.b32.xlu0 %v1978_v12, %s5722_s1 }
 0x29d   : > { %2011 = vrot.lane.b32.xlu1 %v2006_v13, %s5719_s23 }
 0x29f   : > { %2013 = vrot.lane.b32.xlu0 %v2010_v14, %s5719_s23 }
 0x2d1   : > { %v1840_v16 = vpop.permute.xlu0 %1839 }
 0x2d3   : > { %v1842_v17 = vpop.permute.xlu1 %1841 }
 0x2d4   : > { %1847 = vst.msk [vmem:[#allocation4 + $0x88] sm:$0xff] %vm1158_vm1, %v1842_v17  ;;  %v1843_v20 = vsel %vm1158_vm1, %v1840_v16, %v1842_v17 }
 0x2d5   : > { %v1776_v19 = vpop.permute.xlu0 %1775  ;;  %v1875_v23 = vpack.c.bf16 %v1843_v20, %v1843_v20 }
 0x2d7   : > { %v1778_v21 = vpop.permute.xlu1 %1777  ;;  %v1889_v28 = vsel %vm1887_vm15, %v1875_v23, 0 }
 0x2d8   : > { %1783 = vst.msk [vmem:[#allocation4 + $0x68] sm:$0xff] %vm1232_vm6, %v1778_v21  ;;  %v1779_v38 = vsel %vm1232_vm6, %v1776_v19, %v1778_v21 }
 0x2d9   : > { %v1808_v22 = vpop.permute.xlu0 %1807 }
 0x2db   : > { %v1810_v24 = vpop.permute.xlu1 %1809  ;;  %v1866_v25 = vld [vmem:[#allocation4 + $0x88] sm:$0xff] }
 0x2dc   : > { %1815 = vst.msk [vmem:[#allocation4 + $0x78] sm:$0xff] %vm1194_vm5, %v1810_v24  ;;  %v1876_v26 = vpack.c.bf16 %v1866_v25, %v1866_v25  ;;  %1966 = vst [vmem:[#allocation4 + $0x88] sm:$0xff] %v5723_v42  ;;  %v1811_v33 = vsel %vm1194_vm5, %v1808_v22, %v1810_v24  ;;  %v5239_v25 = vld [vmem:[%s5754_s9 + $0x4] ss:$8 sm:$0x3] }
 0x2dd   : > { %v1744_v27 = vpop.permute.xlu0 %1743  ;;  %v1873_v41 = vpack.c.bf16 %v1811_v33, %v1779_v38  ;;  %v2102_v33 = vrot.slane %v5239_v25, %v5946_v4 }
 0x2de   : > { %5232 = vmatprep.subr.msk.bf16.mxu1 %vm1887_vm15, %v1876_v26 }
 0x2df   : > { %v1746_v29 = vpop.permute.xlu1 %1745  ;;  %1901 = vmatpush1.bf16.msra.mxu1 %v1889_v28  ;;  %v1862_v30 = vld [vmem:[#allocation4 + $0x68] sm:$0xff] }
 0x2e0   : > { %1751 = vst.msk [vmem:[#allocation4 + $0x58] sm:$0xff] %vm1273_vm7, %v1746_v29  ;;  %1962 = vst [vmem:[#allocation4 + $0x68] sm:$0xff] %v5723_v42  ;;  %v1747_v44 = vsel %vm1273_vm7, %v1744_v27, %v1746_v29 }
 0x2e1   : > { %v1660_v32 = vpop.permute.xlu0 %1659  ;;  %v1871_v53 = vpack.c.bf16 %v1747_v44, %v1716_v45 }
 0x2e2   : > { %1667 = vst.msk [vmem:[#allocation4 + $0x20] sm:$0xff] %vm1666_vm8, %v1660_v32 }
 0x2e3   : > { %v1662_v37 = vpop.permute.xlu1 %1661  ;;  %v1864_v34 = vld [vmem:[#allocation4 + $0x78] sm:$0xff] }
 0x2e4   : > { %v1874_v39 = vpack.c.bf16 %v1864_v34, %v1862_v30  ;;  %1964 = vst [vmem:[#allocation4 + $0x78] sm:$0xff] %v5723_v42  ;;  %v1663_v49 = vsel %vm1246_vm4, %v1660_v32, %v1662_v37  ;;  %v2106_v32 = vrot.slane %v5239_v25, %v5948_v5 }
 0x2e5   : > { %v1693_v40 = vpop.permute.xlu0 %1692 }
 0x2e6   : > { %1700 = vst.msk [vmem:[#allocation4 + $0x30] sm:$0xff] %vm1699_vm9, %v1693_v40  ;;  %1902 = vmatprep.subr.bf16.mxu1 %v1874_v39 }
 0x2e7   : > { %1903 = vmatpush1.bf16.msra.mxu1 %v1873_v41  ;;  %v1695_v47 = vpop.permute.xlu1 %1694  ;;  %v1860_v43 = vld [vmem:[#allocation4 + $0x58] sm:$0xff] }
 0x2e8   : > { %v1696_v50 = vsel %vm7204_vm3, %v1693_v40, %v1695_v47  ;;  %v1872_v51 = vpack.c.bf16 %v1860_v43, %v1717_v46  ;;  %1960 = vst [vmem:[#allocation4 + $0x58] sm:$0xff] %v5723_v42 }
 0x2e9   : > { %v1594_v52 = vpop.permute.xlu0 %1593  ;;  %v1870_v54 = vpack.c.bf16 %v1696_v50, %v1663_v49  ;;  %v1853_v55 = vld [vmem:[#allocation4 + $0x20] sm:$0xff] }
 0x2ea   : > { %1601 = vst.msk [vmem:[#allocation4] sm:$0xff] %vm1600_vm10, %v1594_v52  ;;  %1904 = vmatprep.subr.bf16.mxu1 %v1872_v51  ;;  %1953 = vst [vmem:[#allocation4 + $0x20] sm:$0xff] %v5723_v42 }
 0x2eb   : > { %1905 = vmatpush1.bf16.msra.mxu1 %v1871_v53  ;;  %v1596_v18 = vpop.permute.xlu1 %1595 }
 0x2ec   : > { %1906 = vmatprep.subr.bf16.mxu1 %v1870_v54  ;;  %v1597_v59 = vsel %vm1170_vm2, %v1594_v52, %v1596_v18 }
 0x2ed   : > { %v1627_v15 = vpop.permute.xlu0 %1626  ;;  %v1855_v56 = vld [vmem:[#allocation4 + $0x30] sm:$0xff] }
 0x2ee   : > { %1634 = vst.msk [vmem:[#allocation4 + $0x10] sm:$0xff] %vm1633_vm11, %v1627_v15  ;;  %v1869_v57 = vpack.c.bf16 %v1855_v56, %v1853_v55  ;;  %1955 = vst [vmem:[#allocation4 + $0x30] sm:$0xff] %v5723_v42 }
 0x2ef   : > { %v1629_v58 = vpop.permute.xlu1 %1628 }
 0x2f0   : > { %v1630_v60 = vsel %vm1208_vm0, %v1627_v15, %v1629_v58  ;;  %1907 = vmatpush1.bf16.msra.mxu1 %v1869_v57 }
 0x2f1   : > { %v1868_v61 = vpack.c.bf16 %v1630_v60, %v1597_v59  ;;  %v1849_v62 = vld [vmem:[#allocation4] sm:$0xff] }
 0x2f2   : > { %1949 = vst [vmem:[#allocation4] sm:$0xff] %v5723_v42 }
 0x2f3   : > { %1908 = vmatprep.subr.bf16.mxu1 %v1868_v61  ;;  %v2222_v11 = vpop.permute.xlu1 %2221 }
 0x2f5   : > { %v1851_v63 = vld [vmem:[#allocation4 + $0x10] sm:$0xff] }
 0x2f6   : > { %v1867_v0 = vpack.c.bf16 %v1851_v63, %v1849_v62  ;;  %1951 = vst [vmem:[#allocation4 + $0x10] sm:$0xff] %v5723_v42 }
 0x2f7   : > { %v2158_v20 = vpop.permute.xlu1 %2157 }
 0x2f8   : > { %1909 = vmatpush1.bf16.msra.mxu1 %v1867_v0 }
 0x2fa   : > { %v1881_v2 = vpop.permute.xlu0 %1880 }
 0x2fb   : > { %5233 = vmatmul.mubr.msk.bf16.vlgmr.msra.gmra.mxu1 %vm1883_vm12, %v1848_v1  ;;  %v2190_v22 = vpop.permute.xlu1 %2189 }
 0x2fc   : > { %2393 = vmatprep.mubr.bf16.mxu1 %v5724_v48 }
 0x2fe   : > { %v2224_v9 = vpop.permute.xlu0 %2223 }
 0x2ff   : > { %v2126_v28 = vpop.permute.xlu1 %2125  ;;  %v2225_v37 = vsel %vm1170_vm2, %v2222_v11, %v2224_v9 }
 0x302   : > { %v2160_v19 = vpop.permute.xlu0 %2159 }
 0x303   : > { %v2161_v35 = vsel %vm1246_vm4, %v2158_v20, %v2160_v19  ;;  %v2044_v40 = vpop.permute.xlu1 %2043 }
 0x306   : > { %v2192_v21 = vpop.permute.xlu0 %2191 }
 0x307   : > { %v2193_v5 = vsel %vm1208_vm0, %v2190_v22, %v2192_v21  ;;  %v2076_v43 = vpop.permute.xlu1 %2075 }
 0x30a   : > { %v2128_v27 = vpop.permute.xlu0 %2127 }
 0x30b   : > { %v2129_v49 = vsel %vm7204_vm3, %v2126_v28, %v2128_v27  ;;  %v1980_v55 = vpop.permute.xlu1 %1979 }
 0x30e   : > { %v2046_v39 = vpop.permute.xlu0 %2045 }
 0x30f   : > { %v2047_v51 = vsel %vm1232_vm6, %v2044_v40, %v2046_v39  ;;  %v2012_v59 = vpop.permute.xlu1 %2011 }
 0x312   : > { %v2078_v47 = vpop.permute.xlu0 %2077 }
 0x313   : > { %v2079_v18 = vsel %vm1273_vm7, %v2076_v43, %v2078_v47 }
 0x316   : > { %v1982_v54 = vpop.permute.xlu0 %1981 }
 0x317   : > { %v1983_v57 = vsel %vm1158_vm1, %v1980_v55, %v1982_v54  ;;  %v5594_v55 = vld [vmem:[%s5759_s13 + $0x30] sm:$0xff]  }
 0x31a   : > { %v2014_v58 = vpop.permute.xlu0 %2013 }
 0x31b   : > { %v2015_v62 = vsel %vm1194_vm5, %v2012_v59, %v2014_v58 }
 0x3bb   : > { %v1928_v3 = vpop.f32.mrf.mxu1 }
 0x3bc   : > { %v1929_v6 = vadd.f32 %v1928_v3, %v1881_v2  ;;  %v2345_v3 = vld [vmem:[%s5829_s27] sm:$0xff] }
 0x3bd   : > { %v1930_v7 = vpop.f32.mrf.mxu1 }
 0x3be   : > { %v1937_v8 = vmin.f32 %v1929_v6, 0.0  ;;  %v1931_v10 = vadd.f32 %v1930_v7, %v1881_v2  ;;  %vm1935_vm13 = vcmp.gt.f32.partialorder %v1929_v6, 0.0  ;;  %v2270_v2 = vld [vmem:[%s5819_s12] sm:$0xff] }
 0x3bf   : > { %v1932_v12 = vpop.f32.mrf.mxu1 }
 0x3c0   : > { %v1939_v13 = vmul.f32 1.442695, %v1937_v8  ;;  %v1938_v14 = vmin.f32 %v1931_v10, 0.0  ;;  %vm1936_vm14 = vcmp.gt.f32.partialorder %v1931_v10, 0.0 }
 0x3c1   : > { %v1933_v16 = vpop.f32.mrf.mxu1 }
 0x3c2   : > { %5638 = vpow2.f32 %v1939_v13  ;;  %v1941_v17 = vmul.f32 1.442695, %v1938_v14 }
 0x3c4   : > { %5640 = vpow2.f32 %v1941_v17 }
 0x3cf   : > { %v5639_v23 = vpop.eup %5638 }
 0x3d0   : > { %v5234_v24 = vadd.f32 -1.0, %v5639_v23 }
 0x3d1   : > { %v5641_v26 = vpop.eup %5640 }
 0x3d2   : > { %v1945_v29 = vsel %vm1935_vm13, %v1929_v6, %v5234_v24  ;;  %v5235_v30 = vadd.f32 -1.0, %v5641_v26  ;;  %vm2576_vm13 = vcmask 523264  }
 0x3d3   : > { %v2228_v31 = vmul.f32 %v2222_v11, %v1945_v29  ;;  %v2164_v38 = vmul.f32 %v2158_v20, %v1945_v29  ;;  %v6274_v44 = vmul.f32 %v2102_v33, %v1945_v29  ;;  %v2196_v46 = vmul.f32 %v2190_v22, %v1945_v29 }
 0x3d4   : > { %v1946_v36 = vsel %vm1936_vm14, %v1931_v10, %v5235_v30  ;;  %v2132_v50 = vmul.f32 %v2126_v28, %v1945_v29  ;;  %v2050_v53 = vmul.f32 %v2047_v51, %v1945_v29  ;;  %v2082_v56 = vmul.f32 %v2079_v18, %v1945_v29  ;;  %v2241_v51 = vld [vmem:[%s5814_s6] sm:$0xf]  ;;  %v5595_v18 = vld [vmem:[%s5759_s13 + $0x68] sm:$0xff]  }
 0x3d5   : > { %2232 = vrot.lane.b32.xlu1 %v2228_v31, %s5722_s1  ;;  %v2229_v34 = vmul.f32 %v2225_v37, %v1946_v36  ;;  %v6272_v41 = vmul.f32 %v2106_v32, %v1946_v36  ;;  %2111 = vst [vmem:[#allocation4 + $0x40] sm:$0xff] %v6274_v44  ;;  %v2165_v4 = vmul.f32 %v2161_v35, %v1946_v36  ;;  %vm2636_vm14 = vcmask 523320  }
 0x3d6   : > { %v2197_v45 = vmul.f32 %v2193_v5, %v1946_v36  ;;  %v2133_v52 = vmul.f32 %v2129_v49, %v1946_v36  ;;  %2582 = vst.msk [vmem:[#allocation4 + $0x40] sm:$0xff] %vm2576_vm13, %v5723_v42  ;;  %v2051_v15 = vmul.f32 %v2046_v39, %v1946_v36  ;;  %v2083_v60 = vmul.f32 %v2078_v47, %v1946_v36 }
 0x3d7   : > { %2234 = vrot.lane.b32.xlu0 %v2229_v34, %s5722_s1  ;;  %v1986_v61 = vmul.f32 %v1983_v57, %v1945_v29  ;;  %v1987_v63 = vmul.f32 %v1982_v54, %v1946_v36  ;;  %v2018_v0 = vmul.f32 %v2015_v62, %v1945_v29  ;;  %v2019_v1 = vmul.f32 %v2014_v58, %v1946_v36  ;;  %v5593_v54 = vld [vmem:[%s5759_s13 + $0x70] sm:$0xff]   ;;  %v5598_v57 = vld [vmem:[%s5759_s13 + $0x20] sm:$0xff]   ;;  %s7252_s1 = sld [smem:[#allocation12_spill]] }
 0x3d9   : > { %2168 = vrot.lane.b32.xlu1 %v2164_v38, %s5720_s26 }
 0x3db   : > { %2170 = vrot.lane.b32.xlu0 %v2165_v4, %s5720_s26  ;;  %s7251_s26 = sld [smem:[#allocation15_spill]] }
 0x3dd   : > { %2200 = vrot.lane.b32.xlu1 %v2196_v46, %s5719_s23 }
 0x3df   : > { %2202 = vrot.lane.b32.xlu0 %v2197_v45, %s5719_s23  ;;  %s7250_s23 = sld [smem:[#allocation13_spill]] }
 0x3e1   : > { %2136 = vrot.lane.b32.xlu1 %v2132_v50, %s7214_s28 }
 0x3e3   : > { %2138 = vrot.lane.b32.xlu0 %v2133_v52, %s7214_s28  ;;  %v5591_v52 = vld [vmem:[%s5759_s13 + $0x78] sm:$0xff]  }
 0x3e5   : > { %2054 = vrot.lane.b32.xlu1 %v2050_v53, %s5715_s0  ;;  %v5592_v53 = vld [vmem:[%s5759_s13 + $0x38] sm:$0xff]  }
 0x3e7   : > { %2056 = vrot.lane.b32.xlu0 %v2051_v15, %s5715_s0  ;;  %v5596_v15 = vld [vmem:[%s5759_s13 + $0x28] sm:$0xff]   ;;  %s5727_s0 = smov 9  }
 0x3e9   : > { %2086 = vrot.lane.b32.xlu1 %v2082_v56, %s7218_s11  ;;  %v5597_v56 = vld [vmem:[%s5759_s13 + $0x60] sm:$0xff]  }
 0x3eb   : > { %2088 = vrot.lane.b32.xlu0 %v2083_v60, %s7218_s11 }
 0x3ed   : > { %1990 = vrot.lane.b32.xlu1 %v1986_v61, %s5718_s22 }
 0x3ef   : > { %1992 = vrot.lane.b32.xlu0 %v1987_v63, %s5718_s22  ;;  %s5731_s22 = smov 119  }
 0x3f1   : > { %2022 = vrot.lane.b32.xlu1 %v2018_v0, %s5717_s18 }
 0x3f3   : > { %2024 = vrot.lane.b32.xlu0 %v2019_v1, %s5717_s18  ;;  %s5730_s18 = smov 120  }
 0x3f5   : > { %2273 = vperm.xlu1 %5589, %v2270_v2  }
 0x3f7   : > { %2348 = vperm.xlu0 %5588, %v2345_v3  }
 0x447   : > { %v2233_v6 = vpop.permute.xlu1 %2232 }
 0x449   : > { %v2235_v7 = vpop.permute.xlu0 %2234 }
 0x44a   : > { %v2236_v8 = vsel %vm1158_vm1, %v2233_v6, %v2235_v7  ;;  %2240 = vst.msk [vmem:[#allocation4 + $0x88] sm:$0xff] %vm1158_vm1, %v2235_v7 }
 0x44b   : > { %v2169_v9 = vpop.permute.xlu1 %2168  ;;  %2239 = vst [vmem:[#allocation4 + $0x80] sm:$0xff] %v2236_v8  ;;  %v2268_v13 = vpack.c.bf16 %v2236_v8, %v2236_v8 }
 0x44c   : > { %2586 = vst.msk [vmem:[#allocation4 + $0x80] sm:$0xff] %vm2576_vm13, %v5723_v42 }
 0x44d   : > { %v2171_v10 = vpop.permute.xlu0 %2170  ;;  %v2280_v21 = vsel %vm1887_vm15, %v2268_v13, 0 }
 0x44e   : > { %v2172_v11 = vsel %vm1232_vm6, %v2169_v9, %v2171_v10  ;;  %2176 = vst.msk [vmem:[#allocation4 + $0x68] sm:$0xff] %vm1232_vm6, %v2171_v10  ;;  %vm5732_vm6 = vmmov 0  }
 0x44f   : > { %v2201_v12 = vpop.permute.xlu1 %2200  ;;  %2175 = vst [vmem:[#allocation4 + $0x60] sm:$0xff] %v2172_v11 }
 0x450   : > { %2584 = vst.msk [vmem:[#allocation4 + $0x60] sm:$0xff] %vm2576_vm13, %v5723_v42 }
 0x451   : > { %v2203_v14 = vpop.permute.xlu0 %2202  ;;  %v2259_v16 = vld [vmem:[#allocation4 + $0x88] sm:$0xff] }
 0x452   : > { %v2204_v17 = vsel %vm1194_vm5, %v2201_v12, %v2203_v14  ;;  %2208 = vst.msk [vmem:[#allocation4 + $0x78] sm:$0xff] %vm1194_vm5, %v2203_v14  ;;  %v2269_v20 = vpack.c.bf16 %v2259_v16, %v2259_v16  ;;  %vm2351_vm5 = vcmask 64512  }
 0x453   : > { %v2137_v19 = vpop.permute.xlu1 %2136  ;;  %2207 = vst [vmem:[#allocation4 + $0x70] sm:$0xff] %v2204_v17  ;;  %v2266_v31 = vpack.c.bf16 %v2204_v17, %v2172_v11  ;;  %v2340_v17 = vld [vmem:[%s5824_s20] sm:$0xf] }
 0x454   : > { %5244 = vmatprep.subr.msk.bf16.mxu0 %vm1887_vm15, %v2269_v20  ;;  %2585 = vst.msk [vmem:[#allocation4 + $0x70] sm:$0xff] %vm2576_vm13, %v5723_v42  ;;  %v5600_v20 = vld [vmem:[%s5759_s13 + $0x18] sm:$0xff]  }
 0x455   : > { %v2139_v22 = vpop.permute.xlu0 %2138  ;;  %2292 = vmatpush1.bf16.msra.mxu0 %v2280_v21  ;;  %v2255_v26 = vld [vmem:[#allocation4 + $0x68] sm:$0xff]  ;;  %v5601_v21 = vld [vmem:[%s5759_s13 + $0x50] sm:$0xff]  }
 0x456   : > { %v2140_v23 = vsel %vm1273_vm7, %v2137_v19, %v2139_v22  ;;  %2144 = vst.msk [vmem:[#allocation4 + $0x58] sm:$0xff] %vm1273_vm7, %v2139_v22  ;;  %v5599_v19 = vld [vmem:[%s5759_s13 + $0x58] sm:$0xff]   ;;  %v5602_v22 = vld [vmem:[%s5759_s13 + $0x10] sm:$0xff]   ;;  %vm2695_vm7 = vcmask 465920  }
 0x457   : > { %v2055_v24 = vpop.permute.xlu1 %2054  ;;  %2143 = vst [vmem:[#allocation4 + $0x50] sm:$0xff] %v2140_v23  ;;  %v2264_v38 = vpack.c.bf16 %v2140_v23, %v6274_v44  ;;  %v5603_v23 = vld [vmem:[%s5759_s13 + $0x48] sm:$0xff]  }
 0x458   : > { %2061 = vst.msk [vmem:[#allocation4 + $0x20] sm:$0xff] %vm1666_vm8, %v2055_v24  ;;  %vm2729_vm8 = vcmask 449536  }
 0x459   : > { %2583 = vst.msk [vmem:[#allocation4 + $0x50] sm:$0xff] %vm2576_vm13, %v5723_v42  ;;  %v2057_v25 = vpop.permute.xlu0 %2056  ;;  %v2257_v27 = vld [vmem:[#allocation4 + $0x78] sm:$0xff] }
 0x45a   : > { %v2058_v28 = vsel %vm1246_vm4, %v2055_v24, %v2057_v25  ;;  %v2267_v30 = vpack.c.bf16 %v2257_v27, %v2255_v26  ;;  %v5604_v24 = vld [vmem:[%s5759_s13 + $0x8] sm:$0xff]   ;;  %v5605_v25 = vld [vmem:[%s5759_s13 + $0x40] sm:$0xff]  }
 0x45b   : > { %v2087_v29 = vpop.permute.xlu1 %2086  ;;  %2062 = vst [vmem:[#allocation4 + $0x28] sm:$0xff] %v2058_v28  ;;  %v5606_v26 = vld [vmem:[%s5759_s13] sm:$0xff]  }
 0x45c   : > { %2093 = vst.msk [vmem:[#allocation4 + $0x30] sm:$0xff] %vm1699_vm9, %v2087_v29  ;;  %2293 = vmatprep.subr.bf16.mxu0 %v2267_v30  ;;  %v6362_v27 = vld [vmem:[%s5764_s17 + $0x6] ss:$0 sm:$0xff]  ;;  %v6376_v30 = vld [vmem:[%s5764_s17 + $0x7] ss:$0 sm:$0xff]  ;;  %vm2678_vm9 = vcmask 515072  }
 0x45d   : > { %v2089_v32 = vpop.permute.xlu0 %2088  ;;  %2294 = vmatpush1.bf16.msra.mxu0 %v2266_v31  ;;  %v2253_v33 = vld [vmem:[#allocation4 + $0x58] sm:$0xff]  ;;  %2687 = vrot.lane.b32.xlu0 %v6362_v27, %s5726_s2  ;;  %v6383_v31 = vld [vmem:[%s5764_s17 + $0x3] ss:$0 sm:$0xff] }
 0x45e   : > { %v2090_v36 = vsel %vm7204_vm3, %v2087_v29, %v2089_v32  ;;  %v2265_v34 = vpack.c.bf16 %v2253_v33, %v6272_v41  ;;  %v6372_v29 = vld [vmem:[%s5764_s17 + $0x5] ss:$0 sm:$0xff]  ;;  %v6386_v32 = vld [vmem:[%s5764_s17 + $0x2] ss:$0 sm:$0xff]  ;;  %v6393_v33 = vld [vmem:[%s5764_s17 + $0x1] ss:$0 sm:$0xff] }
 0x45f   : > { %v1991_v37 = vpop.permute.xlu1 %1990  ;;  %v2246_v35 = vld [vmem:[#allocation4 + $0x20] sm:$0xff]  ;;  %2094 = vst [vmem:[#allocation4 + $0x38] sm:$0xff] %v2090_v36  ;;  %v2263_v39 = vpack.c.bf16 %v2090_v36, %v2058_v28  ;;  %v6365_v28 = vld [vmem:[%s5764_s17 + $0x8] ss:$0 sm:$0xff] }
 0x460   : > { %1997 = vst.msk [vmem:[#allocation4] sm:$0xff] %vm1600_vm10, %v1991_v37  ;;  %2295 = vmatprep.subr.bf16.mxu0 %v2265_v34  ;;  %2721 = vrot.lane.b32.xlu1 %v6365_v28, %s5727_s0  ;;  %v6396_v36 = vld [vmem:[%s5764_s17] ss:$0 sm:$0xff]  ;;  %vm2712_vm10 = vcmask 457728  }
 0x461   : > { %2580 = vst.msk [vmem:[#allocation4 + $0x20] sm:$0xff] %vm2576_vm13, %v5723_v42  ;;  %v1993_v40 = vpop.permute.xlu0 %1992  ;;  %2296 = vmatpush1.bf16.msra.mxu0 %v2264_v38  ;;  %2670 = vrot.lane.b32.xlu0 %v6372_v29, %s7218_s11 }
 0x462   : > { %v1994_v4 = vsel %vm1170_vm2, %v1991_v37, %v1993_v40  ;;  %2297 = vmatprep.subr.bf16.mxu0 %v2263_v39 }
 0x463   : > { %v2023_v5 = vpop.permute.xlu1 %2022  ;;  %v2248_v46 = vld [vmem:[#allocation4 + $0x30] sm:$0xff]  ;;  %1998 = vst [vmem:[#allocation4 + $0x8] sm:$0xff] %v1994_v4 }
 0x464   : > { %2029 = vst.msk [vmem:[#allocation4 + $0x10] sm:$0xff] %vm1633_vm11, %v2023_v5  ;;  %v2262_v41 = vpack.c.bf16 %v2248_v46, %v2246_v35  ;;  %2704 = vrot.lane.b32.xlu1 %v6376_v30, %s5728_s15  ;;  %vm2653_vm11 = vcmask 523272  }
 0x465   : > { %2581 = vst.msk [vmem:[#allocation4 + $0x30] sm:$0xff] %vm2576_vm13, %v5723_v42  ;;  %v2025_v44 = vpop.permute.xlu0 %2024  ;;  %2645 = vrot.lane.b32.xlu0 %v6383_v31, %s7214_s28 }
 0x466   : > { %2298 = vmatpush1.bf16.msra.mxu0 %v2262_v41  ;;  %v2026_v47 = vsel %vm1208_vm0, %v2023_v5, %v2025_v44 }
 0x467   : > { %v2242_v43 = vld [vmem:[#allocation4] sm:$0xff]  ;;  %2030 = vst [vmem:[#allocation4 + $0x18] sm:$0xff] %v2026_v47  ;;  %v2261_v45 = vpack.c.bf16 %v2026_v47, %v1994_v4 }
 0x468   : > { %2578 = vst.msk [vmem:[#allocation4] sm:$0xff] %vm2576_vm13, %v5723_v42  ;;  %2628 = vrot.lane.b32.xlu1 %v6386_v32, %s5729_s16 }
 0x469   : > { %2299 = vmatprep.subr.bf16.mxu0 %v2261_v45  ;;  %2611 = vrot.lane.b32.xlu0 %v6393_v33, %s5730_s18 }
 0x46b   : > { %v2244_v49 = vld [vmem:[#allocation4 + $0x10] sm:$0xff] }
 0x46c   : > { %v2260_v50 = vpack.c.bf16 %v2244_v49, %v2242_v43  ;;  %2579 = vst.msk [vmem:[#allocation4 + $0x10] sm:$0xff] %vm2576_vm13, %v5723_v42  ;;  %2594 = vrot.lane.b32.xlu1 %v6396_v36, %s5731_s22 }
 0x46e   : > { %2300 = vmatpush1.bf16.msra.mxu0 %v2260_v50 }
 0x46f   : > { %5378 = vmatprep.subr.bf16.mxu0 %v5591_v52 }
 0x470   : > { %v2274_v58 = vpop.permute.xlu1 %2273 }
 0x471   : > { %5245 = vmatmul.mubr.msk.bf16.vlgmr.msra.gmra.mxu0 %vm1883_vm12, %v2241_v51 }
 0x472   : > { %5379 = vmatpush3.bf16.msra.mxu0 %v5592_v53  ;;  %v2349_v37 = vpop.permute.xlu0 %2348 }
 0x473   : > { %5380 = vmatprep.subr.bf16.mxu0 %v5593_v54  ;;  %v6404_v54 = vld [vmem:[%s5764_s17 + $0x4] ss:$0 sm:$0xff] }
 0x476   : > { %5381 = vmatpush3.bf16.msra.mxu0 %v5594_v55 }
 0x477   : > { %5382 = vmatprep.subr.bf16.mxu0 %v5595_v18 }
 0x47a   : > { %5383 = vmatpush3.bf16.msra.mxu0 %v5596_v15 }
 0x47b   : > { %5384 = vmatprep.subr.bf16.mxu0 %v5597_v56 }
 0x47e   : > { %5385 = vmatpush3.bf16.msra.mxu0 %v5598_v57 }
 0x47f   : > { %5386 = vmatprep.subr.bf16.mxu0 %v5599_v19 }
 0x482   : > { %5387 = vmatpush3.bf16.msra.mxu0 %v5600_v20 }
 0x483   : > { %5388 = vmatprep.subr.bf16.mxu0 %v5601_v21 }
 0x486   : > { %5389 = vmatpush3.bf16.msra.mxu0 %v5602_v22 }
 0x487   : > { %5390 = vmatprep.subr.bf16.mxu0 %v5603_v23 }
 0x48a   : > { %5391 = vmatpush3.bf16.msra.mxu0 %v5604_v24 }
 0x48b   : > { %5392 = vmatprep.subr.bf16.mxu0 %v5605_v25 }
 0x48e   : > { %5393 = vmatpush3.bf16.msra.mxu0 %v5606_v26 }
 0x48f   : > { %5463 = vmatprep.subr.bf16.mxu0 %v5723_v42 }
 0x4cf   : > { %v2688_v45 = vpop.permute.xlu0 %2687 }
 0x4d2   : > { %v2722_v49 = vpop.permute.xlu1 %2721 }
 0x4d3   : > { %v2671_v51 = vpop.permute.xlu0 %2670 }
 0x4d6   : > { %v2705_v52 = vpop.permute.xlu1 %2704 }
 0x4d7   : > { %v2646_v56 = vpop.permute.xlu0 %2645 }
 0x4da   : > { %v2629_v57 = vpop.permute.xlu1 %2628 }
 0x531   : > { %v2319_v59 = vpop.f32.mrf.mxu0 }
 0x532   : > { %v2320_v60 = vadd.f32 %v2319_v59, %v2274_v58 }
 0x533   : > { %v2321_v61 = vpop.f32.mrf.mxu0 }
 0x534   : > { %v2328_v62 = vmin.f32 %v2320_v60, 0.0  ;;  %v2322_v63 = vadd.f32 %v2321_v61, %v2274_v58  ;;  %vm2326_vm1 = vcmp.gt.f32.partialorder %v2320_v60, 0.0 }
 0x535   : > { %v2323_v0 = vpop.f32.mrf.mxu0 }
 0x536   : > { %v2330_v1 = vmul.f32 1.442695, %v2328_v62  ;;  %v2329_v2 = vmin.f32 %v2322_v63, 0.0  ;;  %vm2327_vm2 = vcmp.gt.f32.partialorder %v2322_v63, 0.0  ;;  %v2612_v62 = vpop.permute.xlu0 %2611 }
 0x537   : > { %v2324_v3 = vpop.f32.mrf.mxu0 }
 0x538   : > { %5642 = vpow2.f32 %v2330_v1  ;;  %v2332_v6 = vmul.f32 1.442695, %v2329_v2  ;;  %v2746_v3 = vld [vmem:[%s5839_s8] sm:$0xff] }
 0x53a   : > { %5644 = vpow2.f32 %v2332_v6 }
 0x545   : > { %v5643_v7 = vpop.eup %5642 }
 0x546   : > { %v5246_v8 = vadd.f32 -1.0, %v5643_v7 }
 0x547   : > { %v5645_v9 = vpop.eup %5644 }
 0x548   : > { %v2336_v10 = vsel %vm2326_vm1, %v2320_v60, %v5246_v8  ;;  %v5247_v11 = vadd.f32 -1.0, %v5645_v9  ;;  %vm2619_vm1 = vcmask 523328  }
 0x549   : > { %2338 = vst [vmem:[#allocation3] sm:$0xff] %v2336_v10  ;;  %v2343_v12 = vpack.c.bf16 %v2336_v10, %v2336_v10 }
 0x54a   : > { %v2337_v13 = vsel %vm2327_vm2, %v2322_v63, %v5247_v11  ;;  %v2595_v63 = vpop.permute.xlu1 %2594  ;;  %vm2602_vm2 = vcmask 523336  }
 0x54b   : > { %v2344_v14 = vpack.c.bf16 %v2337_v13, %v2337_v13  ;;  %v2356_v16 = vsel %vm1887_vm15, %v2343_v12, 0 }
 0x54d   : > { %5248 = vmatprep.subr.msk.bf16.mxu1 %vm1887_vm15, %v2344_v14 }
 0x54e   : > { %2376 = vmatpush1.bf16.msra.mxu1 %v2356_v16 }
 0x54f   : > { %5435 = vmatprep.subr.bf16.mxu1 %v5723_v42 }
 0x551   : > { %5249 = vmatmul.mubr.msk.bf16.vlgmr.msra.gmra.mxu1 %vm2351_vm5, %v2340_v17 }
 0x552   : > { %5445 = vmatprep.mubr.msk.bf16.mxu1 %vm5732_vm6, %v5723_v42 }
 0x611   : > { %v2395_v34 = vpop.f32.mrf.mxu1 }
 0x612   : > { %v2396_v35 = vadd.f32 %v2395_v34, %v2349_v37 }
 0x613   : > { %v2397_v38 = vpop.f32.mrf.mxu1 }
 0x614   : > { %2402 = vst [vmem:[#allocation2] sm:$0xff] %v2396_v35  ;;  %v2398_v39 = vadd.f32 %v2397_v38, %v2349_v37  ;;  %v2406_v46 = vpack.c.bf16 %v2396_v35, %v2396_v35 }
 0x615   : > { %v2399_v40 = vpop.f32.mrf.mxu1 }
 0x616   : > { %2403 = vst [vmem:[#allocation2 + $0x8] sm:$0xff] %v2398_v39  ;;  %v2407_v4 = vpack.c.bf16 %v2398_v39, %v2398_v39 }
 0x617   : > { %v2400_v5 = vpop.f32.mrf.mxu1 }
 0x618   : > { %2568 = vmatprep.mubr.bf16.mxu0 %v2407_v4 }
 0x619   : > { %2569 = vmatmul.mubr.bf16.vlgmr.msra.gmra.mxu0 %v2406_v46 }
 0x61a   : > { %5465 = vmatprep.mubr.msk.bf16.mxu0 %vm5732_vm6, %v5723_v42 }
 0x6d9   : > { %v5394_v41 = vpop.f32.mrf.mxu0 }
 0x6db   : > { %v5395_v44 = vpop.f32.mrf.mxu0 }
 0x6dc   : > { %v5396_v47 = vadd.f32 %v5395_v44, %v5394_v41 }
 0x6dd   : > { %v5397_v43 = vpop.f32.mrf.mxu0 }
 0x6de   : > { %2577 = vst.msk [vmem:[#allocation3] sm:$0xff] %vm2576_vm13, %v5396_v47 }
 0x6df   : > { %v5398_v50 = vpop.f32.mrf.mxu0 }
 0x6e5   : > { %v2663_v53 = vld [vmem:[#allocation3] sm:$0xff] }
 0x6e6   : > { %v2690_v55 = vmul.f32 %v2688_v45, %v2663_v53  ;;  %v2724_v18 = vmul.f32 %v2722_v49, %v2663_v53  ;;  %v2661_v15 = vmul.f32 %v6404_v54, %v2663_v53  ;;  %v2673_v58 = vmul.f32 %v2671_v51, %v2663_v53 }
 0x6e7   : > { %v2707_v59 = vmul.f32 %v2705_v52, %v2663_v53  ;;  %v2648_v60 = vmul.f32 %v2663_v53, %v2646_v56  ;;  %v2631_v61 = vmul.f32 %v2663_v53, %v2629_v57  ;;  %v2614_v1 = vmul.f32 %v2663_v53, %v2612_v62 }
 0x6e8   : > { %2692 = vrot.lane.b32.xlu0 %v2690_v55, %s5729_s16  ;;  %2726 = vrot.lane.b32.xlu1 %v2724_v18, %s5731_s22  ;;  %2662 = vst.msk [vmem:[#allocation4 + $0x40] sm:$0xff] %vm2576_vm13, %v2661_v15  ;;  %v2597_v2 = vmul.f32 %v2663_v53, %v2595_v63 }
 0x6ec   : > { %2675 = vrot.lane.b32.xlu0 %v2673_v58, %s7214_s28  ;;  %2709 = vrot.lane.b32.xlu1 %v2707_v59, %s5730_s18  ;;  %v2965_v59 = vld [vmem:[%s7250_s23] sm:$0xff]  ;;  %s7207_s23 = smov 125  }
 0x6ef   : > { %v6414_v0 = vld [vmem:[#allocation4 + $0x40] sm:$0xff] }
 0x6f0   : > { %2650 = vrot.lane.b32.xlu0 %v2648_v60, %s7218_s11  ;;  %2633 = vrot.lane.b32.xlu1 %v2631_v61, %s5726_s2  ;;  %2809 = vst.msk [vmem:[#allocation4 + $0x40] sm:$0xff] %vm2576_vm13, %v5723_v42  ;;  %v3028_v60 = vld [vmem:[%s7251_s26] sm:$0xff]  ;;  %v3029_v61 = vld [vmem:[%s7251_s26 + $0x8] sm:$0xff] }
 0x6f4   : > { %2616 = vrot.lane.b32.xlu0 %v2614_v1, %s5728_s15  ;;  %2599 = vrot.lane.b32.xlu1 %v2597_v2, %s5727_s0 }
 0x6f8   : > { %2749 = vperm.xlu1 %5589, %v2746_v3   ;;  %2941 = vrot.lane.b32.xlu0 %v6365_v28, %s5727_s0 }
 0x6fc   : > { %2909 = vrot.lane.b32.xlu1 %v6362_v27, %s5726_s2  ;;  %2925 = vrot.lane.b32.xlu0 %v6376_v30, %s5728_s15  ;;  %v2731_v30 = vld [vmem:[%s7249_s4] sm:$0xf]  ;;  %s7261_s4 = smov 5  }
 0x700   : > { %2893 = vrot.lane.b32.xlu1 %v6372_v29, %s7218_s11  ;;  %2853 = vrot.lane.b32.xlu0 %v6386_v32, %s5729_s16 }
 0x704   : > { %2869 = vrot.lane.b32.xlu1 %v6383_v31, %s7214_s28  ;;  %2821 = vrot.lane.b32.xlu0 %v6396_v36, %s5731_s22 }
 0x708   : > { %2837 = vrot.lane.b32.xlu1 %v6393_v33, %s5730_s18 }
 0x75a   : > { %v2693_v6 = vpop.permute.xlu0 %2692  ;;  %v2727_v7 = vpop.permute.xlu1 %2726 }
 0x75b   : > { %2696 = vst.msk [vmem:[#allocation4 + $0x60] sm:$0xff] %vm2695_vm7, %v2693_v6 }
 0x75c   : > { %2730 = vst.msk [vmem:[#allocation4 + $0x80] sm:$0xff] %vm2729_vm8, %v2727_v7 }
 0x75e   : > { %v2676_v8 = vpop.permute.xlu0 %2675  ;;  %v2710_v9 = vpop.permute.xlu1 %2709 }
 0x75f   : > { %2679 = vst.msk [vmem:[#allocation4 + $0x50] sm:$0xff] %vm2678_vm9, %v2676_v8 }
 0x760   : > { %2713 = vst.msk [vmem:[#allocation4 + $0x70] sm:$0xff] %vm2712_vm10, %v2710_v9 }
 0x762   : > { %v2651_v10 = vpop.permute.xlu0 %2650  ;;  %v2634_v11 = vpop.permute.xlu1 %2633  ;;  %v2738_v13 = vld [vmem:[#allocation4 + $0x60] sm:$0xff] }
 0x763   : > { %v2740_v12 = vld [vmem:[#allocation4 + $0x80] sm:$0xff]  ;;  %2654 = vst.msk [vmem:[#allocation4 + $0x30] sm:$0xff] %vm2653_vm11, %v2651_v10 }
 0x764   : > { %2637 = vst.msk [vmem:[#allocation4 + $0x20] sm:$0xff] %vm2636_vm14, %v2634_v11  ;;  %v2745_v14 = vpack.c.bf16 %v2740_v12, %v2740_v12 }
 0x765   : > { %2813 = vst.msk [vmem:[#allocation4 + $0x80] sm:$0xff] %vm2576_vm13, %v5723_v42  ;;  %2811 = vst.msk [vmem:[#allocation4 + $0x60] sm:$0xff] %vm2576_vm13, %v5723_v42 }
 0x766   : > { %v2756_v16 = vsel %vm1887_vm15, %v2745_v14, 0  ;;  %v2617_v17 = vpop.permute.xlu0 %2616  ;;  %v2600_v19 = vpop.permute.xlu1 %2599  ;;  %v2737_v21 = vld [vmem:[#allocation4 + $0x50] sm:$0xff] }
 0x767   : > { %5436 = vmatpush3.bf16.msra.mxu1 %v2756_v16  ;;  %v2739_v20 = vld [vmem:[#allocation4 + $0x70] sm:$0xff]  ;;  %2620 = vst.msk [vmem:[#allocation4 + $0x10] sm:$0xff] %vm2619_vm1, %v2617_v17  ;;  %v2743_v25 = vpack.c.bf16 %v2737_v21, %v6414_v0 }
 0x768   : > { %2603 = vst.msk [vmem:[#allocation4] sm:$0xff] %vm2602_vm2, %v2600_v19  ;;  %5437 = vmatprep.subr.bf16.mxu1 %v5723_v42  ;;  %v2744_v22 = vpack.c.bf16 %v2739_v20, %v2738_v13 }
 0x769   : > { %2812 = vst.msk [vmem:[#allocation4 + $0x70] sm:$0xff] %vm2576_vm13, %v5723_v42  ;;  %2810 = vst.msk [vmem:[#allocation4 + $0x50] sm:$0xff] %vm2576_vm13, %v5723_v42 }
 0x76a   : > { %v2735_v24 = vld [vmem:[#allocation4 + $0x30] sm:$0xff]  ;;  %v2942_v5 = vpop.permute.xlu0 %2941 }
 0x76b   : > { %5438 = vmatpush3.bf16.msra.mxu1 %v2744_v22  ;;  %v2734_v23 = vld [vmem:[#allocation4 + $0x20] sm:$0xff]  ;;  %2808 = vst.msk [vmem:[#allocation4 + $0x30] sm:$0xff] %vm2576_vm13, %v5723_v42 }
 0x76c   : > { %5439 = vmatprep.subr.bf16.mxu1 %v5723_v42  ;;  %2807 = vst.msk [vmem:[#allocation4 + $0x20] sm:$0xff] %vm2576_vm13, %v5723_v42  ;;  %v2742_v28 = vpack.c.bf16 %v2735_v24, %v2734_v23  ;;  %v2950_v24 = vld [vmem:[%s7252_s1] sm:$0xf]  ;;  %s7209_s1 = smov 5  }
 0x76e   : > { %v2733_v27 = vld [vmem:[#allocation4 + $0x10] sm:$0xff]  ;;  %v2926_v41 = vpop.permute.xlu0 %2925 }
 0x76f   : > { %5440 = vmatpush3.bf16.msra.mxu1 %v2743_v25  ;;  %v2732_v26 = vld [vmem:[#allocation4] sm:$0xff]  ;;  %2806 = vst.msk [vmem:[#allocation4 + $0x10] sm:$0xff] %vm2576_vm13, %v5723_v42 }
 0x770   : > { %5441 = vmatprep.subr.bf16.mxu1 %v5723_v42  ;;  %2805 = vst.msk [vmem:[#allocation4] sm:$0xff] %vm2576_vm13, %v5723_v42  ;;  %v2741_v29 = vpack.c.bf16 %v2733_v27, %v2732_v26 }
 0x772   : > { %v2854_v50 = vpop.permute.xlu0 %2853 }
 0x773   : > { %5442 = vmatpush3.bf16.msra.mxu1 %v2742_v28  ;;  %v2750_v31 = vpop.permute.xlu1 %2749 }
 0x774   : > { %5443 = vmatprep.subr.bf16.mxu1 %v5723_v42 }
 0x776   : > { %v2822_v18 = vpop.permute.xlu0 %2821 }
 0x777   : > { %5444 = vmatpush3.bf16.msra.mxu1 %v2741_v29  ;;  %v2910_v46 = vpop.permute.xlu1 %2909 }
 0x778   : > { %5449 = vmatprep.subr.bf16.mxu1 %v5723_v42 }
 0x77a   : > { %5446 = vmatmul.mubr.msk.bf16.vlgmr.msra.gmra.mxu1 %vm1883_vm12, %v2731_v30 }
 0x77b   : > { %5459 = vmatprep.mubr.msk.bf16.mxu1 %vm5732_vm6, %v5723_v42  ;;  %v2894_v44 = vpop.permute.xlu1 %2893 }
 0x77f   : > { %v2870_v51 = vpop.permute.xlu1 %2869 }
 0x783   : > { %v2838_v15 = vpop.permute.xlu1 %2837 }
 0x83a   : > { %v2792_v32 = vpop.f32.mrf.mxu1 }
 0x83b   : > { %v2793_v33 = vadd.f32 %v2792_v32, %v2750_v31 }
 0x83c   : > { %v5447_v36 = vpop.f32.mrf.mxu1 }
 0x83d   : > { %v2799_v37 = vmin.f32 %v2793_v33, 0.0  ;;  %vm2798_vm3 = vcmp.gt.f32.partialorder %v2793_v33, 0.0 }
 0x83e   : > { %v2795_v34 = vpop.f32.mrf.mxu1 }
 0x83f   : > { %v2800_v35 = vmul.f32 1.442695, %v2799_v37 }
 0x840   : > { %v5448_v38 = vpop.f32.mrf.mxu1 }
 0x841   : > { %5646 = vpow2.f32 %v2800_v35 }
 0x84e   : > { %v5647_v39 = vpop.eup %5646 }
 0x84f   : > { %v5276_v40 = vadd.f32 -1.0, %v5647_v39 }
 0x851   : > { %v2803_v4 = vsel %vm2798_vm3, %v2793_v33, %v5276_v40 }
 0x852   : > { %2804 = vst.msk [vmem:[#allocation2] sm:$0xff] %vm2576_vm13, %v2803_v4 }
 0x859   : > { %v2878_v47 = vld [vmem:[#allocation2] sm:$0xff] }
 0x85a   : > { %v2884_v43 = vmul.f32 %v6404_v54, %v2878_v47  ;;  %v2944_v45 = vmul.f32 %v2942_v5, %v2878_v47  ;;  %v2912_v49 = vmul.f32 %v2910_v46, %v2878_v47  ;;  %v2928_v52 = vmul.f32 %v2926_v41, %v2878_v47 }
 0x85b   : > { %v2896_v53 = vmul.f32 %v2894_v44, %v2878_v47  ;;  %v2856_v55 = vmul.f32 %v2878_v47, %v2854_v50  ;;  %v2872_v54 = vmul.f32 %v2878_v47, %v2870_v51  ;;  %v2824_v57 = vmul.f32 %v2878_v47, %v2822_v18 }
 0x85c   : > { %2885 = vst.msk [vmem:[#allocation4 + $0x40] sm:$0xff] %vm2576_vm13, %v2884_v43  ;;  %2946 = vrot.lane.b32.xlu0 %v2944_v45, %s5731_s22  ;;  %2914 = vrot.lane.b32.xlu1 %v2912_v49, %s5729_s16  ;;  %v2840_v58 = vmul.f32 %v2878_v47, %v2838_v15  ;;  %s7216_s16 = smov 3   ;;  %s7205_s22 = smov 124  }
 0x860   : > { %2930 = vrot.lane.b32.xlu0 %v2928_v52, %s5730_s18  ;;  %2898 = vrot.lane.b32.xlu1 %v2896_v53, %s7214_s28  ;;  %s5734_s18 = smov 4  }
 0x863   : > { %v2955_v56 = vld [vmem:[#allocation4 + $0x40] sm:$0xff] }
 0x864   : > { %2858 = vrot.lane.b32.xlu0 %v2856_v55, %s5726_s2  ;;  %2874 = vrot.lane.b32.xlu1 %v2872_v54, %s7218_s11  ;;  %3179 = vst.msk [vmem:[#allocation4 + $0x40] sm:$0xff] %vm1208_vm0, %v5723_v42  ;;  %s7253_s2 = sld [smem:[#allocation14_spill]] }
 0x868   : > { %2826 = vrot.lane.b32.xlu0 %v2824_v57, %s5727_s0  ;;  %2842 = vrot.lane.b32.xlu1 %v2840_v58, %s5728_s15  ;;  %s7254_s0 = sld [smem:[#allocation6_spill]] }
 0x869   : > { %s7255_s15 = sld [smem:[#allocation7_spill]] }
 0x86a   : > { %v5607_v39 = vld [vmem:[%s7253_s2] sm:$0xff]   ;;  %s7211_s2 = smov 123  }
 0x86c   : > { %2968 = vperm.xlu0 %5588, %v2965_v59   ;;  %3032 = vperm.xlu1 %5589, %v3028_v60  }
 0x86e   : > { %v5608_v40 = vld [vmem:[%s7254_s0 + $0x18] sm:$0xff]   ;;  %v5609_v4 = vld [vmem:[%s7254_s0 + $0x10] sm:$0xff]   ;;  %v5610_v5 = vld [vmem:[%s7254_s0 + $0x8] sm:$0xff]  }
 0x86f   : > { %v5611_v46 = vld [vmem:[%s7254_s0] sm:$0xff]   ;;  %v6570_v50 = vld [vmem:[%s7255_s15 + $0x8] ss:$0 sm:$0xff]  ;;  %s7260_s0 = smov 123  }
 0x870   : > { %3037 = vperm.xlu0 %5588, %v3029_v61   ;;  %v6539_v41 = vld [vmem:[%s7255_s15 + $0x6] ss:$0 sm:$0xff]  ;;  %v6542_v44 = vld [vmem:[%s7255_s15 + $0x7] ss:$0 sm:$0xff]  ;;  %v6549_v47 = vld [vmem:[%s7255_s15 + $0x3] ss:$0 sm:$0xff] }
 0x871   : > { %3355 = vrot.lane.b32.xlu1 %v6542_v44, %s5734_s18  ;;  %v6552_v43 = vld [vmem:[%s7255_s15 + $0x5] ss:$0 sm:$0xff]  ;;  %v6560_v45 = vld [vmem:[%s7255_s15 + $0x1] ss:$0 sm:$0xff]  ;;  %v6563_v49 = vld [vmem:[%s7255_s15 + $0x2] ss:$0 sm:$0xff] }
 0x872   : > { %v6573_v51 = vld [vmem:[%s7255_s15] ss:$0 sm:$0xff] }
 0x874   : > { %3331 = vrot.lane.b32.xlu0 %v6539_v41, %s7216_s16 }
 0x875   : > { %3308 = vrot.lane.b32.xlu1 %v6552_v43, %s7218_s11 }
 0x878   : > { %3273 = vrot.lane.b32.xlu0 %v6549_v47, %s7214_s28 }
 0x879   : > { %3249 = vrot.lane.b32.xlu1 %v6563_v49, %s7207_s23 }
 0x87c   : > { %3225 = vrot.lane.b32.xlu0 %v6560_v45, %s7205_s22 }
 0x87d   : > { %3201 = vrot.lane.b32.xlu1 %v6573_v51, %s7211_s2 }
 0x880   : > { %3379 = vrot.lane.b32.xlu0 %v6570_v50, %s7209_s1 }
 0x8ce   : > { %v2947_v62 = vpop.permute.xlu0 %2946  ;;  %v2915_v63 = vpop.permute.xlu1 %2914 }
 0x8cf   : > { %2949 = vst.msk [vmem:[#allocation4 + $0x80] sm:$0xff] %vm2729_vm8, %v2947_v62  ;;  %vm3238_vm8 = vcmask 130080  }
 0x8d0   : > { %2917 = vst.msk [vmem:[#allocation4 + $0x60] sm:$0xff] %vm2695_vm7, %v2915_v63  ;;  %vm3262_vm7 = vcmask 130072  }
 0x8d2   : > { %v2931_v0 = vpop.permute.xlu0 %2930  ;;  %v2899_v1 = vpop.permute.xlu1 %2898 }
 0x8d3   : > { %2933 = vst.msk [vmem:[#allocation4 + $0x70] sm:$0xff] %vm2712_vm10, %v2931_v0  ;;  %vm3392_vm10 = vcmask 89088  }
 0x8d4   : > { %2901 = vst.msk [vmem:[#allocation4 + $0x50] sm:$0xff] %vm2678_vm9, %v2899_v1  ;;  %vm3214_vm9 = vcmask 130088  }
 0x8d6   : > { %v2959_v2 = vld [vmem:[#allocation4 + $0x80] sm:$0xff]  ;;  %v2859_v3 = vpop.permute.xlu0 %2858  ;;  %v2875_v6 = vpop.permute.xlu1 %2874 }
 0x8d7   : > { %v2957_v7 = vld [vmem:[#allocation4 + $0x60] sm:$0xff]  ;;  %3183 = vst.msk [vmem:[#allocation4 + $0x80] sm:$0xff] %vm1208_vm0, %v5723_v42  ;;  %v2964_v8 = vpack.c.bf16 %v2959_v2, %v2959_v2 }
 0x8d8   : > { %2861 = vst.msk [vmem:[#allocation4 + $0x20] sm:$0xff] %vm2636_vm14, %v2859_v3  ;;  %v6585_v2 = vld [vmem:[%s7255_s15 + $0x4] ss:$0 sm:$0xff] }
 0x8d9   : > { %2877 = vst.msk [vmem:[#allocation4 + $0x30] sm:$0xff] %vm2653_vm11, %v2875_v6  ;;  %v2975_v9 = vsel %vm1887_vm15, %v2964_v8, 0  ;;  %vm3980_vm11 = vcmask 31744  }
 0x8da   : > { %3181 = vst.msk [vmem:[#allocation4 + $0x60] sm:$0xff] %vm1208_vm0, %v5723_v42  ;;  %5450 = vmatpush3.bf16.msra.mxu1 %v2975_v9  ;;  %v2827_v10 = vpop.permute.xlu0 %2826  ;;  %v2843_v11 = vpop.permute.xlu1 %2842  ;;  %v2958_v12 = vld [vmem:[#allocation4 + $0x70] sm:$0xff] }
 0x8db   : > { %v2956_v13 = vld [vmem:[#allocation4 + $0x50] sm:$0xff]  ;;  %2829 = vst.msk [vmem:[#allocation4] sm:$0xff] %vm2602_vm2, %v2827_v10  ;;  %5451 = vmatprep.subr.bf16.mxu1 %v5723_v42  ;;  %v2963_v14 = vpack.c.bf16 %v2958_v12, %v2957_v7 }
 0x8dc   : > { %2845 = vst.msk [vmem:[#allocation4 + $0x10] sm:$0xff] %vm2619_vm1, %v2843_v11  ;;  %v2962_v19 = vpack.c.bf16 %v2956_v13, %v2955_v56 }
 0x8dd   : > { %3182 = vst.msk [vmem:[#allocation4 + $0x70] sm:$0xff] %vm1208_vm0, %v5723_v42  ;;  %3180 = vst.msk [vmem:[#allocation4 + $0x50] sm:$0xff] %vm1208_vm0, %v5723_v42 }
 0x8de   : > { %5452 = vmatpush3.bf16.msra.mxu1 %v2963_v14  ;;  %4002 = vst.msk [vmem:[#allocation4 + $0x120] sm:$0xff] %vm3980_vm11, %v5723_v42  ;;  %4003 = vst.msk [vmem:[#allocation4 + $0x130] sm:$0xff] %vm3980_vm11, %v5723_v42 }
 0x8df   : > { %v2953_v16 = vld [vmem:[#allocation4 + $0x20] sm:$0xff]  ;;  %5453 = vmatprep.subr.bf16.mxu1 %v5723_v42  ;;  %4004 = vst.msk [vmem:[#allocation4 + $0x140] sm:$0xff] %vm3980_vm11, %v5723_v42  ;;  %4005 = vst.msk [vmem:[#allocation4 + $0x150] sm:$0xff] %vm3980_vm11, %v5723_v42 }
 0x8e0   : > { %v2954_v17 = vld [vmem:[#allocation4 + $0x30] sm:$0xff]  ;;  %3177 = vst.msk [vmem:[#allocation4 + $0x20] sm:$0xff] %vm1208_vm0, %v5723_v42 }
 0x8e1   : > { %3178 = vst.msk [vmem:[#allocation4 + $0x30] sm:$0xff] %vm1208_vm0, %v5723_v42  ;;  %v2961_v22 = vpack.c.bf16 %v2954_v17, %v2953_v16 }
 0x8e2   : > { %5454 = vmatpush3.bf16.msra.mxu1 %v2962_v19  ;;  %v2951_v20 = vld [vmem:[#allocation4] sm:$0xff]  ;;  %4006 = vst.msk [vmem:[#allocation4 + $0x160] sm:$0xff] %vm3980_vm11, %v5723_v42  ;;  %4007 = vst.msk [vmem:[#allocation4 + $0x170] sm:$0xff] %vm3980_vm11, %v5723_v42 }
 0x8e3   : > { %v2952_v21 = vld [vmem:[#allocation4 + $0x10] sm:$0xff]  ;;  %5455 = vmatprep.subr.bf16.mxu1 %v5723_v42  ;;  %3175 = vst.msk [vmem:[#allocation4] sm:$0xff] %vm1208_vm0, %v5723_v42 }
 0x8e4   : > { %3176 = vst.msk [vmem:[#allocation4 + $0x10] sm:$0xff] %vm1208_vm0, %v5723_v42  ;;  %v2960_v23 = vpack.c.bf16 %v2952_v21, %v2951_v20 }
 0x8e5   : > { %4008 = vst.msk [vmem:[#allocation4 + $0x180] sm:$0xff] %vm3980_vm11, %v5723_v42  ;;  %4009 = vst.msk [vmem:[#allocation4 + $0x190] sm:$0xff] %vm3980_vm11, %v5723_v42 }
 0x8e6   : > { %5456 = vmatpush3.bf16.msra.mxu1 %v2961_v22  ;;  %4010 = vst.msk [vmem:[#allocation4 + $0x1a0] sm:$0xff] %vm3980_vm11, %v5723_v42 }
 0x8e7   : > { %5457 = vmatprep.subr.bf16.mxu1 %v5723_v42  ;;  %v2969_v25 = vpop.permute.xlu0 %2968  ;;  %v3033_v52 = vpop.permute.xlu1 %3032 }
 0x8ea   : > { %5458 = vmatpush3.bf16.msra.mxu1 %v2960_v23 }
 0x8eb   : > { %3448 = vmatprep.subr.bf16.mxu1 %v5724_v48  ;;  %v3038_v18 = vpop.permute.xlu0 %3037  ;;  %v3356_v3 = vpop.permute.xlu1 %3355 }
 0x8ed   : > { %5460 = vmatmul.mubr.msk.bf16.vlgmr.msra.gmra.mxu1 %vm1883_vm12, %v2950_v24  ;;  %vm3368_vm12 = vcmask 97280  }
 0x8ef   : > { %v3332_v9 = vpop.permute.xlu0 %3331  ;;  %v3309_v13 = vpop.permute.xlu1 %3308 }
 0x8f3   : > { %v3274_v19 = vpop.permute.xlu0 %3273  ;;  %v3250_v23 = vpop.permute.xlu1 %3249 }
 0x9ad   : > { %v3011_v26 = vpop.f32.mrf.mxu1 }
 0x9ae   : > { %v3012_v27 = vadd.f32 %v3011_v26, %v2969_v25 }
 0x9af   : > { %v5461_v28 = vpop.f32.mrf.mxu1 }
 0x9b0   : > { %v3018_v29 = vmin.f32 %v3012_v27, 0.0  ;;  %vm3017_vm3 = vcmp.gt.f32.partialorder %v3012_v27, 0.0 }
 0x9b1   : > { %v3014_v30 = vpop.f32.mrf.mxu1 }
 0x9b2   : > { %v3019_v31 = vmul.f32 1.442695, %v3018_v29  ;;  %v3202_v30 = vpop.permute.xlu1 %3201 }
 0x9b3   : > { %v5462_v32 = vpop.f32.mrf.mxu1 }
 0x9b4   : > { %5648 = vpow2.f32 %v3019_v31 }
 0x9c1   : > { %v5649_v33 = vpop.eup %5648 }
 0x9c2   : > { %v5287_v36 = vadd.f32 -1.0, %v5649_v33 }
 0x9c4   : > { %v3022_v37 = vsel %vm3017_vm3, %v3012_v27, %v5287_v36  ;;  %v3226_v27 = vpop.permute.xlu0 %3225  ;;  %vm4175_vm3 = vcmask 23552  }
 0x9c5   : > { %3023 = vst.msk [vmem:[#allocation3] sm:$0xff] %vm2576_vm13, %v3022_v37 }
 0x9c8   : > { %v3380_v33 = vpop.permute.xlu0 %3379 }
 0x9cc   : > { %v3026_v34 = vld [vmem:[#allocation3] sm:$0xff] }
 0x9cd   : > { %v3027_v35 = vpack.c.bf16 %v3026_v34, %v3026_v34 }
 0x9cf   : > { %v3049_v38 = vsel %vm1887_vm15, %v3027_v35, 0 }
 0x9d0   : > { %5464 = vmatpush3.bf16.msra.mxu0 %v3049_v38 }
 0x9d1   : > { %5469 = vmatprep.subr.bf16.mxu0 %v5723_v42 }
 0x9d3   : > { %5466 = vmatmul.mubr.msk.bf16.vlgmr.msra.gmra.mxu0 %vm2351_vm5, %v5607_v39  ;;  %vm3286_vm5 = vcmask 130056  }
 0x9d4   : > { %5477 = vmatprep.mubr.msk.bf16.mxu0 %vm5732_vm6, %v5723_v42  ;;  %5470 = vmatpush3.bf16.msra.mxu0 %v5608_v40 }
 0x9d5   : > { %5471 = vmatprep.subr.bf16.mxu0 %v5723_v42 }
 0x9d8   : > { %5472 = vmatpush3.bf16.msra.mxu0 %v5609_v4 }
 0x9d9   : > { %5473 = vmatprep.subr.bf16.mxu0 %v5723_v42 }
 0x9dc   : > { %5474 = vmatpush3.bf16.msra.mxu0 %v5610_v5 }
 0x9dd   : > { %5475 = vmatprep.subr.bf16.mxu0 %v5723_v42 }
 0x9e0   : > { %5476 = vmatpush3.bf16.msra.mxu0 %v5611_v46 }
 0x9e1   : > { %3769 = vmatprep.subr.bf16.mxu0 %v5724_v48 }
 0xa93   : > { %v3085_v53 = vpop.f32.mrf.mxu0 }
 0xa94   : > { %v3086_v55 = vadd.f32 %v3085_v53, %v3033_v52 }
 0xa95   : > { %v5467_v54 = vpop.f32.mrf.mxu0 }
 0xa96   : > { %3092 = vst.msk [vmem:[#allocation2] sm:$0xff] %vm2576_vm13, %v3086_v55 }
 0xa97   : > { %v3088_v15 = vpop.f32.mrf.mxu0 }
 0xa98   : > { %v3089_v56 = vadd.f32 %v3088_v15, %v3038_v18 }
 0xa99   : > { %v5468_v57 = vpop.f32.mrf.mxu0 }
 0xa9a   : > { %3093 = vst.msk [vmem:[#allocation2 + $0x10] sm:$0xff] %vm2576_vm13, %v3089_v56 }
 0xa9d   : > { %v3094_v58 = vld [vmem:[#allocation2] sm:$0xff] }
 0xaa1   : > { %v3095_v59 = vld [vmem:[#allocation2 + $0x10] sm:$0xff] }
 0xaa2   : > { %v3096_v60 = vpack.c.bf16 %v3095_v59, %v3094_v58 }
 0xaa4   : > { %5478 = vmatmul.mubr.msk.bf16.vlgmr.msra.gmra.mxu0 %vm2576_vm13, %v3096_v60  ;;  %vm3344_vm13 = vcmask 105472  }
 0xb64   : > { %v3166_v61 = vpop.f32.mrf.mxu0 }
 0xb65   : > { %3173 = vst.msk [vmem:[#allocation3] sm:$0xff] %vm1208_vm0, %v3166_v61 }
 0xb66   : > { %v5479_v62 = vpop.f32.mrf.mxu0 }
 0xb68   : > { %v3169_v63 = vpop.f32.mrf.mxu0 }
 0xb69   : > { %3174 = vst.msk [vmem:[#allocation3 + $0x10] sm:$0xff] %vm1208_vm0, %v3169_v63 }
 0xb6a   : > { %v5480_v0 = vpop.f32.mrf.mxu0 }
 0xb6c   : > { %v3300_v1 = vld [vmem:[#allocation3] sm:$0xff] }
 0xb6d   : > { %v3358_v6 = vmul.f32 %v3356_v3, %v3300_v1  ;;  %v3296_v7 = vmul.f32 %v6585_v2, %v3300_v1  ;;  %v3334_v11 = vmul.f32 %v3332_v9, %v3300_v1  ;;  %v3311_v16 = vmul.f32 %v3309_v13, %v3300_v1 }
 0xb6e   : > { %v3276_v21 = vmul.f32 %v3300_v1, %v3274_v19  ;;  %v3252_v26 = vmul.f32 %v3300_v1, %v3250_v23  ;;  %v3228_v29 = vmul.f32 %v3300_v1, %v3226_v27  ;;  %v3204_v32 = vmul.f32 %v3300_v1, %v3202_v30 }
 0xb6f   : > { %3362 = vrot.lane.b32.xlu1 %v3358_v6, %s7205_s22  ;;  %3298 = vst.msk [vmem:[#allocation4 + $0x80] sm:$0xff] %vm1208_vm0, %v3296_v7  ;;  %v3382_v37 = vmul.f32 %v3380_v33, %v3300_v1 }
 0xb70   : > { %v3242_v8 = vld [vmem:[#allocation3 + $0x10] sm:$0xff] }
 0xb71   : > { %v3359_v10 = vmul.f32 %v3356_v3, %v3242_v8  ;;  %v3297_v12 = vmul.f32 %v6585_v2, %v3242_v8  ;;  %v3335_v14 = vmul.f32 %v3332_v9, %v3242_v8  ;;  %v3312_v20 = vmul.f32 %v3309_v13, %v3242_v8 }
 0xb72   : > { %v3277_v24 = vmul.f32 %v3274_v19, %v3242_v8  ;;  %v3253_v28 = vmul.f32 %v3250_v23, %v3242_v8  ;;  %v3229_v31 = vmul.f32 %v3242_v8, %v3226_v27  ;;  %v3205_v36 = vmul.f32 %v3242_v8, %v3202_v30 }
 0xb73   : > { %3364 = vrot.lane.b32.xlu0 %v3359_v10, %s7205_s22  ;;  %3338 = vrot.lane.b32.xlu1 %v3334_v11, %s7207_s23  ;;  %3299 = vst.msk [vmem:[#allocation4 + $0x90] sm:$0xff] %vm1208_vm0, %v3297_v12  ;;  %s7256_s22 = sld [smem:[#allocation17_spill]]  ;;  %v3383_v34 = vmul.f32 %v3380_v33, %v3242_v8 }
 0xb76   : > { %v6596_v17 = vld [vmem:[#allocation4 + $0x80] sm:$0xff] }
 0xb77   : > { %3340 = vrot.lane.b32.xlu0 %v3335_v14, %s7207_s23  ;;  %3315 = vrot.lane.b32.xlu1 %v3311_v16, %s7214_s28  ;;  %3511 = vst.msk [vmem:[#allocation4 + $0x80] sm:$0xff] %vm1208_vm0, %v5723_v42  ;;  %s7257_s23 = sld [smem:[#allocation16_spill]] }
 0xb79   : > { %v3424_v35 = vld [vmem:[%s7256_s22] sm:$0xff]  ;;  %v3425_v38 = vld [vmem:[%s7256_s22 + $0x8] sm:$0xff] }
 0xb7a   : > { %v6602_v22 = vld [vmem:[#allocation4 + $0x90] sm:$0xff] }
 0xb7b   : > { %3317 = vrot.lane.b32.xlu0 %v3312_v20, %s7214_s28  ;;  %3280 = vrot.lane.b32.xlu1 %v3276_v21, %s7218_s11  ;;  %v3419_v25 = vpack.c.bf16 %v6602_v22, %v6596_v17  ;;  %3512 = vst.msk [vmem:[#allocation4 + $0x90] sm:$0xff] %vm1208_vm0, %v5723_v42 }
 0xb7d   : > { %v5612_v39 = vld [vmem:[%s7257_s23 + $0x4] ss:$8 sps:$4 sm:$0xff]   ;;  %v5614_v19 = vld [vmem:[%s7257_s23] ss:$8 sps:$4 sm:$0xff]  }
 0xb7e   : > { %5306 = vmatprep.mubr.msk.bf16.mxu1 %vm1208_vm0, %v5612_v39 }
 0xb7f   : > { %3282 = vrot.lane.b32.xlu0 %v3277_v24, %s7218_s11  ;;  %3256 = vrot.lane.b32.xlu1 %v3252_v26, %s7216_s16 }
 0xb83   : > { %3258 = vrot.lane.b32.xlu0 %v3253_v28, %s7216_s16  ;;  %3232 = vrot.lane.b32.xlu1 %v3228_v29, %s5734_s18 }
 0xb87   : > { %3234 = vrot.lane.b32.xlu0 %v3229_v31, %s5734_s18  ;;  %3208 = vrot.lane.b32.xlu1 %v3204_v32, %s7209_s1 }
 0xb8b   : > { %3210 = vrot.lane.b32.xlu0 %v3205_v36, %s7209_s1  ;;  %3386 = vrot.lane.b32.xlu1 %v3382_v37, %s7211_s2  ;;  %s7258_s1 = smov 125  }
 0xb8f   : > { %3388 = vrot.lane.b32.xlu0 %v3383_v34, %s7211_s2  ;;  %3428 = vperm.xlu1 %5589, %v3424_v35   ;;  %s7259_s2 = smov 124  }
 0xb93   : > { %3433 = vperm.xlu0 %5588, %v3425_v38   ;;  %3678 = vrot.lane.b32.xlu1 %v6542_v44, %s5734_s18 }
 0xb97   : > { %3655 = vrot.lane.b32.xlu0 %v6539_v41, %s7216_s16  ;;  %3632 = vrot.lane.b32.xlu1 %v6552_v43, %s7218_s11 }
 0xb9b   : > { %3598 = vrot.lane.b32.xlu0 %v6549_v47, %s7214_s28  ;;  %3575 = vrot.lane.b32.xlu1 %v6563_v49, %s7258_s1 }
 0xb9f   : > { %3552 = vrot.lane.b32.xlu0 %v6560_v45, %s7259_s2  ;;  %3529 = vrot.lane.b32.xlu1 %v6573_v51, %s7260_s0 }
 0xba3   : > { %3701 = vrot.lane.b32.xlu0 %v6570_v50, %s7261_s4 }
 0xbe1   : > { %v3363_v40 = vpop.permute.xlu1 %3362 }
 0xbe2   : > { %3369 = vst.msk [vmem:[#allocation4 + $0xe0] sm:$0xff] %vm3368_vm12, %v3363_v40 }
 0xbe5   : > { %v3365_v4 = vpop.permute.xlu0 %3364  ;;  %v3339_v5 = vpop.permute.xlu1 %3338 }
 0xbe6   : > { %3370 = vst.msk [vmem:[#allocation4 + $0xf0] sm:$0xff] %vm3368_vm12, %v3365_v4 }
 0xbe7   : > { %3345 = vst.msk [vmem:[#allocation4 + $0xc0] sm:$0xff] %vm3344_vm13, %v3339_v5 }
 0xbe9   : > { %v3341_v46 = vpop.permute.xlu0 %3340  ;;  %v3316_v41 = vpop.permute.xlu1 %3315  ;;  %v3411_v44 = vld [vmem:[#allocation4 + $0xe0] sm:$0xff] }
 0xbea   : > { %3346 = vst.msk [vmem:[#allocation4 + $0xd0] sm:$0xff] %vm3344_vm13, %v3341_v46 }
 0xbeb   : > { %3321 = vst.msk [vmem:[#allocation4 + $0xa0] sm:$0xff] %vm1246_vm4, %v3316_v41 }
 0xbec   : > { %3517 = vst.msk [vmem:[#allocation4 + $0xe0] sm:$0xff] %vm1208_vm0, %v5723_v42 }
 0xbed   : > { %v3318_v47 = vpop.permute.xlu0 %3317  ;;  %v3412_v43 = vld [vmem:[#allocation4 + $0xf0] sm:$0xff]  ;;  %v3281_v45 = vpop.permute.xlu1 %3280 }
 0xbee   : > { %3322 = vst.msk [vmem:[#allocation4 + $0xb0] sm:$0xff] %vm1246_vm4, %v3318_v47  ;;  %v3422_v49 = vpack.c.bf16 %v3412_v43, %v3411_v44  ;;  %v3409_v50 = vld [vmem:[#allocation4 + $0xc0] sm:$0xff] }
 0xbef   : > { %3518 = vst.msk [vmem:[#allocation4 + $0xf0] sm:$0xff] %vm1208_vm0, %v5723_v42  ;;  %3515 = vst.msk [vmem:[#allocation4 + $0xc0] sm:$0xff] %vm1208_vm0, %v5723_v42 }
 0xbf0   : > { %3287 = vst.msk [vmem:[#allocation4 + $0x60] sm:$0xff] %vm3286_vm5, %v3281_v45  ;;  %3449 = vmatpush1.bf16.msra.mxu1 %v3422_v49 }
 0xbf1   : > { %v3283_v51 = vpop.permute.xlu0 %3282  ;;  %3450 = vmatprep.subr.bf16.mxu1 %v5724_v48  ;;  %v3410_v52 = vld [vmem:[#allocation4 + $0xd0] sm:$0xff]  ;;  %v3257_v53 = vpop.permute.xlu1 %3256 }
 0xbf2   : > { %3288 = vst.msk [vmem:[#allocation4 + $0x70] sm:$0xff] %vm3286_vm5, %v3283_v51  ;;  %v3421_v55 = vpack.c.bf16 %v3410_v52, %v3409_v50  ;;  %v3407_v54 = vld [vmem:[#allocation4 + $0xa0] sm:$0xff] }
 0xbf3   : > { %3516 = vst.msk [vmem:[#allocation4 + $0xd0] sm:$0xff] %vm1208_vm0, %v5723_v42  ;;  %3513 = vst.msk [vmem:[#allocation4 + $0xa0] sm:$0xff] %vm1208_vm0, %v5723_v42 }
 0xbf4   : > { %3263 = vst.msk [vmem:[#allocation4 + $0x40] sm:$0xff] %vm3262_vm7, %v3257_v53  ;;  %3451 = vmatpush1.bf16.msra.mxu1 %v3421_v55 }
 0xbf5   : > { %v3259_v18 = vpop.permute.xlu0 %3258  ;;  %3452 = vmatprep.subr.bf16.mxu1 %v5724_v48  ;;  %v3408_v15 = vld [vmem:[#allocation4 + $0xb0] sm:$0xff]  ;;  %v3233_v56 = vpop.permute.xlu1 %3232 }
 0xbf6   : > { %3264 = vst.msk [vmem:[#allocation4 + $0x50] sm:$0xff] %vm3262_vm7, %v3259_v18  ;;  %v3420_v57 = vpack.c.bf16 %v3408_v15, %v3407_v54 }
 0xbf7   : > { %3514 = vst.msk [vmem:[#allocation4 + $0xb0] sm:$0xff] %vm1208_vm0, %v5723_v42  ;;  %v3403_v58 = vld [vmem:[#allocation4 + $0x60] sm:$0xff] }
 0xbf8   : > { %3239 = vst.msk [vmem:[#allocation4 + $0x20] sm:$0xff] %vm3238_vm8, %v3233_v56  ;;  %3453 = vmatpush1.bf16.msra.mxu1 %v3420_v57 }
 0xbf9   : > { %3509 = vst.msk [vmem:[#allocation4 + $0x60] sm:$0xff] %vm1208_vm0, %v5723_v42  ;;  %v3235_v59 = vpop.permute.xlu0 %3234  ;;  %3454 = vmatprep.subr.bf16.mxu1 %v5724_v48  ;;  %v3404_v60 = vld [vmem:[#allocation4 + $0x70] sm:$0xff]  ;;  %v3209_v61 = vpop.permute.xlu1 %3208 }
 0xbfa   : > { %3240 = vst.msk [vmem:[#allocation4 + $0x30] sm:$0xff] %vm3238_vm8, %v3235_v59  ;;  %v3418_v3 = vpack.c.bf16 %v3404_v60, %v3403_v58 }
 0xbfb   : > { %3510 = vst.msk [vmem:[#allocation4 + $0x70] sm:$0xff] %vm1208_vm0, %v5723_v42  ;;  %v3401_v62 = vld [vmem:[#allocation4 + $0x40] sm:$0xff] }
 0xbfc   : > { %3215 = vst.msk [vmem:[#allocation4] sm:$0xff] %vm3214_vm9, %v3209_v61  ;;  %3455 = vmatpush1.bf16.msra.mxu1 %v3419_v25 }
 0xbfd   : > { %3507 = vst.msk [vmem:[#allocation4 + $0x40] sm:$0xff] %vm1208_vm0, %v5723_v42  ;;  %v3211_v63 = vpop.permute.xlu0 %3210  ;;  %3456 = vmatprep.subr.bf16.mxu1 %v5724_v48  ;;  %v3402_v0 = vld [vmem:[#allocation4 + $0x50] sm:$0xff]  ;;  %v3387_v1 = vpop.permute.xlu1 %3386 }
 0xbfe   : > { %3216 = vst.msk [vmem:[#allocation4 + $0x10] sm:$0xff] %vm3214_vm9, %v3211_v63  ;;  %v3417_v9 = vpack.c.bf16 %v3402_v0, %v3401_v62 }
 0xbff   : > { %3508 = vst.msk [vmem:[#allocation4 + $0x50] sm:$0xff] %vm1208_vm0, %v5723_v42  ;;  %v3399_v6 = vld [vmem:[#allocation4 + $0x20] sm:$0xff] }
 0xc00   : > { %3393 = vst.msk [vmem:[#allocation4 + $0x100] sm:$0xff] %vm3392_vm10, %v3387_v1  ;;  %3457 = vmatpush1.bf16.msra.mxu1 %v3418_v3 }
 0xc01   : > { %3505 = vst.msk [vmem:[#allocation4 + $0x20] sm:$0xff] %vm1208_vm0, %v5723_v42  ;;  %v3389_v7 = vpop.permute.xlu0 %3388  ;;  %3458 = vmatprep.subr.bf16.mxu1 %v5724_v48  ;;  %v3400_v8 = vld [vmem:[#allocation4 + $0x30] sm:$0xff] }
 0xc02   : > { %3394 = vst.msk [vmem:[#allocation4 + $0x110] sm:$0xff] %vm3392_vm10, %v3389_v7  ;;  %v3416_v12 = vpack.c.bf16 %v3400_v8, %v3399_v6  ;;  %v5615_v8 = vld [vmem:[%s7264_s5 + $0x4] ss:$8 sps:$4 sm:$0xff]  }
 0xc03   : > { %3506 = vst.msk [vmem:[#allocation4 + $0x30] sm:$0xff] %vm1208_vm0, %v5723_v42  ;;  %v3397_v10 = vld [vmem:[#allocation4] sm:$0xff]  ;;  %5320 = vmatprep.mubr.msk.bf16.mxu0 %vm1208_vm0, %v5615_v8 }
 0xc04   : > { %3503 = vst.msk [vmem:[#allocation4] sm:$0xff] %vm1208_vm0, %v5723_v42  ;;  %3459 = vmatpush1.bf16.msra.mxu1 %v3417_v9 }
 0xc05   : > { %3460 = vmatprep.subr.bf16.mxu1 %v5724_v48  ;;  %v3398_v11 = vld [vmem:[#allocation4 + $0x10] sm:$0xff] }
 0xc06   : > { %3504 = vst.msk [vmem:[#allocation4 + $0x10] sm:$0xff] %vm1208_vm0, %v5723_v42  ;;  %v3415_v16 = vpack.c.bf16 %v3398_v11, %v3397_v10 }
 0xc07   : > { %v3413_v13 = vld [vmem:[#allocation4 + $0x100] sm:$0xff] }
 0xc08   : > { %3519 = vst.msk [vmem:[#allocation4 + $0x100] sm:$0xff] %vm1208_vm0, %v5723_v42  ;;  %3461 = vmatpush1.bf16.msra.mxu1 %v3416_v12 }
 0xc09   : > { %3462 = vmatprep.subr.bf16.mxu1 %v5724_v48  ;;  %v3414_v14 = vld [vmem:[#allocation4 + $0x110] sm:$0xff] }
 0xc0a   : > { %3520 = vst.msk [vmem:[#allocation4 + $0x110] sm:$0xff] %vm1208_vm0, %v5723_v42  ;;  %v3423_v17 = vpack.c.bf16 %v3414_v14, %v3413_v13  ;;  %v3429_v20 = vpop.permute.xlu1 %3428 }
 0xc0c   : > { %3463 = vmatpush1.bf16.msra.mxu1 %v3415_v16 }
 0xc0d   : > { %3478 = vmatprep.subr.bf16.mxu1 %v5724_v48 }
 0xc0e   : > { %v3434_v25 = vpop.permute.xlu0 %3433  ;;  %v3679_v39 = vpop.permute.xlu1 %3678 }
 0xc10   : > { %3479 = vmatpush2.bf16.msra.mxu1 %v3423_v17 }
 0xc12   : > { %v3656_v46 = vpop.permute.xlu0 %3655  ;;  %v3633_v43 = vpop.permute.xlu1 %3632 }
 0xc13   : > { %3481 = vmatmul.mubr.bf16.vlgmr.msra.gmra.mxu1 %v5614_v19 }
 0xc16   : > { %v3576_v54 = vpop.permute.xlu1 %3575 }
 0xc1a   : > { %v3530_v59 = vpop.permute.xlu1 %3529 }
 0xcd3   : > { %v3482_v21 = vpop.f32.mrf.mxu1 }
 0xcd4   : > { %v3483_v22 = vadd.f32 %v3482_v21, %v3429_v20 }
 0xcd5   : > { %v3484_v23 = vpop.f32.mrf.mxu1 }
 0xcd6   : > { %v3491_v24 = vmin.f32 %v3483_v22, 0.0  ;;  %vm3489_vm14 = vcmp.gt.f32.partialorder %v3483_v22, 0.0 }
 0xcd7   : > { %v3485_v26 = vpop.f32.mrf.mxu1 }
 0xcd8   : > { %v3493_v27 = vmul.f32 1.442695, %v3491_v24  ;;  %v3486_v28 = vadd.f32 %v3485_v26, %v3434_v25 }
 0xcd9   : > { %v3487_v29 = vpop.f32.mrf.mxu1 }
 0xcda   : > { %5650 = vpow2.f32 %v3493_v27  ;;  %v3492_v30 = vmin.f32 %v3486_v28, 0.0  ;;  %vm3490_vm1 = vcmp.gt.f32.partialorder %v3486_v28, 0.0 }
 0xcdc   : > { %v3495_v31 = vmul.f32 1.442695, %v3492_v30 }
 0xcde   : > { %5652 = vpow2.f32 %v3495_v31 }
 0xce7   : > { %v5651_v32 = vpop.eup %5650 }
 0xce8   : > { %v5307_v33 = vadd.f32 -1.0, %v5651_v32 }
 0xcea   : > { %v3499_v36 = vsel %vm3489_vm14, %v3483_v22, %v5307_v33 }
 0xceb   : > { %v5653_v37 = vpop.eup %5652  ;;  %3501 = vst.msk [vmem:[#allocation2] sm:$0xff] %vm1208_vm0, %v3499_v36 }
 0xcec   : > { %v5308_v34 = vadd.f32 -1.0, %v5653_v37 }
 0xcee   : > { %v3500_v35 = vsel %vm3490_vm1, %v3486_v28, %v5308_v34 }
 0xcef   : > { %3502 = vst.msk [vmem:[#allocation2 + $0x10] sm:$0xff] %vm1208_vm0, %v3500_v35 }
 0xcf2   : > { %v3613_v38 = vld [vmem:[#allocation2] sm:$0xff] }
 0xcf3   : > { %v3620_v40 = vmul.f32 %v6585_v2, %v3613_v38  ;;  %v3681_v4 = vmul.f32 %v3679_v39, %v3613_v38  ;;  %v3658_v44 = vmul.f32 %v3656_v46, %v3613_v38  ;;  %v3635_v49 = vmul.f32 %v3633_v43, %v3613_v38 }
 0xcf4   : > { %v3578_v15 = vmul.f32 %v3613_v38, %v3576_v54  ;;  %v3532_v61 = vmul.f32 %v3613_v38, %v3530_v59 }
 0xcf5   : > { %3622 = vst.msk [vmem:[#allocation4 + $0x80] sm:$0xff] %vm1208_vm0, %v3620_v40  ;;  %3685 = vrot.lane.b32.xlu1 %v3681_v4, %s7259_s2 }
 0xcf6   : > { %v3614_v5 = vld [vmem:[#allocation2 + $0x10] sm:$0xff] }
 0xcf7   : > { %v3621_v41 = vmul.f32 %v6585_v2, %v3614_v5  ;;  %v3682_v47 = vmul.f32 %v3679_v39, %v3614_v5  ;;  %v3659_v45 = vmul.f32 %v3656_v46, %v3614_v5  ;;  %v3599_v2 = vpop.permute.xlu0 %3598  ;;  %v3636_v52 = vmul.f32 %v3633_v43, %v3614_v5 }
 0xcf8   : > { %v3601_v51 = vmul.f32 %v3613_v38, %v3599_v2  ;;  %v3602_v18 = vmul.f32 %v3614_v5, %v3599_v2  ;;  %v3579_v58 = vmul.f32 %v3614_v5, %v3576_v54  ;;  %v3533_v0 = vmul.f32 %v3614_v5, %v3530_v59 }
 0xcf9   : > { %3623 = vst.msk [vmem:[#allocation4 + $0x90] sm:$0xff] %vm1208_vm0, %v3621_v41  ;;  %3687 = vrot.lane.b32.xlu0 %v3682_v47, %s7259_s2  ;;  %3662 = vrot.lane.b32.xlu1 %v3658_v44, %s7258_s1  ;;  %s7262_s2 = sld [smem:[#allocation19_spill]] }
 0xcfb   : > { %v3553_v56 = vpop.permute.xlu0 %3552 }
 0xcfc   : > { %v6724_v50 = vld [vmem:[#allocation4 + $0x80] sm:$0xff]  ;;  %v3555_v57 = vmul.f32 %v3613_v38, %v3553_v56  ;;  %v3556_v60 = vmul.f32 %v3614_v5, %v3553_v56 }
 0xcfd   : > { %3664 = vrot.lane.b32.xlu0 %v3659_v45, %s7258_s1  ;;  %3639 = vrot.lane.b32.xlu1 %v3635_v49, %s7214_s28  ;;  %3992 = vst.msk [vmem:[#allocation4 + $0x80] sm:$0xff] %vm3980_vm11, %v5723_v42 }
 0xcff   : > { %v3702_v62 = vpop.permute.xlu0 %3701  ;;  %v3745_v1 = vld [vmem:[%s7262_s2] sm:$0xff]  ;;  %v3746_v6 = vld [vmem:[%s7262_s2 + $0x8] sm:$0xff]  ;;  %s7222_s2 = smov 2  }
 0xd00   : > { %v6730_v53 = vld [vmem:[#allocation4 + $0x90] sm:$0xff]  ;;  %v3704_v63 = vmul.f32 %v3702_v62, %v3613_v38  ;;  %v3705_v3 = vmul.f32 %v3702_v62, %v3614_v5 }
 0xd01   : > { %3641 = vrot.lane.b32.xlu0 %v3636_v52, %s7214_s28  ;;  %3605 = vrot.lane.b32.xlu1 %v3601_v51, %s7218_s11  ;;  %v3740_v55 = vpack.c.bf16 %v6730_v53, %v6724_v50  ;;  %3993 = vst.msk [vmem:[#allocation4 + $0x90] sm:$0xff] %vm3980_vm11, %v5723_v42  ;;  %s7263_s28 = sld [smem:[#allocation21_spill]]  ;;  %v5617_v52 = vld [vmem:[%s7264_s5] ss:$8 sps:$4 sm:$0xff]  }
 0xd02   : > { %s7272_s5 = sld [smem:[#allocation22_spill]] }
 0xd05   : > { %3607 = vrot.lane.b32.xlu0 %v3602_v18, %s7218_s11  ;;  %3582 = vrot.lane.b32.xlu1 %v3578_v15, %s7216_s16 }
 0xd07   : > { %v3830_v7 = vld [vmem:[%s7263_s28] sm:$0xff]  ;;  %v3831_v9 = vld [vmem:[%s7263_s28 + $0x8] sm:$0xff]  ;;  %v3832_v10 = vld [vmem:[%s7263_s28 + $0x10] sm:$0xff] }
 0xd09   : > { %3584 = vrot.lane.b32.xlu0 %v3579_v58, %s7216_s16  ;;  %3559 = vrot.lane.b32.xlu1 %v3555_v57, %s5734_s18  ;;  %s7268_s16 = smov 127  }
 0xd0d   : > { %3561 = vrot.lane.b32.xlu0 %v3556_v60, %s5734_s18  ;;  %3536 = vrot.lane.b32.xlu1 %v3532_v61, %s7261_s4  ;;  %s7267_s18 = sld [smem:[#allocation9_spill]] }
 0xd11   : > { %3538 = vrot.lane.b32.xlu0 %v3533_v0, %s7261_s4  ;;  %3708 = vrot.lane.b32.xlu1 %v3704_v63, %s7260_s0  ;;  %s7265_s4 = sld [smem:[#allocation20_spill]] }
 0xd15   : > { %3710 = vrot.lane.b32.xlu0 %v3705_v3, %s7260_s0  ;;  %3749 = vperm.xlu1 %5589, %v3745_v1   ;;  %s7266_s0 = sld [smem:[#allocation8_spill]] }
 0xd17   : > { %v5618_v53 = vld [vmem:[%s7265_s4] sm:$0xff]  }
 0xd18   : > { %5483 = vmatprep.mubr.msk.bf16.mxu1 %vm1208_vm0, %v5618_v53 }
 0xd19   : > { %3754 = vperm.xlu0 %5588, %v3746_v6   ;;  %3835 = vperm.xlu1 %5589, %v3830_v7  }
 0xd1d   : > { %3840 = vperm.xlu0 %5588, %v3831_v9   ;;  %3845 = vperm.xlu1 %5589, %v3832_v10  }
 0xd67   : > { %v3686_v11 = vpop.permute.xlu1 %3685 }
 0xd68   : > { %3691 = vst.msk [vmem:[#allocation4 + $0xe0] sm:$0xff] %vm3368_vm12, %v3686_v11 }
 0xd6b   : > { %v3688_v12 = vpop.permute.xlu0 %3687  ;;  %v3663_v13 = vpop.permute.xlu1 %3662 }
 0xd6c   : > { %3692 = vst.msk [vmem:[#allocation4 + $0xf0] sm:$0xff] %vm3368_vm12, %v3688_v12  ;;  %v5619_v12 = vld [vmem:[%s7265_s4 + $0x8] ss:$0 sps:$4 sm:$0xff]   ;;  %s7270_s4 = smov 1   ;;  %vm4100_vm12 = vcmask 31752  }
 0xd6d   : > { %3668 = vst.msk [vmem:[#allocation4 + $0xc0] sm:$0xff] %vm3344_vm13, %v3663_v13  ;;  %v5620_v13 = vld [vmem:[%s7266_s0] sm:$0xff]   ;;  %s5739_s0 = smov 126  }
 0xd6f   : > { %v3732_v14 = vld [vmem:[#allocation4 + $0xe0] sm:$0xff]  ;;  %v3665_v16 = vpop.permute.xlu0 %3664  ;;  %v3640_v17 = vpop.permute.xlu1 %3639 }
 0xd70   : > { %3998 = vst.msk [vmem:[#allocation4 + $0xe0] sm:$0xff] %vm3980_vm11, %v5723_v42 }
 0xd71   : > { %3669 = vst.msk [vmem:[#allocation4 + $0xd0] sm:$0xff] %vm3344_vm13, %v3665_v16  ;;  %v6827_v16 = vld [vmem:[%s7267_s18 + $0x3] ss:$0 sm:$0xff]  ;;  %vm4069_vm13 = vcmask 31760  }
 0xd72   : > { %3645 = vst.msk [vmem:[#allocation4 + $0xa0] sm:$0xff] %vm1246_vm4, %v3640_v17  ;;  %4113 = vrot.lane.b32.xlu1 %v6827_v16, %s7268_s16  ;;  %v6834_v17 = vld [vmem:[%s7267_s18 + $0x2] ss:$0 sm:$0xff] }
 0xd73   : > { %v3642_v20 = vpop.permute.xlu0 %3641  ;;  %v3606_v21 = vpop.permute.xlu1 %3605  ;;  %v3733_v22 = vld [vmem:[#allocation4 + $0xf0] sm:$0xff] }
 0xd74   : > { %v3730_v19 = vld [vmem:[#allocation4 + $0xc0] sm:$0xff]  ;;  %3646 = vst.msk [vmem:[#allocation4 + $0xb0] sm:$0xff] %vm1246_vm4, %v3642_v20  ;;  %v3743_v23 = vpack.c.bf16 %v3733_v22, %v3732_v14 }
 0xd75   : > { %3996 = vst.msk [vmem:[#allocation4 + $0xc0] sm:$0xff] %vm3980_vm11, %v5723_v42  ;;  %3999 = vst.msk [vmem:[#allocation4 + $0xf0] sm:$0xff] %vm3980_vm11, %v5723_v42  ;;  %v6824_v14 = vld [vmem:[%s7267_s18 + $0x5] ss:$0 sm:$0xff]  ;;  %v6844_v20 = vld [vmem:[%s7267_s18] ss:$0 sm:$0xff] }
 0xd76   : > { %3611 = vst.msk [vmem:[#allocation4 + $0x60] sm:$0xff] %vm3286_vm5, %v3606_v21  ;;  %3770 = vmatpush1.bf16.msra.mxu0 %v3743_v23  ;;  %4157 = vrot.lane.b32.xlu0 %v6824_v14, %s7218_s11  ;;  %v6847_v21 = vld [vmem:[%s7267_s18 + $0x8] ss:$0 sm:$0xff]  ;;  %s7269_s11 = smov 3   ;;  %v6854_v22 = vld [vmem:[%s7267_s18 + $0x7] ss:$0 sm:$0xff] }
 0xd77   : > { %v3608_v25 = vpop.permute.xlu0 %3607  ;;  %v3583_v26 = vpop.permute.xlu1 %3582  ;;  %3771 = vmatprep.subr.bf16.mxu0 %v5724_v48  ;;  %v6857_v23 = vld [vmem:[%s7267_s18 + $0x6] ss:$0 sm:$0xff] }
 0xd78   : > { %v3731_v24 = vld [vmem:[#allocation4 + $0xd0] sm:$0xff]  ;;  %3612 = vst.msk [vmem:[#allocation4 + $0x70] sm:$0xff] %vm3286_vm5, %v3608_v25  ;;  %vm4038_vm5 = vcmask 31768  }
 0xd79   : > { %v3728_v27 = vld [vmem:[#allocation4 + $0xa0] sm:$0xff]  ;;  %3997 = vst.msk [vmem:[#allocation4 + $0xd0] sm:$0xff] %vm3980_vm11, %v5723_v42  ;;  %v3742_v28 = vpack.c.bf16 %v3731_v24, %v3730_v19 }
 0xd7a   : > { %3588 = vst.msk [vmem:[#allocation4 + $0x40] sm:$0xff] %vm3262_vm7, %v3583_v26  ;;  %v6837_v19 = vld [vmem:[%s7267_s18 + $0x1] ss:$0 sm:$0xff]  ;;  %4082 = vrot.lane.b32.xlu0 %v6834_v17, %s7268_s16 }
 0xd7b   : > { %3994 = vst.msk [vmem:[#allocation4 + $0xa0] sm:$0xff] %vm3980_vm11, %v5723_v42  ;;  %3772 = vmatpush1.bf16.msra.mxu0 %v3742_v28  ;;  %v3585_v29 = vpop.permute.xlu0 %3584  ;;  %v3560_v30 = vpop.permute.xlu1 %3559  ;;  %v3729_v31 = vld [vmem:[#allocation4 + $0xb0] sm:$0xff]  ;;  %4051 = vrot.lane.b32.xlu1 %v6837_v19, %s5739_s0 }
 0xd7c   : > { %3773 = vmatprep.subr.bf16.mxu0 %v5724_v48  ;;  %3589 = vst.msk [vmem:[#allocation4 + $0x50] sm:$0xff] %vm3262_vm7, %v3585_v29  ;;  %v3741_v33 = vpack.c.bf16 %v3729_v31, %v3728_v27  ;;  %vm7274_vm7 = vcmask 7168  }
 0xd7d   : > { %v3724_v32 = vld [vmem:[#allocation4 + $0x60] sm:$0xff]  ;;  %3565 = vst.msk [vmem:[#allocation4 + $0x20] sm:$0xff] %vm3238_vm8, %v3560_v30 }
 0xd7e   : > { %3995 = vst.msk [vmem:[#allocation4 + $0xb0] sm:$0xff] %vm3980_vm11, %v5723_v42  ;;  %3990 = vst.msk [vmem:[#allocation4 + $0x60] sm:$0xff] %vm3980_vm11, %v5723_v42  ;;  %4020 = vrot.lane.b32.xlu0 %v6844_v20, %s7258_s1 }
 0xd7f   : > { %3774 = vmatpush1.bf16.msra.mxu0 %v3741_v33  ;;  %v3562_v36 = vpop.permute.xlu0 %3561  ;;  %v3537_v37 = vpop.permute.xlu1 %3536  ;;  %v3725_v34 = vld [vmem:[#allocation4 + $0x70] sm:$0xff]  ;;  %4249 = vrot.lane.b32.xlu1 %v6847_v21, %s7269_s11 }
 0xd80   : > { %3775 = vmatprep.subr.bf16.mxu0 %v5724_v48  ;;  %3566 = vst.msk [vmem:[#allocation4 + $0x30] sm:$0xff] %vm3238_vm8, %v3562_v36  ;;  %v3739_v5 = vpack.c.bf16 %v3725_v34, %v3724_v32  ;;  %vm7275_vm8 = vmmov %vm7274_vm7 }
 0xd81   : > { %v3722_v35 = vld [vmem:[#allocation4 + $0x40] sm:$0xff]  ;;  %3542 = vst.msk [vmem:[#allocation4] sm:$0xff] %vm3214_vm9, %v3537_v37 }
 0xd82   : > { %3991 = vst.msk [vmem:[#allocation4 + $0x70] sm:$0xff] %vm3980_vm11, %v5723_v42  ;;  %3988 = vst.msk [vmem:[#allocation4 + $0x40] sm:$0xff] %vm3980_vm11, %v5723_v42  ;;  %4218 = vrot.lane.b32.xlu0 %v6854_v22, %s7222_s2 }
 0xd83   : > { %3776 = vmatpush1.bf16.msra.mxu0 %v3740_v55  ;;  %v3539_v38 = vpop.permute.xlu0 %3538  ;;  %v3709_v39 = vpop.permute.xlu1 %3708  ;;  %v3723_v40 = vld [vmem:[#allocation4 + $0x50] sm:$0xff]  ;;  %4188 = vrot.lane.b32.xlu1 %v6857_v23, %s7270_s4 }
 0xd84   : > { %3777 = vmatprep.subr.bf16.mxu0 %v5724_v48  ;;  %v3720_v4 = vld [vmem:[#allocation4 + $0x20] sm:$0xff]  ;;  %3543 = vst.msk [vmem:[#allocation4 + $0x10] sm:$0xff] %vm3214_vm9, %v3539_v38  ;;  %v3738_v47 = vpack.c.bf16 %v3723_v40, %v3722_v35  ;;  %vm4236_vm9 = vcmask 15360  }
 0xd85   : > { %3714 = vst.msk [vmem:[#allocation4 + $0x100] sm:$0xff] %vm3392_vm10, %v3709_v39 }
 0xd86   : > { %3989 = vst.msk [vmem:[#allocation4 + $0x50] sm:$0xff] %vm3980_vm11, %v5723_v42  ;;  %3986 = vst.msk [vmem:[#allocation4 + $0x20] sm:$0xff] %vm3980_vm11, %v5723_v42 }
 0xd87   : > { %3778 = vmatpush1.bf16.msra.mxu0 %v3739_v5  ;;  %v3711_v46 = vpop.permute.xlu0 %3710  ;;  %v3721_v41 = vld [vmem:[#allocation4 + $0x30] sm:$0xff] }
 0xd88   : > { %3779 = vmatprep.subr.bf16.mxu0 %v5724_v48  ;;  %v3718_v44 = vld [vmem:[#allocation4] sm:$0xff]  ;;  %3715 = vst.msk [vmem:[#allocation4 + $0x110] sm:$0xff] %vm3392_vm10, %v3711_v46  ;;  %v3737_v49 = vpack.c.bf16 %v3721_v41, %v3720_v4  ;;  %vm7276_vm10 = vmmov %vm7274_vm7 }
 0xd89   : > { %3987 = vst.msk [vmem:[#allocation4 + $0x30] sm:$0xff] %vm3980_vm11, %v5723_v42  ;;  %3984 = vst.msk [vmem:[#allocation4] sm:$0xff] %vm3980_vm11, %v5723_v42 }
 0xd8b   : > { %3780 = vmatpush1.bf16.msra.mxu0 %v3738_v47  ;;  %v3719_v43 = vld [vmem:[#allocation4 + $0x10] sm:$0xff] }
 0xd8c   : > { %3781 = vmatprep.subr.bf16.mxu0 %v5724_v48  ;;  %v3734_v45 = vld [vmem:[#allocation4 + $0x100] sm:$0xff]  ;;  %3985 = vst.msk [vmem:[#allocation4 + $0x10] sm:$0xff] %vm3980_vm11, %v5723_v42  ;;  %v3736_v2 = vpack.c.bf16 %v3719_v43, %v3718_v44 }
 0xd8d   : > { %4000 = vst.msk [vmem:[#allocation4 + $0x100] sm:$0xff] %vm3980_vm11, %v5723_v42  ;;  %v6876_v44 = vld [vmem:[%s7267_s18 + $0x4] ss:$0 sm:$0xff] }
 0xd8f   : > { %3782 = vmatpush1.bf16.msra.mxu0 %v3737_v49  ;;  %v3735_v50 = vld [vmem:[#allocation4 + $0x110] sm:$0xff] }
 0xd90   : > { %3783 = vmatprep.subr.bf16.mxu0 %v5724_v48  ;;  %4001 = vst.msk [vmem:[#allocation4 + $0x110] sm:$0xff] %vm3980_vm11, %v5723_v42  ;;  %v3744_v51 = vpack.c.bf16 %v3735_v50, %v3734_v45  ;;  %v3750_v55 = vpop.permute.xlu1 %3749 }
 0xd93   : > { %3784 = vmatpush1.bf16.msra.mxu0 %v3736_v2 }
 0xd94   : > { %3799 = vmatprep.subr.bf16.mxu0 %v5724_v48  ;;  %v3755_v57 = vpop.permute.xlu0 %3754  ;;  %v3836_v24 = vpop.permute.xlu1 %3835 }
 0xd97   : > { %3800 = vmatpush2.bf16.msra.mxu0 %v3744_v51 }
 0xd98   : > { %4357 = vmatprep.subr.bf16.mxu0 %v5724_v48  ;;  %v3846_v25 = vpop.permute.xlu1 %3845  ;;  %v3841_v31 = vpop.permute.xlu0 %3840 }
 0xd9a   : > { %3802 = vmatmul.mubr.bf16.vlgmr.msra.gmra.mxu0 %v5617_v52 }
 0xde4   : > { %v4114_v50 = vpop.permute.xlu1 %4113 }
 0xde8   : > { %v6878_v47 = vpop.permute.xlu0 %4157 }
 0xe5a   : > { %v3803_v54 = vpop.f32.mrf.mxu0 }
 0xe5b   : > { %v3804_v18 = vadd.f32 %v3803_v54, %v3750_v55  ;;  %v4083_v55 = vpop.permute.xlu0 %4082 }
 0xe5c   : > { %v3805_v15 = vpop.f32.mrf.mxu0 }
 0xe5d   : > { %v3812_v56 = vmin.f32 %v3804_v18, 0.0  ;;  %vm3810_vm4 = vcmp.gt.f32.partialorder %v3804_v18, 0.0 }
 0xe5e   : > { %v3806_v58 = vpop.f32.mrf.mxu0 }
 0xe5f   : > { %v3814_v59 = vmul.f32 1.442695, %v3812_v56  ;;  %v3807_v60 = vadd.f32 %v3806_v58, %v3755_v57 }
 0xe60   : > { %v3808_v61 = vpop.f32.mrf.mxu0 }
 0xe61   : > { %5654 = vpow2.f32 %v3814_v59  ;;  %v3813_v62 = vmin.f32 %v3807_v60, 0.0  ;;  %vm3811_vm2 = vcmp.gt.f32.partialorder %v3807_v60, 0.0  ;;  %v4052_v59 = vpop.permute.xlu1 %4051 }
 0xe63   : > { %v3816_v63 = vmul.f32 1.442695, %v3813_v62 }
 0xe65   : > { %5656 = vpow2.f32 %v3816_v63 }
 0xe6e   : > { %v5655_v0 = vpop.eup %5654 }
 0xe6f   : > { %v5321_v1 = vadd.f32 -1.0, %v5655_v0  ;;  %v4021_v0 = vpop.permute.xlu0 %4020 }
 0xe71   : > { %v3820_v3 = vsel %vm3810_vm4, %v3804_v18, %v5321_v1 }
 0xe72   : > { %v5657_v6 = vpop.eup %5656  ;;  %3822 = vst.msk [vmem:[#allocation3] sm:$0xff] %vm1208_vm0, %v3820_v3 }
 0xe73   : > { %v5322_v7 = vadd.f32 -1.0, %v5657_v6 }
 0xe75   : > { %v3821_v8 = vsel %vm3811_vm2, %v3807_v60, %v5322_v7  ;;  %vm7279_vm2 = vmmov %vm7274_vm7 }
 0xe76   : > { %3823 = vst.msk [vmem:[#allocation3 + $0x10] sm:$0xff] %vm1208_vm0, %v3821_v8  ;;  %v4250_v8 = vpop.permute.xlu1 %4249 }
 0xe79   : > { %v3827_v9 = vld [vmem:[#allocation3] sm:$0xff] }
 0xe7d   : > { %v3828_v10 = vld [vmem:[#allocation3 + $0x10] sm:$0xff] }
 0xe7e   : > { %v3829_v11 = vpack.c.bf16 %v3828_v10, %v3827_v9 }
 0xe80   : > { %5481 = vmatprep.subr.bf16.mxu1 %v3829_v11 }
 0xe81   : > { %5482 = vmatpush3.bf16.msra.mxu1 %v3829_v11  ;;  %v4219_v11 = vpop.permute.xlu0 %4218 }
 0xe82   : > { %5487 = vmatprep.subr.bf16.mxu1 %v5620_v13 }
 0xe84   : > { %5484 = vmatmul.mubr.msk.bf16.vlgmr.msra.gmra.mxu1 %vm1208_vm0, %v5619_v12 }
 0xe85   : > { %5488 = vmatpush3.bf16.msra.mxu1 %v5620_v13 }
 0xe86   : > { %4793 = vmatprep.subr.bf16.mxu1 %v5724_v48 }
 0xf44   : > { %v5485_v26 = vpop.f32.mrf.mxu1 }
 0xf45   : > { %v3905_v27 = vadd.f32 %v5485_v26, %v3846_v25 }
 0xf46   : > { %v3896_v28 = vpop.f32.mrf.mxu1 }
 0xf47   : > { %3912 = vst.msk [vmem:[#allocation2 + $0x20] sm:$0xff] %vm1208_vm0, %v3905_v27  ;;  %v3897_v29 = vadd.f32 %v3896_v28, %v3836_v24  ;;  %v4189_v24 = vpop.permute.xlu1 %4188 }
 0xf48   : > { %v5486_v30 = vpop.f32.mrf.mxu1 }
 0xf49   : > { %3910 = vst.msk [vmem:[#allocation2] sm:$0xff] %vm1208_vm0, %v3897_v29 }
 0xf4a   : > { %v3899_v32 = vpop.f32.mrf.mxu1 }
 0xf4b   : > { %v3900_v33 = vadd.f32 %v3899_v32, %v3841_v31 }
 0xf4d   : > { %3911 = vst.msk [vmem:[#allocation2 + $0x10] sm:$0xff] %vm1208_vm0, %v3900_v33 }
 0xf4e   : > { %v3915_v36 = vld [vmem:[#allocation2 + $0x20] sm:$0xff] }
 0xf4f   : > { %v3917_v38 = vpack.c.bf16 %v3915_v36, %v3915_v36 }
 0xf50   : > { %v3913_v37 = vld [vmem:[#allocation2] sm:$0xff] }
 0xf54   : > { %v3914_v34 = vld [vmem:[#allocation2 + $0x10] sm:$0xff] }
 0xf55   : > { %v3916_v35 = vpack.c.bf16 %v3914_v34, %v3913_v37  ;;  %v5621_v37 = vld [vmem:[%s7272_s5 + $0x4] ss:$8 sps:$4 sm:$0xff]  }
 0xf57   : > { %5489 = vmatprep.mubr.msk.bf16.mxu1 %vm1208_vm0, %v3916_v35 }
 0xf58   : > { %5490 = vmatmul.mubr.msk.bf16.vlgmr.msra.gmra.mxu1 %vm1208_vm0, %v3917_v38  ;;  %vm4347_vm0 = vcmask 719872  }
 0xf59   : > { %5343 = vmatprep.mubr.msk.bf16.mxu0 %vm4347_vm0, %v5621_v37 }
0x1018   : > { %v5491_v39 = vpop.f32.mrf.mxu1 }
0x1019   : > { %3983 = vst.msk [vmem:[#allocation3 + $0x20] sm:$0xff] %vm3980_vm11, %v5491_v39 }
0x101a   : > { %v3966_v40 = vpop.f32.mrf.mxu1 }
0x101b   : > { %3981 = vst.msk [vmem:[#allocation3] sm:$0xff] %vm3980_vm11, %v3966_v40 }
0x101c   : > { %v5492_v4 = vpop.f32.mrf.mxu1 }
0x101e   : > { %v3969_v5 = vpop.f32.mrf.mxu1 }
0x101f   : > { %3982 = vst.msk [vmem:[#allocation3 + $0x10] sm:$0xff] %vm3980_vm11, %v3969_v5 }
0x1020   : > { %v6871_v46 = vld [vmem:[#allocation3 + $0x20] sm:$0xff] }
0x1021   : > { %v4144_v45 = vmul.f32 %v6876_v44, %v6871_v46  ;;  %v4118_v52 = vmul.f32 %v4114_v50, %v6871_v46  ;;  %v4087_v54 = vmul.f32 %v4083_v55, %v6871_v46  ;;  %v4056_v63 = vmul.f32 %v4052_v59, %v6871_v46 }
0x1022   : > { %v6873_v41 = vld [vmem:[#allocation3] sm:$0xff]  ;;  %v4025_v1 = vmul.f32 %v6871_v46, %v4021_v0  ;;  %v4254_v9 = vmul.f32 %v4250_v8, %v6871_v46  ;;  %v4223_v25 = vmul.f32 %v4219_v11, %v6871_v46  ;;  %v4193_v26 = vmul.f32 %v4189_v24, %v6871_v46 }
0x1023   : > { %v4160_v43 = vmul.f32 %v6878_v47, %v6873_v41  ;;  %v4142_v49 = vmul.f32 %v6876_v44, %v6873_v41  ;;  %4147 = vst.msk [vmem:[#allocation4 + $0xe0] sm:$0xff] %vm3980_vm11, %v4144_v45  ;;  %v4116_v18 = vmul.f32 %v4114_v50, %v6873_v41  ;;  %v4085_v57 = vmul.f32 %v4083_v55, %v6873_v41 }
0x1024   : > { %v4054_v3 = vmul.f32 %v4052_v59, %v6873_v41  ;;  %v4023_v6 = vmul.f32 %v4021_v0, %v6873_v41  ;;  %v4252_v10 = vmul.f32 %v4250_v8, %v6873_v41  ;;  %v4221_v27 = vmul.f32 %v4219_v11, %v6873_v41 }
0x1025   : > { %4166 = vrot.lane.b32.xlu0 %v4160_v43, %s7268_s16  ;;  %4145 = vst.msk [vmem:[#allocation4 + $0xc0] sm:$0xff] %vm3980_vm11, %v4142_v49  ;;  %v4191_v28 = vmul.f32 %v4189_v24, %v6873_v41  ;;  %v4162_v31 = vmul.f32 %v6878_v47, %v6871_v46 }
0x1026   : > { %v4210_v2 = vld [vmem:[#allocation3 + $0x10] sm:$0xff] }
0x1027   : > { %v4117_v51 = vmul.f32 %v4210_v2, %v4114_v50  ;;  %v4143_v53 = vmul.f32 %v6876_v44, %v4210_v2  ;;  %v4086_v58 = vmul.f32 %v4210_v2, %v4083_v55  ;;  %v4055_v61 = vmul.f32 %v4210_v2, %v4052_v59 }
0x1028   : > { %v4024_v7 = vmul.f32 %v4210_v2, %v4021_v0  ;;  %v4253_v12 = vmul.f32 %v4250_v8, %v4210_v2  ;;  %v4222_v13 = vmul.f32 %v4219_v11, %v4210_v2  ;;  %v4192_v29 = vmul.f32 %v4210_v2, %v4189_v24 }
0x1029   : > { %4124 = vrot.lane.b32.xlu1 %v4117_v51, %s7270_s4  ;;  %4126 = vrot.lane.b32.xlu0 %v4118_v52, %s7270_s4  ;;  %4146 = vst.msk [vmem:[#allocation4 + $0xd0] sm:$0xff] %vm3980_vm11, %v4143_v53  ;;  %v4161_v30 = vmul.f32 %v4210_v2, %v6878_v47 }
0x102a   : > { %v6898_v15 = vld [vmem:[#allocation4 + $0xe0] sm:$0xff] }
0x102b   : > { %4440 = vst.msk [vmem:[#allocation4 + $0xe0] sm:$0xff] %vm3980_vm11, %v5723_v42 }
0x102c   : > { %v6900_v56 = vld [vmem:[#allocation4 + $0xc0] sm:$0xff] }
0x102d   : > { %4095 = vrot.lane.b32.xlu1 %v4087_v54, %s7270_s4  ;;  %4122 = vrot.lane.b32.xlu0 %v4116_v18, %s7270_s4  ;;  %4438 = vst.msk [vmem:[#allocation4 + $0xc0] sm:$0xff] %vm3980_vm11, %v5723_v42 }
0x1030   : > { %v6909_v60 = vld [vmem:[#allocation4 + $0xd0] sm:$0xff] }
0x1031   : > { %4091 = vrot.lane.b32.xlu1 %v4085_v57, %s7270_s4  ;;  %4093 = vrot.lane.b32.xlu0 %v4086_v58, %s7270_s4  ;;  %v4306_v62 = vpack.c.bf16 %v6909_v60, %v6900_v56  ;;  %4439 = vst.msk [vmem:[#allocation4 + $0xd0] sm:$0xff] %vm3980_vm11, %v5723_v42 }
0x1035   : > { %4062 = vrot.lane.b32.xlu1 %v4055_v61, %s7222_s2  ;;  %4064 = vrot.lane.b32.xlu0 %v4056_v63, %s7222_s2 }
0x1039   : > { %4033 = vrot.lane.b32.xlu1 %v4025_v1, %s7269_s11  ;;  %4060 = vrot.lane.b32.xlu0 %v4054_v3, %s7222_s2  ;;  %s7271_s2 = sld [smem:[#allocation23_spill]] }
0x103d   : > { %4029 = vrot.lane.b32.xlu1 %v4023_v6, %s7269_s11  ;;  %4031 = vrot.lane.b32.xlu0 %v4024_v7, %s7269_s11 }
0x103f   : > { %v4314_v32 = vld [vmem:[%s7271_s2] sm:$0xff]  ;;  %v4315_v33 = vld [vmem:[%s7271_s2 + $0x8] sm:$0xff]  ;;  %v4316_v36 = vld [vmem:[%s7271_s2 + $0x10] sm:$0xff]  ;;  %s7273_s2 = smov 2  }
0x1041   : > { %4262 = vrot.lane.b32.xlu1 %v4254_v9, %s7258_s1  ;;  %4258 = vrot.lane.b32.xlu0 %v4252_v10, %s7258_s1 }
0x1045   : > { %4260 = vrot.lane.b32.xlu1 %v4253_v12, %s7258_s1  ;;  %4229 = vrot.lane.b32.xlu0 %v4222_v13, %s5739_s0 }
0x1049   : > { %4231 = vrot.lane.b32.xlu1 %v4223_v25, %s5739_s0  ;;  %4201 = vrot.lane.b32.xlu0 %v4193_v26, %s7268_s16 }
0x104d   : > { %4227 = vrot.lane.b32.xlu1 %v4221_v27, %s5739_s0  ;;  %4197 = vrot.lane.b32.xlu0 %v4191_v28, %s7268_s16 }
0x1051   : > { %4199 = vrot.lane.b32.xlu1 %v4192_v29, %s7268_s16  ;;  %4168 = vrot.lane.b32.xlu0 %v4161_v30, %s7268_s16 }
0x1055   : > { %4170 = vrot.lane.b32.xlu1 %v4162_v31, %s7268_s16  ;;  %4319 = vperm.xlu0 %5588, %v4314_v32  }
0x1059   : > { %4324 = vperm.xlu1 %5589, %v4315_v33   ;;  %4329 = vperm.xlu0 %5588, %v4316_v36  }
0x105d   : > { %4596 = vrot.lane.b32.xlu1 %v6824_v14, %s7270_s4  ;;  %4552 = vrot.lane.b32.xlu0 %v6827_v16, %s7268_s16 }
0x1061   : > { %4522 = vrot.lane.b32.xlu1 %v6834_v17, %s7268_s16  ;;  %4492 = vrot.lane.b32.xlu0 %v6837_v19, %s5739_s0 }
0x1065   : > { %4462 = vrot.lane.b32.xlu1 %v6844_v20, %s7258_s1  ;;  %4686 = vrot.lane.b32.xlu0 %v6847_v21, %s7269_s11 }
0x1069   : > { %4656 = vrot.lane.b32.xlu1 %v6854_v22, %s7273_s2  ;;  %4626 = vrot.lane.b32.xlu0 %v6857_v23, %s7270_s4 }
0x1097   : > { %v4167_v14 = vpop.permute.xlu0 %4166 }
0x1098   : > { %4176 = vst.msk [vmem:[#allocation4 + $0xf0] sm:$0xff] %vm4175_vm3, %v4167_v14  ;;  %v4272_v14 = vld [vmem:[%s7272_s5 + $0x10] sm:$0xff] }
0x109b   : > { %v4125_v16 = vpop.permute.xlu1 %4124  ;;  %v4127_v17 = vpop.permute.xlu0 %4126 }
0x109c   : > { %4132 = vst.msk [vmem:[#allocation4 + $0xa0] sm:$0xff] %vm4100_vm12, %v4125_v16  ;;  %4133 = vst.msk [vmem:[#allocation4 + $0xb0] sm:$0xff] %vm4100_vm12, %v4127_v17  ;;  %v5623_v17 = vld [vmem:[%s7272_s5] ss:$8 sps:$4 sm:$0xff]  }
0x109f   : > { %v4096_v19 = vpop.permute.xlu1 %4095  ;;  %v4123_v20 = vpop.permute.xlu0 %4122  ;;  %v4288_v21 = vld [vmem:[#allocation4 + $0xf0] sm:$0xff] }
0x10a0   : > { %4103 = vst.msk [vmem:[#allocation4 + $0x80] sm:$0xff] %vm4100_vm12, %v4096_v19  ;;  %4131 = vst.msk [vmem:[#allocation4 + $0x90] sm:$0xff] %vm4100_vm12, %v4123_v20  ;;  %v4307_v22 = vpack.c.bf16 %v4288_v21, %v6898_v15  ;;  %v5342_v19 = vcombine.high %v4272_v14, %v4272_v14  ;;  %v5341_v20 = vcombine.low %v4272_v14, %v4272_v14 }
0x10a1   : > { %4441 = vst.msk [vmem:[#allocation4 + $0xf0] sm:$0xff] %vm3980_vm11, %v5723_v42 }
0x10a2   : > { %4358 = vmatpush1.bf16.msra.mxu0 %v4307_v22 }
0x10a3   : > { %v4092_v23 = vpop.permute.xlu1 %4091  ;;  %v4283_v34 = vld [vmem:[#allocation4 + $0xa0] sm:$0xff]  ;;  %v4094_v35 = vpop.permute.xlu0 %4093  ;;  %4359 = vmatprep.subr.bf16.mxu0 %v5724_v48  ;;  %v4284_v38 = vld [vmem:[#allocation4 + $0xb0] sm:$0xff] }
0x10a4   : > { %4101 = vst.msk [vmem:[#allocation4 + $0x60] sm:$0xff] %vm4100_vm12, %v4092_v23  ;;  %4102 = vst.msk [vmem:[#allocation4 + $0x70] sm:$0xff] %vm4100_vm12, %v4094_v35  ;;  %v4305_v46 = vpack.c.bf16 %v4284_v38, %v4283_v34 }
0x10a5   : > { %4436 = vst.msk [vmem:[#allocation4 + $0xa0] sm:$0xff] %vm3980_vm11, %v5723_v42  ;;  %4437 = vst.msk [vmem:[#allocation4 + $0xb0] sm:$0xff] %vm3980_vm11, %v5723_v42 }
0x10a6   : > { %4360 = vmatpush1.bf16.msra.mxu0 %v4306_v62 }
0x10a7   : > { %v4063_v39 = vpop.permute.xlu1 %4062  ;;  %v4281_v40 = vld [vmem:[#allocation4 + $0x80] sm:$0xff]  ;;  %v4065_v4 = vpop.permute.xlu0 %4064  ;;  %4361 = vmatprep.subr.bf16.mxu0 %v5724_v48  ;;  %v4282_v5 = vld [vmem:[#allocation4 + $0x90] sm:$0xff] }
0x10a8   : > { %4071 = vst.msk [vmem:[#allocation4 + $0x40] sm:$0xff] %vm4069_vm13, %v4063_v39  ;;  %4072 = vst.msk [vmem:[#allocation4 + $0x50] sm:$0xff] %vm4069_vm13, %v4065_v4  ;;  %v4304_v49 = vpack.c.bf16 %v4282_v5, %v4281_v40 }
0x10a9   : > { %4434 = vst.msk [vmem:[#allocation4 + $0x80] sm:$0xff] %vm3980_vm11, %v5723_v42  ;;  %4435 = vst.msk [vmem:[#allocation4 + $0x90] sm:$0xff] %vm3980_vm11, %v5723_v42 }
0x10aa   : > { %4362 = vmatpush1.bf16.msra.mxu0 %v4305_v46 }
0x10ab   : > { %v4034_v41 = vpop.permute.xlu1 %4033  ;;  %v4279_v47 = vld [vmem:[#allocation4 + $0x60] sm:$0xff]  ;;  %v4061_v43 = vpop.permute.xlu0 %4060  ;;  %4363 = vmatprep.subr.bf16.mxu0 %v5724_v48  ;;  %v4280_v45 = vld [vmem:[#allocation4 + $0x70] sm:$0xff] }
0x10ac   : > { %4041 = vst.msk [vmem:[#allocation4 + $0x20] sm:$0xff] %vm4038_vm5, %v4034_v41  ;;  %v4303_v53 = vpack.c.bf16 %v4280_v45, %v4279_v47 }
0x10ad   : > { %4432 = vst.msk [vmem:[#allocation4 + $0x60] sm:$0xff] %vm3980_vm11, %v5723_v42  ;;  %4433 = vst.msk [vmem:[#allocation4 + $0x70] sm:$0xff] %vm3980_vm11, %v5723_v42 }
0x10ae   : > { %4070 = vst.msk [vmem:[#allocation4 + $0x30] sm:$0xff] %vm4069_vm13, %v4061_v43  ;;  %4364 = vmatpush1.bf16.msra.mxu0 %v4304_v49 }
0x10af   : > { %v4030_v50 = vpop.permute.xlu1 %4029  ;;  %v4277_v2 = vld [vmem:[#allocation4 + $0x40] sm:$0xff]  ;;  %v4032_v51 = vpop.permute.xlu0 %4031  ;;  %4365 = vmatprep.subr.bf16.mxu0 %v5724_v48  ;;  %v4278_v52 = vld [vmem:[#allocation4 + $0x50] sm:$0xff] }
0x10b0   : > { %4039 = vst.msk [vmem:[#allocation4] sm:$0xff] %vm4038_vm5, %v4030_v50  ;;  %4040 = vst.msk [vmem:[#allocation4 + $0x10] sm:$0xff] %vm4038_vm5, %v4032_v51  ;;  %v4302_v56 = vpack.c.bf16 %v4278_v52, %v4277_v2 }
0x10b1   : > { %4430 = vst.msk [vmem:[#allocation4 + $0x40] sm:$0xff] %vm3980_vm11, %v5723_v42  ;;  %4431 = vst.msk [vmem:[#allocation4 + $0x50] sm:$0xff] %vm3980_vm11, %v5723_v42 }
0x10b2   : > { %4366 = vmatpush1.bf16.msra.mxu0 %v4303_v53 }
0x10b3   : > { %v4263_v55 = vpop.permute.xlu1 %4262  ;;  %v4275_v54 = vld [vmem:[#allocation4 + $0x20] sm:$0xff]  ;;  %v4259_v18 = vpop.permute.xlu0 %4258  ;;  %4367 = vmatprep.subr.bf16.mxu0 %v5724_v48 }
0x10b4   : > { %4269 = vst.msk [vmem:[#allocation4 + $0x1a0] sm:$0xff] %vm7274_vm7, %v4263_v55  ;;  %vm7282_vm7 = vmmov %vm7279_vm2 }
0x10b5   : > { %v4276_v15 = vld [vmem:[#allocation4 + $0x30] sm:$0xff]  ;;  %4428 = vst.msk [vmem:[#allocation4 + $0x20] sm:$0xff] %vm3980_vm11, %v5723_v42 }
0x10b6   : > { %4267 = vst.msk [vmem:[#allocation4 + $0x180] sm:$0xff] %vm7275_vm8, %v4259_v18  ;;  %4368 = vmatpush1.bf16.msra.mxu0 %v4302_v56  ;;  %v4301_v61 = vpack.c.bf16 %v4276_v15, %v4275_v54  ;;  %vm7284_vm8 = vmmov %vm7279_vm2 }
0x10b7   : > { %4429 = vst.msk [vmem:[#allocation4 + $0x30] sm:$0xff] %vm3980_vm11, %v5723_v42  ;;  %v4261_v57 = vpop.permute.xlu1 %4260  ;;  %v4273_v58 = vld [vmem:[#allocation4] sm:$0xff]  ;;  %v4230_v59 = vpop.permute.xlu0 %4229  ;;  %4369 = vmatprep.subr.bf16.mxu0 %v5724_v48  ;;  %v4274_v60 = vld [vmem:[#allocation4 + $0x10] sm:$0xff] }
0x10b8   : > { %4268 = vst.msk [vmem:[#allocation4 + $0x190] sm:$0xff] %vm7276_vm10, %v4261_v57  ;;  %v4300_v3 = vpack.c.bf16 %v4274_v60, %v4273_v58  ;;  %vm7285_vm10 = vmmov %vm7279_vm2 }
0x10b9   : > { %4426 = vst.msk [vmem:[#allocation4] sm:$0xff] %vm3980_vm11, %v5723_v42  ;;  %4427 = vst.msk [vmem:[#allocation4 + $0x10] sm:$0xff] %vm3980_vm11, %v5723_v42 }
0x10ba   : > { %4238 = vst.msk [vmem:[#allocation4 + $0x160] sm:$0xff] %vm4236_vm9, %v4230_v59  ;;  %4370 = vmatpush1.bf16.msra.mxu0 %v4301_v61 }
0x10bb   : > { %v4232_v62 = vpop.permute.xlu1 %4231  ;;  %v4299_v63 = vld [vmem:[#allocation4 + $0x1a0] sm:$0xff]  ;;  %v4202_v0 = vpop.permute.xlu0 %4201  ;;  %4371 = vmatprep.subr.bf16.mxu0 %v5724_v48 }
0x10bc   : > { %4239 = vst.msk [vmem:[#allocation4 + $0x170] sm:$0xff] %vm4236_vm9, %v4232_v62  ;;  %v4313_v6 = vpack.c.bf16 %v4299_v63, %v4299_v63 }
0x10bd   : > { %4452 = vst.msk [vmem:[#allocation4 + $0x1a0] sm:$0xff] %vm3980_vm11, %v5723_v42  ;;  %v4297_v1 = vld [vmem:[#allocation4 + $0x180] sm:$0xff] }
0x10be   : > { %4208 = vst.msk [vmem:[#allocation4 + $0x140] sm:$0xff] %vm4175_vm3, %v4202_v0  ;;  %4372 = vmatpush1.bf16.msra.mxu0 %v4300_v3  ;;  %v4355_v11 = vsel %vm1887_vm15, %v4313_v6, 0 }
0x10bf   : > { %4450 = vst.msk [vmem:[#allocation4 + $0x180] sm:$0xff] %vm3980_vm11, %v5723_v42  ;;  %v4228_v7 = vpop.permute.xlu1 %4227  ;;  %v4298_v8 = vld [vmem:[#allocation4 + $0x190] sm:$0xff]  ;;  %v4198_v9 = vpop.permute.xlu0 %4197  ;;  %4377 = vmatprep.subr.bf16.mxu0 %v5724_v48 }
0x10c0   : > { %4237 = vst.msk [vmem:[#allocation4 + $0x150] sm:$0xff] %vm4236_vm9, %v4228_v7  ;;  %v4312_v26 = vpack.c.bf16 %v4298_v8, %v4297_v1 }
0x10c1   : > { %4451 = vst.msk [vmem:[#allocation4 + $0x190] sm:$0xff] %vm3980_vm11, %v5723_v42  ;;  %v4295_v10 = vld [vmem:[#allocation4 + $0x160] sm:$0xff] }
0x10c2   : > { %4206 = vst.msk [vmem:[#allocation4 + $0x120] sm:$0xff] %vm4175_vm3, %v4198_v9  ;;  %4378 = vmatpush2.bf16.msra.mxu0 %v4355_v11 }
0x10c3   : > { %4448 = vst.msk [vmem:[#allocation4 + $0x160] sm:$0xff] %vm3980_vm11, %v5723_v42  ;;  %v4200_v12 = vpop.permute.xlu1 %4199  ;;  %v4296_v13 = vld [vmem:[#allocation4 + $0x170] sm:$0xff]  ;;  %v4169_v24 = vpop.permute.xlu0 %4168  ;;  %4379 = vmatprep.subr.bf16.mxu0 %v5724_v48 }
0x10c4   : > { %4207 = vst.msk [vmem:[#allocation4 + $0x130] sm:$0xff] %vm4175_vm3, %v4200_v12  ;;  %4177 = vst.msk [vmem:[#allocation4 + $0x100] sm:$0xff] %vm4175_vm3, %v4169_v24  ;;  %v4311_v30 = vpack.c.bf16 %v4296_v13, %v4295_v10 }
0x10c5   : > { %4449 = vst.msk [vmem:[#allocation4 + $0x170] sm:$0xff] %vm3980_vm11, %v5723_v42  ;;  %v4293_v25 = vld [vmem:[#allocation4 + $0x140] sm:$0xff] }
0x10c6   : > { %4446 = vst.msk [vmem:[#allocation4 + $0x140] sm:$0xff] %vm3980_vm11, %v5723_v42  ;;  %4380 = vmatpush2.bf16.msra.mxu0 %v4312_v26 }
0x10c7   : > { %v4171_v27 = vpop.permute.xlu1 %4170  ;;  %v4294_v28 = vld [vmem:[#allocation4 + $0x150] sm:$0xff]  ;;  %4381 = vmatprep.subr.bf16.mxu0 %v5724_v48 }
0x10c8   : > { %4178 = vst.msk [vmem:[#allocation4 + $0x110] sm:$0xff] %vm4175_vm3, %v4171_v27  ;;  %v4310_v33 = vpack.c.bf16 %v4294_v28, %v4293_v25 }
0x10c9   : > { %4447 = vst.msk [vmem:[#allocation4 + $0x150] sm:$0xff] %vm3980_vm11, %v5723_v42  ;;  %v4291_v29 = vld [vmem:[#allocation4 + $0x120] sm:$0xff] }
0x10ca   : > { %4444 = vst.msk [vmem:[#allocation4 + $0x120] sm:$0xff] %vm3980_vm11, %v5723_v42  ;;  %4382 = vmatpush2.bf16.msra.mxu0 %v4311_v30 }
0x10cb   : > { %v4292_v31 = vld [vmem:[#allocation4 + $0x130] sm:$0xff]  ;;  %4383 = vmatprep.subr.bf16.mxu0 %v5724_v48  ;;  %v4289_v32 = vld [vmem:[#allocation4 + $0x100] sm:$0xff] }
0x10cc   : > { %4445 = vst.msk [vmem:[#allocation4 + $0x130] sm:$0xff] %vm3980_vm11, %v5723_v42  ;;  %4442 = vst.msk [vmem:[#allocation4 + $0x100] sm:$0xff] %vm3980_vm11, %v5723_v42  ;;  %v4309_v37 = vpack.c.bf16 %v4292_v31, %v4291_v29 }
0x10ce   : > { %4384 = vmatpush2.bf16.msra.mxu0 %v4310_v33 }
0x10cf   : > { %v4290_v36 = vld [vmem:[#allocation4 + $0x110] sm:$0xff]  ;;  %4385 = vmatprep.subr.bf16.mxu0 %v5724_v48 }
0x10d0   : > { %4443 = vst.msk [vmem:[#allocation4 + $0x110] sm:$0xff] %vm3980_vm11, %v5723_v42  ;;  %v4308_v16 = vpack.c.bf16 %v4290_v36, %v4289_v32  ;;  %v4320_v21 = vpop.permute.xlu0 %4319 }
0x10d2   : > { %4386 = vmatpush2.bf16.msra.mxu0 %v4309_v37 }
0x10d3   : > { %4387 = vmatprep.subr.bf16.mxu0 %v5724_v48 }
0x10d4   : > { %v4325_v38 = vpop.permute.xlu1 %4324  ;;  %v4330_v41 = vpop.permute.xlu0 %4329 }
0x10d6   : > { %4388 = vmatpush2.bf16.msra.mxu0 %v4308_v16 }
0x10d8   : > { %v4597_v61 = vpop.permute.xlu1 %4596  ;;  %v4553_v1 = vpop.permute.xlu0 %4552 }
0x10d9   : > { %4390 = vmatmul.mubr.bf16.vlgmr.msra.gmra.mxu0 %v5623_v17 }
0x10da   : > { %5344 = vmatprep.mubr.msk.bf16.mxu0 %vm4347_vm0, %v5342_v19 }
0x10dc   : > { %v4523_v10 = vpop.permute.xlu1 %4522  ;;  %v4493_v24 = vpop.permute.xlu0 %4492 }
0x10e0   : > { %v4463_v27 = vpop.permute.xlu1 %4462  ;;  %v4687_v31 = vpop.permute.xlu0 %4686 }
0x10e1   : > { %4398 = vmatmul.mubr.bf16.gmra.mxu0 %v5341_v20 }
0x10e4   : > { %v4657_v14 = vpop.permute.xlu1 %4656  ;;  %v4627_v19 = vpop.permute.xlu0 %4626 }
0x1199   : > { %v4391_v22 = vpop.f32.mrf.mxu0 }
0x119a   : > { %v4392_v23 = vadd.f32 %v4391_v22, %v4320_v21 }
0x119b   : > { %v4393_v34 = vpop.f32.mrf.mxu0 }
0x119c   : > { %v4408_v35 = vmin.f32 %v4392_v23, 0.0  ;;  %vm4405_vm14 = vcmp.gt.f32.partialorder %v4392_v23, 0.0 }
0x119d   : > { %v4394_v39 = vpop.f32.mrf.mxu0 }
0x119e   : > { %v4411_v40 = vmul.f32 1.442695, %v4408_v35  ;;  %v4395_v4 = vadd.f32 %v4394_v39, %v4325_v38 }
0x119f   : > { %v4396_v5 = vpop.f32.mrf.mxu0 }
0x11a0   : > { %5658 = vpow2.f32 %v4411_v40  ;;  %v4409_v46 = vmin.f32 %v4395_v4, 0.0  ;;  %vm4406_vm1 = vcmp.gt.f32.partialorder %v4395_v4, 0.0  ;;  %v4871_v5 = vld [vmem:[%s5919_s21] sm:$0xff] }
0x11a1   : > { %v4399_v47 = vpop.f32.mrf.mxu0 }
0x11a2   : > { %v4413_v43 = vmul.f32 1.442695, %v4409_v46  ;;  %v4400_v45 = vadd.f32 %v4399_v47, %v4330_v41  ;;  %v4872_v46 = vld [vmem:[%s5919_s21 + $0x8] sm:$0xff]  ;;  %v4873_v41 = vld [vmem:[%s5919_s21 + $0x10] sm:$0xff]  ;;  %v4874_v47 = vld [vmem:[%s5919_s21 + $0x18] sm:$0xff] }
0x11a3   : > { %v4401_v49 = vpop.f32.mrf.mxu0 }
0x11a4   : > { %5660 = vpow2.f32 %v4413_v43  ;;  %v4410_v50 = vmin.f32 %v4400_v45, 0.0  ;;  %vm4407_vm4 = vcmp.gt.f32.partialorder %v4400_v45, 0.0 }
0x11a5   : > { %v4402_v2 = vpop.f32.mrf.mxu0 }
0x11a6   : > { %v4415_v51 = vmul.f32 1.442695, %v4410_v50 }
0x11a7   : > { %v4403_v52 = vpop.f32.mrf.mxu0 }
0x11a8   : > { %5662 = vpow2.f32 %v4415_v51 }
0x11ad   : > { %v5659_v53 = vpop.eup %5658 }
0x11ae   : > { %v5345_v55 = vadd.f32 -1.0, %v5659_v53 }
0x11b0   : > { %v4420_v54 = vsel %vm4405_vm14, %v4392_v23, %v5345_v55 }
0x11b1   : > { %v5661_v18 = vpop.eup %5660  ;;  %4423 = vst.msk [vmem:[#allocation2] sm:$0xff] %vm3980_vm11, %v4420_v54 }
0x11b2   : > { %v5346_v15 = vadd.f32 -1.0, %v5661_v18 }
0x11b4   : > { %v4421_v56 = vsel %vm4406_vm1, %v4395_v4, %v5346_v15  ;;  %vm4981_vm1 = vcmask 1041408  }
0x11b5   : > { %v5663_v57 = vpop.eup %5662  ;;  %4424 = vst.msk [vmem:[#allocation2 + $0x10] sm:$0xff] %vm3980_vm11, %v4421_v56 }
0x11b6   : > { %v5347_v58 = vadd.f32 -1.0, %v5663_v57 }
0x11b8   : > { %v4573_v59 = vld [vmem:[#allocation2] sm:$0xff]  ;;  %v4422_v60 = vsel %vm4407_vm4, %v4400_v45, %v5347_v58  ;;  %vm7290_vm4 = vmmov %vm7279_vm2 }
0x11b9   : > { %v4581_v62 = vmul.f32 %v6876_v44, %v4573_v59  ;;  %4425 = vst.msk [vmem:[#allocation2 + $0x20] sm:$0xff] %vm3980_vm11, %v4422_v60  ;;  %v4599_v63 = vmul.f32 %v4597_v61, %v4573_v59  ;;  %v4555_v12 = vmul.f32 %v4573_v59, %v4553_v1  ;;  %v4525_v13 = vmul.f32 %v4573_v59, %v4523_v10 }
0x11ba   : > { %v4495_v29 = vmul.f32 %v4573_v59, %v4493_v24  ;;  %v4465_v30 = vmul.f32 %v4573_v59, %v4463_v27  ;;  %v4689_v36 = vmul.f32 %v4687_v31, %v4573_v59  ;;  %v4659_v21 = vmul.f32 %v4657_v14, %v4573_v59 }
0x11bb   : > { %4584 = vst.msk [vmem:[#allocation4 + $0xc0] sm:$0xff] %vm3980_vm11, %v4581_v62  ;;  %4605 = vrot.lane.b32.xlu1 %v4599_v63, %s7268_s16  ;;  %v4629_v22 = vmul.f32 %v4627_v19, %v4573_v59 }
0x11bc   : > { %v4574_v0 = vld [vmem:[#allocation2 + $0x10] sm:$0xff] }
0x11bd   : > { %v4582_v3 = vmul.f32 %v6876_v44, %v4574_v0  ;;  %v4556_v6 = vmul.f32 %v4574_v0, %v4553_v1  ;;  %v4526_v25 = vmul.f32 %v4574_v0, %v4523_v10  ;;  %v4496_v26 = vmul.f32 %v4574_v0, %v4493_v24 }
0x11be   : > { %v4466_v32 = vmul.f32 %v4574_v0, %v4463_v27  ;;  %v4690_v37 = vmul.f32 %v4687_v31, %v4574_v0  ;;  %v4660_v16 = vmul.f32 %v4657_v14, %v4574_v0  ;;  %v4630_v23 = vmul.f32 %v4627_v19, %v4574_v0 }
0x11bf   : > { %4585 = vst.msk [vmem:[#allocation4 + $0xd0] sm:$0xff] %vm3980_vm11, %v4582_v3  ;;  %4563 = vrot.lane.b32.xlu0 %v4556_v6, %s7270_s4  ;;  %v4600_v34 = vmul.f32 %v4597_v61, %v4574_v0 }
0x11c0   : > { %v4575_v7 = vld [vmem:[#allocation2 + $0x20] sm:$0xff] }
0x11c1   : > { %v4583_v8 = vmul.f32 %v6876_v44, %v4575_v7  ;;  %v4557_v9 = vmul.f32 %v4575_v7, %v4553_v1  ;;  %v4527_v11 = vmul.f32 %v4575_v7, %v4523_v10  ;;  %v4497_v44 = vmul.f32 %v4575_v7, %v4493_v24 }
0x11c2   : > { %v4467_v28 = vmul.f32 %v4575_v7, %v4463_v27  ;;  %v4691_v33 = vmul.f32 %v4687_v31, %v4575_v7  ;;  %v4661_v17 = vmul.f32 %v4657_v14, %v4575_v7  ;;  %v4631_v20 = vmul.f32 %v4627_v19, %v4575_v7  ;;  %v4722_v54 = vld [vmem:[#allocation4 + $0xc0] sm:$0xff] }
0x11c3   : > { %4586 = vst.msk [vmem:[#allocation4 + $0xe0] sm:$0xff] %vm3980_vm11, %v4583_v8  ;;  %4565 = vrot.lane.b32.xlu1 %v4557_v9, %s7270_s4  ;;  %4535 = vrot.lane.b32.xlu0 %v4527_v11, %s7270_s4  ;;  %v4601_v35 = vmul.f32 %v4597_v61, %v4575_v7 }
0x11c6   : > { %v4723_v53 = vld [vmem:[#allocation4 + $0xd0] sm:$0xff] }
0x11c7   : > { %4561 = vrot.lane.b32.xlu1 %v4555_v12, %s7270_s4  ;;  %4531 = vrot.lane.b32.xlu0 %v4525_v13, %s7270_s4  ;;  %v4743_v15 = vpack.c.bf16 %v4723_v53, %v4722_v54 }
0x11ca   : > { %v4724_v50 = vld [vmem:[#allocation4 + $0xe0] sm:$0xff] }
0x11cb   : > { %4533 = vrot.lane.b32.xlu1 %v4526_v25, %s7270_s4  ;;  %4503 = vrot.lane.b32.xlu0 %v4496_v26, %s7273_s2  ;;  %s7278_s4 = sld [smem:[#allocation24_spill]] }
0x11cf   : > { %4505 = vrot.lane.b32.xlu1 %v4497_v44, %s7273_s2  ;;  %4475 = vrot.lane.b32.xlu0 %v4467_v28, %s7269_s11 }
0x11d1   : > { %v5626_v39 = vld [vmem:[%s7278_s4 + $0x4] ss:$8 sps:$4 sm:$0xff]  }
0x11d2   : > { %5361 = vmatprep.mubr.msk.bf16.mxu1 %vm4347_vm0, %v5626_v39 }
0x11d3   : > { %4501 = vrot.lane.b32.xlu1 %v4495_v29, %s7273_s2  ;;  %4471 = vrot.lane.b32.xlu0 %v4465_v30, %s7269_s11  ;;  %s7277_s2 = sld [smem:[#allocation25_spill]] }
0x11d7   : > { %4473 = vrot.lane.b32.xlu1 %v4466_v32, %s7269_s11  ;;  %4699 = vrot.lane.b32.xlu0 %v4691_v33, %s7258_s1  ;;  %s7286_s11 = sld [smem:[#allocation26_spill]] }
0x11d9   : > { %v4753_v38 = vld [vmem:[%s7277_s2 + $0x10] sm:$0xff]  ;;  %v4751_v40 = vld [vmem:[%s7277_s2] sm:$0xff]  ;;  %v4752_v4 = vld [vmem:[%s7277_s2 + $0x8] sm:$0xff] }
0x11db   : > { %4695 = vrot.lane.b32.xlu1 %v4689_v36, %s7258_s1  ;;  %4697 = vrot.lane.b32.xlu0 %v4690_v37, %s7258_s1  ;;  %s5377_s1 = sshll.u32 %s7298_s10, 4 }
0x11df   : > { %4667 = vrot.lane.b32.xlu1 %v4660_v16, %s5739_s0  ;;  %4669 = vrot.lane.b32.xlu0 %v4661_v17, %s5739_s0 }
0x11e3   : > { %4639 = vrot.lane.b32.xlu1 %v4631_v20, %s7268_s16  ;;  %4665 = vrot.lane.b32.xlu0 %v4659_v21, %s5739_s0  ;;  %s1126_s0 = scalar_lea.vmem %s5934_s25, %s5377_s1 }
0x11e7   : > { %4635 = vrot.lane.b32.xlu1 %v4629_v22, %s7268_s16  ;;  %4637 = vrot.lane.b32.xlu0 %v4630_v23, %s7268_s16 }
0x11eb   : > { %4607 = vrot.lane.b32.xlu1 %v4600_v34, %s7268_s16  ;;  %4609 = vrot.lane.b32.xlu0 %v4601_v35, %s7268_s16  ;;  %s7287_s16 = sld [smem:[#allocation10_spill]] }
0x11ef   : > { %4766 = vperm.xlu1 %5589, %v4753_v38   ;;  %4756 = vperm.xlu0 %5588, %v4751_v40  }
0x11f3   : > { %4761 = vperm.xlu1 %5589, %v4752_v4   ;;  %4877 = vperm.xlu0 %5588, %v4871_v5  }
0x11f7   : > { %4882 = vperm.xlu1 %5589, %v4872_v46   ;;  %4887 = vperm.xlu0 %5588, %v4873_v41  }
0x11fb   : > { %4892 = vperm.xlu1 %5589, %v4874_v47  }
0x122d   : > { %v4606_v43 = vpop.permute.xlu1 %4605 }
0x122e   : > { %4614 = vst.msk [vmem:[#allocation4 + $0xf0] sm:$0xff] %vm4175_vm3, %v4606_v43 }
0x1231   : > { %v4564_v45 = vpop.permute.xlu0 %4563 }
0x1232   : > { %4571 = vst.msk [vmem:[#allocation4 + $0xa0] sm:$0xff] %vm4100_vm12, %v4564_v45 }
0x1235   : > { %v4566_v49 = vpop.permute.xlu1 %4565  ;;  %v4725_v2 = vld [vmem:[#allocation4 + $0xf0] sm:$0xff]  ;;  %v4536_v51 = vpop.permute.xlu0 %4535 }
0x1236   : > { %4572 = vst.msk [vmem:[#allocation4 + $0xb0] sm:$0xff] %vm4100_vm12, %v4566_v49  ;;  %v4744_v52 = vpack.c.bf16 %v4725_v2, %v4724_v50  ;;  %4542 = vst.msk [vmem:[#allocation4 + $0x80] sm:$0xff] %vm4100_vm12, %v4536_v51  ;;  %v4709_v50 = vld [vmem:[%s7278_s4 + $0x10] sm:$0xff]  ;;  %v5628_v51 = vld [vmem:[%s7278_s4] ss:$8 sps:$4 sm:$0xff]  }
0x1237   : > { %v5359_v53 = vcombine.low %v4709_v50, %v4709_v50 }
0x1238   : > { %4794 = vmatpush1.bf16.msra.mxu1 %v4744_v52  ;;  %v5360_v52 = vcombine.high %v4709_v50, %v4709_v50 }
0x1239   : > { %v4562_v55 = vpop.permute.xlu1 %4561  ;;  %4795 = vmatprep.subr.bf16.mxu1 %v5724_v48  ;;  %v4532_v18 = vpop.permute.xlu0 %4531  ;;  %v4720_v57 = vld [vmem:[#allocation4 + $0xa0] sm:$0xff] }
0x123a   : > { %4570 = vst.msk [vmem:[#allocation4 + $0x90] sm:$0xff] %vm4100_vm12, %v4562_v55  ;;  %4540 = vst.msk [vmem:[#allocation4 + $0x60] sm:$0xff] %vm4100_vm12, %v4532_v18  ;;  %v5631_v55 = vld [vmem:[%s7286_s11] sm:$0xff]  }
0x123c   : > { %4796 = vmatpush1.bf16.msra.mxu1 %v4743_v15 }
0x123d   : > { %v4534_v56 = vpop.permute.xlu1 %4533  ;;  %4797 = vmatprep.subr.bf16.mxu1 %v5724_v48  ;;  %v4721_v58 = vld [vmem:[#allocation4 + $0xb0] sm:$0xff]  ;;  %v4504_v59 = vpop.permute.xlu0 %4503  ;;  %v4718_v62 = vld [vmem:[#allocation4 + $0x80] sm:$0xff] }
0x123e   : > { %4541 = vst.msk [vmem:[#allocation4 + $0x70] sm:$0xff] %vm4100_vm12, %v4534_v56  ;;  %v4742_v60 = vpack.c.bf16 %v4721_v58, %v4720_v57  ;;  %vm7280_vm12 = vmmov %vm7279_vm2 }
0x123f   : > { %4511 = vst.msk [vmem:[#allocation4 + $0x40] sm:$0xff] %vm4069_vm13, %v4504_v59 }
0x1240   : > { %4798 = vmatpush1.bf16.msra.mxu1 %v4742_v60 }
0x1241   : > { %v4506_v61 = vpop.permute.xlu1 %4505  ;;  %4799 = vmatprep.subr.bf16.mxu1 %v5724_v48  ;;  %v4719_v63 = vld [vmem:[#allocation4 + $0x90] sm:$0xff]  ;;  %v4476_v0 = vpop.permute.xlu0 %4475  ;;  %v4716_v6 = vld [vmem:[#allocation4 + $0x60] sm:$0xff] }
0x1242   : > { %4512 = vst.msk [vmem:[#allocation4 + $0x50] sm:$0xff] %vm4069_vm13, %v4506_v61  ;;  %v4741_v1 = vpack.c.bf16 %v4719_v63, %v4718_v62 }
0x1243   : > { %4482 = vst.msk [vmem:[#allocation4 + $0x20] sm:$0xff] %vm4038_vm5, %v4476_v0 }
0x1244   : > { %4800 = vmatpush1.bf16.msra.mxu1 %v4741_v1 }
0x1245   : > { %v4502_v3 = vpop.permute.xlu1 %4501  ;;  %4801 = vmatprep.subr.bf16.mxu1 %v5724_v48  ;;  %v4717_v7 = vld [vmem:[#allocation4 + $0x70] sm:$0xff]  ;;  %v4472_v8 = vpop.permute.xlu0 %4471 }
0x1246   : > { %4510 = vst.msk [vmem:[#allocation4 + $0x30] sm:$0xff] %vm4069_vm13, %v4502_v3  ;;  %v4740_v9 = vpack.c.bf16 %v4717_v7, %v4716_v6  ;;  %v4714_v11 = vld [vmem:[#allocation4 + $0x40] sm:$0xff]  ;;  %vm7281_vm13 = vmmov %vm7279_vm2 }
0x1247   : > { %4480 = vst.msk [vmem:[#allocation4] sm:$0xff] %vm4038_vm5, %v4472_v8 }
0x1248   : > { %4802 = vmatpush1.bf16.msra.mxu1 %v4740_v9 }
0x1249   : > { %v4474_v10 = vpop.permute.xlu1 %4473  ;;  %4803 = vmatprep.subr.bf16.mxu1 %v5724_v48  ;;  %v4715_v12 = vld [vmem:[#allocation4 + $0x50] sm:$0xff]  ;;  %v4700_v24 = vpop.permute.xlu0 %4699 }
0x124a   : > { %v4712_v13 = vld [vmem:[#allocation4 + $0x20] sm:$0xff]  ;;  %4481 = vst.msk [vmem:[#allocation4 + $0x10] sm:$0xff] %vm4038_vm5, %v4474_v10  ;;  %v4739_v25 = vpack.c.bf16 %v4715_v12, %v4714_v11  ;;  %vm7283_vm5 = vmmov %vm7279_vm2 }
0x124b   : > { %5040 = vst.msk [vmem:[#allocation4 + $0x20] sm:$0xff] %vm7279_vm2, %v5723_v42 }
0x124c   : > { %4706 = vst.msk [vmem:[#allocation4 + $0x1a0] sm:$0xff] %vm7280_vm12, %v4700_v24  ;;  %4804 = vmatpush1.bf16.msra.mxu1 %v4739_v25  ;;  %vm7291_vm12 = vmmov %vm7279_vm2 }
0x124d   : > { %v4713_v26 = vld [vmem:[#allocation4 + $0x30] sm:$0xff]  ;;  %v4696_v44 = vpop.permute.xlu1 %4695  ;;  %4805 = vmatprep.subr.bf16.mxu1 %v5724_v48  ;;  %v4698_v28 = vpop.permute.xlu0 %4697 }
0x124e   : > { %v4710_v27 = vld [vmem:[#allocation4] sm:$0xff]  ;;  %5041 = vst.msk [vmem:[#allocation4 + $0x30] sm:$0xff] %vm7281_vm13, %v5723_v42  ;;  %v4738_v29 = vpack.c.bf16 %v4713_v26, %v4712_v13  ;;  %vm7292_vm13 = vmmov %vm7279_vm2 }
0x124f   : > { %4704 = vst.msk [vmem:[#allocation4 + $0x180] sm:$0xff] %vm7282_vm7, %v4696_v44  ;;  %vm7294_vm7 = vmmov %vm7279_vm2 }
0x1250   : > { %5038 = vst.msk [vmem:[#allocation4] sm:$0xff] %vm7283_vm5, %v5723_v42  ;;  %4806 = vmatpush1.bf16.msra.mxu1 %v4738_v29  ;;  %vm5065_vm5 = vcmask 261120  }
0x1251   : > { %4705 = vst.msk [vmem:[#allocation4 + $0x190] sm:$0xff] %vm7284_vm8, %v4698_v28  ;;  %v4711_v30 = vld [vmem:[#allocation4 + $0x10] sm:$0xff]  ;;  %v4668_v31 = vpop.permute.xlu1 %4667  ;;  %4807 = vmatprep.subr.bf16.mxu1 %v5724_v48  ;;  %v4670_v32 = vpop.permute.xlu0 %4669  ;;  %vm7295_vm8 = vmmov %vm7279_vm2 }
0x1252   : > { %5039 = vst.msk [vmem:[#allocation4 + $0x10] sm:$0xff] %vm7285_vm10, %v5723_v42  ;;  %v4737_v33 = vpack.c.bf16 %v4711_v30, %v4710_v27  ;;  %vm7296_vm10 = vmmov %vm7279_vm2 }
0x1253   : > { %4675 = vst.msk [vmem:[#allocation4 + $0x160] sm:$0xff] %vm4236_vm9, %v4668_v31  ;;  %v4736_v36 = vld [vmem:[#allocation4 + $0x1a0] sm:$0xff]  ;;  %4676 = vst.msk [vmem:[#allocation4 + $0x170] sm:$0xff] %vm4236_vm9, %v4670_v32 }
0x1254   : > { %v4750_v37 = vpack.c.bf16 %v4736_v36, %v4736_v36  ;;  %4808 = vmatpush1.bf16.msra.mxu1 %v4737_v33 }
0x1255   : > { %v4640_v14 = vpop.permute.xlu1 %4639  ;;  %4813 = vmatprep.subr.bf16.mxu1 %v5724_v48  ;;  %v4666_v16 = vpop.permute.xlu0 %4665 }
0x1256   : > { %4646 = vst.msk [vmem:[#allocation4 + $0x140] sm:$0xff] %vm4175_vm3, %v4640_v14  ;;  %v4791_v17 = vsel %vm1887_vm15, %v4750_v37, 0  ;;  %v4734_v19 = vld [vmem:[#allocation4 + $0x180] sm:$0xff]  ;;  %v5632_v37 = vld [vmem:[%s7286_s11 + $0x8] sm:$0xff]  }
0x1257   : > { %4674 = vst.msk [vmem:[#allocation4 + $0x150] sm:$0xff] %vm4236_vm9, %v4666_v16  ;;  %v4974_v14 = vld [vmem:[%s7287_s16] sm:$0x3] }
0x1258   : > { %v4735_v20 = vld [vmem:[#allocation4 + $0x190] sm:$0xff]  ;;  %4814 = vmatpush2.bf16.msra.mxu1 %v4791_v17  ;;  %v4983_v16 = vsel %vm4981_vm1, %v4974_v14, 0 }
0x1259   : > { %v4636_v21 = vpop.permute.xlu1 %4635  ;;  %4815 = vmatprep.subr.bf16.mxu1 %v5724_v48  ;;  %v4638_v22 = vpop.permute.xlu0 %4637  ;;  %v4749_v23 = vpack.c.bf16 %v4735_v20, %v4734_v19 }
0x125a   : > { %4644 = vst.msk [vmem:[#allocation4 + $0x120] sm:$0xff] %vm4175_vm3, %v4636_v21  ;;  %4645 = vst.msk [vmem:[#allocation4 + $0x130] sm:$0xff] %vm4175_vm3, %v4638_v22  ;;  %v4732_v34 = vld [vmem:[#allocation4 + $0x160] sm:$0xff]  ;;  %v4733_v35 = vld [vmem:[#allocation4 + $0x170] sm:$0xff] }
0x125b   : > { %v4748_v40 = vpack.c.bf16 %v4733_v35, %v4732_v34 }
0x125c   : > { %4816 = vmatpush2.bf16.msra.mxu1 %v4749_v23 }
0x125d   : > { %v4608_v38 = vpop.permute.xlu1 %4607  ;;  %4817 = vmatprep.subr.bf16.mxu1 %v5724_v48  ;;  %v4610_v39 = vpop.permute.xlu0 %4609  ;;  %v4730_v4 = vld [vmem:[#allocation4 + $0x140] sm:$0xff] }
0x125e   : > { %4615 = vst.msk [vmem:[#allocation4 + $0x100] sm:$0xff] %vm4175_vm3, %v4608_v38  ;;  %4616 = vst.msk [vmem:[#allocation4 + $0x110] sm:$0xff] %vm4175_vm3, %v4610_v39  ;;  %v4731_v5 = vld [vmem:[#allocation4 + $0x150] sm:$0xff]  ;;  %vm4905_vm3 = vcmask 195584  }
0x125f   : > { %v4747_v46 = vpack.c.bf16 %v4731_v5, %v4730_v4  ;;  %5497 = vmatprep.mubr.msk.bf16.mxu0 %vm4905_vm3, %v5631_v55 }
0x1260   : > { %4818 = vmatpush2.bf16.msra.mxu1 %v4748_v40 }
0x1261   : > { %4819 = vmatprep.subr.bf16.mxu1 %v5724_v48  ;;  %v4728_v41 = vld [vmem:[#allocation4 + $0x120] sm:$0xff]  ;;  %v4729_v47 = vld [vmem:[#allocation4 + $0x130] sm:$0xff] }
0x1262   : > { %v4746_v43 = vpack.c.bf16 %v4729_v47, %v4728_v41 }
0x1264   : > { %4820 = vmatpush2.bf16.msra.mxu1 %v4747_v46 }
0x1265   : > { %4821 = vmatprep.subr.bf16.mxu1 %v5724_v48  ;;  %v4726_v45 = vld [vmem:[#allocation4 + $0x100] sm:$0xff]  ;;  %v4727_v49 = vld [vmem:[#allocation4 + $0x110] sm:$0xff] }
0x1266   : > { %v4745_v2 = vpack.c.bf16 %v4727_v49, %v4726_v45 }
0x1268   : > { %4822 = vmatpush2.bf16.msra.mxu1 %v4746_v43 }
0x1269   : > { %4823 = vmatprep.subr.bf16.mxu1 %v5724_v48 }
0x126a   : > { %v4767_v54 = vpop.permute.xlu1 %4766  ;;  %v4757_v18 = vpop.permute.xlu0 %4756 }
0x126c   : > { %4824 = vmatpush2.bf16.msra.mxu1 %v4745_v2 }
0x126d   : > { %5516 = vmatprep.subr.msk.bf16.mxu1 %vm4981_vm1, %v4974_v14 }
0x126e   : > { %v4762_v58 = vpop.permute.xlu1 %4761  ;;  %v4878_v17 = vpop.permute.xlu0 %4877 }
0x126f   : > { %4826 = vmatmul.mubr.bf16.vlgmr.msra.gmra.mxu1 %v5628_v51 }
0x1270   : > { %5362 = vmatprep.mubr.msk.bf16.mxu1 %vm4347_vm0, %v5360_v52  ;;  %5502 = vmatpush3.bf16.msra.mxu1 %v4983_v16 }
0x1272   : > { %v4883_v19 = vpop.permute.xlu1 %4882  ;;  %v4888_v20 = vpop.permute.xlu0 %4887 }
0x1276   : > { %v4893_v35 = vpop.permute.xlu1 %4892 }
0x1277   : > { %4834 = vmatmul.mubr.bf16.gmra.mxu1 %v5359_v53 }
0x132f   : > { %v4827_v15 = vpop.f32.mrf.mxu1 }
0x1330   : > { %v4828_v56 = vadd.f32 %v4827_v15, %v4757_v18 }
0x1331   : > { %v4829_v57 = vpop.f32.mrf.mxu1 }
0x1332   : > { %v4844_v48 = vmin.f32 %v4828_v56, 0.0  ;;  %vm4841_vm0 = vcmp.gt.f32.partialorder %v4828_v56, 0.0 }
0x1333   : > { %v4830_v59 = vpop.f32.mrf.mxu1 }
0x1334   : > { %v4847_v60 = vmul.f32 1.442695, %v4844_v48  ;;  %v4831_v61 = vadd.f32 %v4830_v59, %v4762_v58  ;;  %v5633_v59 = vld [vmem:[%s5924_s3] sm:$0xff]  }
0x1335   : > { %v4832_v62 = vpop.f32.mrf.mxu1 }
0x1336   : > { %5664 = vpow2.f32 %v4847_v60  ;;  %v4845_v63 = vmin.f32 %v4831_v61, 0.0  ;;  %vm4842_vm9 = vcmp.gt.f32.partialorder %v4831_v61, 0.0  ;;  %v5058_v60 = vld [vmem:[%s5929_s29] sm:$0xff] }
0x1337   : > { %v4835_v0 = vpop.f32.mrf.mxu1 }
0x1338   : > { %v4849_v1 = vmul.f32 1.442695, %v4845_v63  ;;  %v4836_v3 = vadd.f32 %v4835_v0, %v4767_v54  ;;  %v5059_v0 = vld [vmem:[%s5929_s29 + $0x8] sm:$0xff] }
0x1339   : > { %v4837_v6 = vpop.f32.mrf.mxu1 }
0x133a   : > { %5666 = vpow2.f32 %v4849_v1  ;;  %v4846_v7 = vmin.f32 %v4836_v3, 0.0  ;;  %vm4843_vm14 = vcmp.gt.f32.partialorder %v4836_v3, 0.0 }
0x133b   : > { %v4838_v8 = vpop.f32.mrf.mxu1 }
0x133c   : > { %v4851_v9 = vmul.f32 1.442695, %v4846_v7 }
0x133d   : > { %v4839_v10 = vpop.f32.mrf.mxu1 }
0x133e   : > { %5668 = vpow2.f32 %v4851_v9 }
0x1343   : > { %v5665_v11 = vpop.eup %5664 }
0x1344   : > { %v5363_v12 = vadd.f32 -1.0, %v5665_v11 }
0x1346   : > { %v4856_v13 = vsel %vm4841_vm0, %v4828_v56, %v5363_v12 }
0x1347   : > { %v5667_v24 = vpop.eup %5666  ;;  %4859 = vst.msk [vmem:[#allocation3] sm:$0xff] %vm3980_vm11, %v4856_v13 }
0x1348   : > { %v5364_v25 = vadd.f32 -1.0, %v5667_v24 }
0x134a   : > { %v4857_v26 = vsel %vm4842_vm9, %v4831_v61, %v5364_v25 }
0x134b   : > { %v5669_v44 = vpop.eup %5668  ;;  %4860 = vst.msk [vmem:[#allocation3 + $0x10] sm:$0xff] %vm3980_vm11, %v4857_v26 }
0x134c   : > { %v5365_v27 = vadd.f32 -1.0, %v5669_v44 }
0x134e   : > { %v4858_v28 = vsel %vm4843_vm14, %v4836_v3, %v5365_v27  ;;  %v4866_v32 = vld [vmem:[#allocation3] sm:$0xff] }
0x134f   : > { %4861 = vst.msk [vmem:[#allocation3 + $0x20] sm:$0xff] %vm3980_vm11, %v4858_v28 }
0x1352   : > { %v4867_v30 = vld [vmem:[#allocation3 + $0x10] sm:$0xff] }
0x1353   : > { %v4869_v36 = vpack.c.bf16 %v4867_v30, %v4866_v32 }
0x1356   : > { %v4868_v29 = vld [vmem:[#allocation3 + $0x20] sm:$0xff] }
0x1357   : > { %v4870_v31 = vpack.c.bf16 %v4868_v29, %v4868_v29 }
0x1359   : > { %5515 = vmatprep.subr.msk.bf16.mxu0 %vm1887_vm15, %v4870_v31  ;;  %v4913_v33 = vsel %vm1887_vm15, %v4870_v31, 0  ;;  %vm7288_vm15 = vmmov %vm7279_vm2 }
0x135a   : > { %5494 = vmatpush3.bf16.msra.mxu0 %v4913_v33 }
0x135b   : > { %5495 = vmatprep.subr.bf16.mxu0 %v4869_v36 }
0x135e   : > { %5496 = vmatpush3.bf16.msra.mxu0 %v4869_v36 }
0x135f   : > { %5507 = vmatprep.subr.bf16.mxu0 %v5723_v42 }
0x1361   : > { %5498 = vmatmul.mubr.msk.bf16.vlgmr.msra.gmra.mxu0 %vm4905_vm3, %v5632_v37 }
0x1362   : > { %5511 = vmatprep.mubr.msk.bf16.mxu0 %vm5732_vm6, %v5723_v42  ;;  %vm7289_vm6 = vmmov %vm7279_vm2 }
0x1421   : > { %v5499_v21 = vpop.f32.mrf.mxu0 }
0x1422   : > { %v4958_v22 = vadd.f32 %v5499_v21, %v4888_v20 }
0x1423   : > { %v4949_v23 = vpop.f32.mrf.mxu0 }
0x1424   : > { %4966 = vst.msk [vmem:[#allocation2 + $0x20] sm:$0xff] %vm3980_vm11, %v4958_v22  ;;  %v4950_v34 = vadd.f32 %v4949_v23, %v4878_v17 }
0x1425   : > { %v5500_v38 = vpop.f32.mrf.mxu0 }
0x1426   : > { %4964 = vst.msk [vmem:[#allocation2] sm:$0xff] %vm3980_vm11, %v4950_v34  ;;  %v4961_v39 = vadd.f32 %v5500_v38, %v4893_v35 }
0x1427   : > { %v4952_v40 = vpop.f32.mrf.mxu0 }
0x1428   : > { %4967 = vst.msk [vmem:[#allocation2 + $0x30] sm:$0xff] %vm3980_vm11, %v4961_v39  ;;  %v4953_v4 = vadd.f32 %v4952_v40, %v4883_v19 }
0x142a   : > { %4965 = vst.msk [vmem:[#allocation2 + $0x10] sm:$0xff] %vm3980_vm11, %v4953_v4 }
0x142b   : > { %v4970_v43 = vld [vmem:[#allocation2 + $0x20] sm:$0xff] }
0x142d   : > { %v4968_v46 = vld [vmem:[#allocation2] sm:$0xff] }
0x142f   : > { %v4971_v5 = vld [vmem:[#allocation2 + $0x30] sm:$0xff] }
0x1430   : > { %v4973_v45 = vpack.c.bf16 %v4971_v5, %v4970_v43 }
0x1431   : > { %v4969_v41 = vld [vmem:[#allocation2 + $0x10] sm:$0xff] }
0x1432   : > { %v4972_v47 = vpack.c.bf16 %v4969_v41, %v4968_v46 }
0x1434   : > { %5503 = vmatprep.mubr.msk.bf16.mxu1 %vm3980_vm11, %v4972_v47 }
0x1435   : > { %5504 = vmatmul.mubr.msk.bf16.vlgmr.msra.gmra.mxu1 %vm3980_vm11, %v4973_v45  ;;  %vm7293_vm11 = vmmov %vm7279_vm2 }
0x14f5   : > { %v5505_v49 = vpop.f32.mrf.mxu1 }
0x14f6   : > { %5036 = vst.msk [vmem:[#allocation3 + $0x20] sm:$0xff] %vm7288_vm15, %v5505_v49 }
0x14f7   : > { %v5019_v50 = vpop.f32.mrf.mxu1 }
0x14f8   : > { %5034 = vst.msk [vmem:[#allocation3] sm:$0xff] %vm7289_vm6, %v5019_v50 }
0x14f9   : > { %v5506_v2 = vpop.f32.mrf.mxu1 }
0x14fa   : > { %5037 = vst.msk [vmem:[#allocation3 + $0x30] sm:$0xff] %vm7290_vm4, %v5506_v2 }
0x14fb   : > { %v5022_v51 = vpop.f32.mrf.mxu1 }
0x14fc   : > { %5035 = vst.msk [vmem:[#allocation3 + $0x10] sm:$0xff] %vm7279_vm2, %v5022_v51 }
0x14fd   : > { %v5044_v52 = vld [vmem:[#allocation3 + $0x20] sm:$0xff] }
0x14fe   : > { %5048 = vst.msk [vmem:[#allocation4 + $0x20] sm:$0xff] %vm7291_vm12, %v5044_v52 }
0x14ff   : > { %v5042_v53 = vld [vmem:[#allocation3] sm:$0xff] }
0x1500   : > { %5046 = vst.msk [vmem:[#allocation4] sm:$0xff] %vm7292_vm13, %v5042_v53 }
0x1501   : > { %v5045_v55 = vld [vmem:[#allocation3 + $0x30] sm:$0xff] }
0x1502   : > { %5049 = vst.msk [vmem:[#allocation4 + $0x30] sm:$0xff] %vm7293_vm11, %v5045_v55 }
0x1503   : > { %v5043_v54 = vld [vmem:[#allocation3 + $0x10] sm:$0xff] }
0x1504   : > { %5047 = vst.msk [vmem:[#allocation4 + $0x10] sm:$0xff] %vm7294_vm7, %v5043_v54 }
0x1505   : > { %v5054_v18 = vld [vmem:[#allocation4 + $0x20] sm:$0xff] }
0x1507   : > { %v5052_v48 = vld [vmem:[#allocation4] sm:$0xff] }
0x1509   : > { %v5055_v15 = vld [vmem:[#allocation4 + $0x30] sm:$0xff] }
0x150a   : > { %v5057_v56 = vpack.c.bf16 %v5055_v15, %v5054_v18 }
0x150b   : > { %v5053_v57 = vld [vmem:[#allocation4 + $0x10] sm:$0xff] }
0x150c   : > { %5508 = vmatpush3.bf16.msra.mxu0 %v5057_v56  ;;  %v5056_v58 = vpack.c.bf16 %v5053_v57, %v5052_v48 }
0x150d   : > { %5509 = vmatprep.subr.bf16.mxu0 %v5723_v42 }
0x1510   : > { %5510 = vmatpush3.bf16.msra.mxu0 %v5056_v58 }
0x1513   : > { %5512 = vmatmul.mubr.msk.bf16.vlgmr.msra.gmra.mxu0 %vm5065_vm5, %v5633_v59 }
0x15d3   : > { %v5103_v61 = vpop.f32.mrf.mxu0 }
0x15d4   : > { %v5104_v62 = vadd.f32 %v5103_v61, %v5058_v60 }
0x15d5   : > { %v5513_v63 = vpop.f32.mrf.mxu0 }
0x15d6   : > { %5110 = vst.msk [vmem:[%s1126_s0] sm:$0xff] %vm7295_vm8, %v5104_v62 }
0x15d7   : > { %v5106_v1 = vpop.f32.mrf.mxu0 }
0x15d8   : > { %v5107_v3 = vadd.f32 %v5106_v1, %v5059_v0 }
0x15d9   : > { %v5514_v6 = vpop.f32.mrf.mxu0 }
0x15da   : > { %5111 = vst.msk [vmem:[%s1126_s0 + $0x8] sm:$0xff] %vm7296_vm10, %v5107_v3 }
0x15db PF: > { %s85_s7 = sadd.s32 1, %s5676_s7  }
0x15dc   : > { %p82_p4 = scmp.ge.s32.totalorder %s85_s7, 4  }
0x15de   :  { %84 = sbr.rel (!%p82_p4) target bundleno = 68 (0x44), region = 243 }

</bundles_post_ra>
